<compile_context>
chip_gen: v7x
topology: tpu7x:2x2x1
jax: 0.10.0
libtpu: 0.0.40
codegen_flags: <defaults>
</compile_context>

<pallas_src>
import jax
import jax.numpy as jnp
from jax.experimental import pallas as pl
from jax.experimental.pallas import tpu as pltpu

SRC_VOCAB = 32     # input-text vocabulary
TGT_VOCAB = 128    # decoder.output_size (summary vocabulary)
EMB = 32           # embedding dim
HID = 128          # GRU hidden dim
SRC_LEN = 8        # text length  (text.shape = (SRC_LEN, BATCH))
SUM_LEN = 6        # max summary length (summary.shape = (SUM_LEN, BATCH))
BATCH = 8


# --------------------------------------------------------------------------
# Encoder: 1-layer GRU over the source sequence, fused into a single kernel.
# The x @ W_ih projection is hoisted out of the recurrence (M = S*B rows).
# --------------------------------------------------------------------------
def _encoder_kernel(x_ref, wih_ref, whh_ref, bih_ref, bhh_ref, enc_out_ref):
    S, B, E = x_ref.shape
    H = whh_ref.shape[0]

    # Batched input-to-hidden projection for all timesteps at once (MXU, bf16).
    x = x_ref[...].reshape(S * B, E).astype(jnp.bfloat16)
    gi_all = (jnp.dot(x, wih_ref[...], preferred_element_type=jnp.float32)
              + bih_ref[...]).reshape(S, B, 3 * H)

    whh = whh_ref[...]          # bf16
    bhh = bhh_ref[...]          # f32
    h = jnp.zeros((B, H), jnp.float32)
    for t in range(S):          # S is small & static: full unroll
        gi = gi_all[t]
        gh = (jnp.dot(h.astype(jnp.bfloat16), whh,
                      preferred_element_type=jnp.float32) + bhh)
        r = jax.nn.sigmoid(gi[:, :H] + gh[:, :H])
        z = jax.nn.sigmoid(gi[:, H:2 * H] + gh[:, H:2 * H])
        n = jnp.tanh(gi[:, 2 * H:] + r * gh[:, 2 * H:])
        h = (1.0 - z) * n + z * h
        enc_out_ref[t] = h


def run_encoder(x_emb, wih, whh, bih, bhh):
    S, B, _ = x_emb.shape
    H = whh.shape[0]
    return pl.pallas_call(
        _encoder_kernel,
        out_shape=jax.ShapeDtypeStruct((S, B, H), jnp.float32),
        in_specs=[pl.BlockSpec(memory_space=pltpu.MemorySpace.VMEM)] * 5,
        out_specs=pl.BlockSpec(memory_space=pltpu.MemorySpace.VMEM),
    )(x_emb, wih, whh, bih, bhh)


# --------------------------------------------------------------------------
# Decoder: the entire generation loop in ONE pallas_call, grid=(max_len-1,).
#   scalar prefetch : per-step teacher-forcing flags (SMEM)
#   VMEM scratch    : hidden state, previous-token one-hot, precomputed enc@We
# --------------------------------------------------------------------------
def _decoder_kernel(tf_ref,                                    # SMEM (T-1,) int32
                    sum_oh_ref, h0_ref, enc_ref, dec_emb_ref,
                    att_wh_ref, att_we_ref, att_b_ref, att_v_ref,
                    wih_e_ref, wih_c_ref, whh_ref, bih_ref, bhh_ref,
                    wout_ref, bout_ref,
                    logp_ref,                                  # out block (1, B, V)
                    h_scr, tok_scr, ep_scr):
    i = pl.program_id(0)
    S, B, H = enc_ref.shape
    V = wout_ref.shape[1]

    @pl.when(i == 0)
    def _():
        h_scr[...] = h0_ref[...]
        tok_scr[...] = sum_oh_ref[0]                           # <sos> row, one-hot
        # step-invariant attention projection, computed once
        enc_flat = enc_ref[...].reshape(S * B, H).astype(jnp.bfloat16)
        ep_scr[...] = jnp.dot(enc_flat, att_we_ref[...],
                              preferred_element_type=jnp.float32).reshape(S, B, H)

    h = h_scr[...]                                             # (B, H) f32
    tok_oh = tok_scr[...]                                      # (B, V) f32

    # ---- embedding lookup in-kernel: one-hot @ table (MXU, bf16) ----
    emb = jnp.dot(tok_oh.astype(jnp.bfloat16), dec_emb_ref[...],
                  preferred_element_type=jnp.float32)          # (B, E)

    # ---- Bahdanau additive attention: v . tanh(Wh h + We enc + b) ----
    hp = jnp.dot(h.astype(jnp.bfloat16), att_wh_ref[...],
                 preferred_element_type=jnp.float32)           # (B, H)
    energy = jnp.tanh(ep_scr[...] + hp[None, :, :] + att_b_ref[...].reshape(1, 1, H))
    scores = jnp.sum(energy * att_v_ref[...].reshape(1, 1, H),
                     axis=-1, keepdims=True)                   # (S, B, 1)
    attn = jax.nn.softmax(scores, axis=0)                      # (S, B, 1)
    context = jnp.sum(attn * enc_ref[...], axis=0)             # (B, H) f32

    # ---- GRU cell, input = [emb ; context] (split weights avoid concat) ----
    gi = (jnp.dot(emb.astype(jnp.bfloat16), wih_e_ref[...],
                  preferred_element_type=jnp.float32)
          + jnp.dot(context.astype(jnp.bfloat16), wih_c_ref[...],
                    preferred_element_type=jnp.float32)
          + bih_ref[...])
    gh = (jnp.dot(h.astype(jnp.bfloat16), whh_ref[...],
                  preferred_element_type=jnp.float32) + bhh_ref[...])
    r = jax.nn.sigmoid(gi[:, :H] + gh[:, :H])
    z = jax.nn.sigmoid(gi[:, H:2 * H] + gh[:, H:2 * H])
    n = jnp.tanh(gi[:, 2 * H:] + r * gh[:, 2 * H:])
    h_new = (1.0 - z) * n + z * h

    # ---- fused output projection over [h_new ; context] (single K=2H pass) ----
    hc = jnp.concatenate([h_new, context], axis=-1).astype(jnp.bfloat16)   # (B, 2H)
    logits = jnp.dot(hc, wout_ref[...], preferred_element_type=jnp.float32) + bout_ref[...]
    logp = jax.nn.log_softmax(logits, axis=-1)                 # (B, V)

    logp_ref[0] = logp
    h_scr[...] = h_new

    # ---- next input token: summary[t] if teacher-forced else argmax(logp), t = i+1 ----
    lane = jax.lax.broadcasted_iota(jnp.int32, (B, V), 1)
    m = jnp.max(logp, axis=-1, keepdims=True)
    first_max = jnp.min(jnp.where(logp == m, lane, V), axis=-1, keepdims=True)  # (B, 1)
    top1_oh = (lane == first_max).astype(jnp.float32)          # ties -> lowest index
    is_teacher = tf_ref[i] != 0
    tok_scr[...] = jnp.where(is_teacher, sum_oh_ref[i + 1], top1_oh)


def _const_spec(shape):
    nd = len(shape)
    return pl.BlockSpec(shape, lambda i, tf, _nd=nd: (0,) * _nd)


def run_decoder(tf_flags, sum_oh, h0, enc_out, dec_emb,
                att_wh, att_we, att_b, att_v,
                wih_e, wih_c, whh, bih, bhh, wout, bout):
    T1 = sum_oh.shape[0] - 1                # max_len - 1 decode steps
    S, B, H = enc_out.shape
    V = wout.shape[1]
    ins = (sum_oh, h0, enc_out, dec_emb, att_wh, att_we, att_b, att_v,
           wih_e, wih_c, whh, bih, bhh, wout, bout)
    grid_spec = pltpu.PrefetchScalarGridSpec(
        num_scalar_prefetch=1,
        grid=(T1,),
        in_specs=[_const_spec(a.shape) for a in ins],
        out_specs=pl.BlockSpec((1, B, V), lambda i, tf: (i, 0, 0)),
        scratch_shapes=[pltpu.VMEM((B, H), jnp.float32),      # hidden carry
                        pltpu.VMEM((B, V), jnp.float32),      # prev-token one-hot
                        pltpu.VMEM((S, B, H), jnp.float32)],  # precomputed enc @ W_e
    )
    return pl.pallas_call(
        _decoder_kernel,
        out_shape=jax.ShapeDtypeStruct((T1, B, V), jnp.float32),
        grid_spec=grid_spec,
        compiler_params=pltpu.CompilerParams(dimension_semantics=("arbitrary",)),
    )(tf_flags, *ins)


# --------------------------------------------------------------------------
# Parameter init (deterministic, synthetic).
# --------------------------------------------------------------------------
def init_params(key):
    ks = jax.random.split(key, 18)
    w = lambda k, shape: jax.random.normal(k, shape, jnp.float32) * 0.1
    H, E = HID, EMB
    return dict(
        enc_emb=w(ks[0], (SRC_VOCAB, E)),
        enc_wih=w(ks[1], (E, 3 * H)),
        enc_whh=w(ks[2], (H, 3 * H)),
        enc_bih=w(ks[3], (1, 3 * H)),
        enc_bhh=w(ks[4], (1, 3 * H)),
        dec_emb=w(ks[5], (TGT_VOCAB, E)),
        att_wh=w(ks[6], (H, H)),
        att_we=w(ks[7], (H, H)),
        att_b=w(ks[8], (1, H)),
        att_v=w(ks[9], (1, H)),
        dec_wih_e=w(ks[10], (E, 3 * H)),
        dec_wih_c=w(ks[11], (H, 3 * H)),
        dec_whh=w(ks[12], (H, 3 * H)),
        dec_bih=w(ks[13], (1, 3 * H)),
        dec_bhh=w(ks[14], (1, 3 * H)),
        out_wh=w(ks[15], (H, TGT_VOCAB)),
        out_wc=w(ks[16], (H, TGT_VOCAB)),
        out_b=w(ks[17], (1, TGT_VOCAB)),
    )


# --------------------------------------------------------------------------
# Seq2Seq.forward equivalent (jitted end-to-end; 2 pallas_calls total).
# --------------------------------------------------------------------------
def _forward_impl(text, summary, params, tf_key, teacher_forcing_ratio):
    """text: (src_len, batch) int32; summary: (max_len, batch) int32.
    Returns outputs: (max_len, batch, vocab) float32 (outputs[0] stays zero)."""
    max_len, batch = summary.shape
    V = TGT_VOCAB
    bf = lambda a: a.astype(jnp.bfloat16)

    # ---- encoder ----
    x_emb = jnp.take(params["enc_emb"], text, axis=0)                     # (S,B,E) glue gather
    enc_out = run_encoder(x_emb, bf(params["enc_wih"]), bf(params["enc_whh"]),
                          params["enc_bih"], params["enc_bhh"])           # (S,B,H)
    hidden0 = enc_out[-1]                                                 # 1-layer GRU final hidden

    # ---- decoder (whole time loop fused into one kernel) ----
    # teacher forcing: per-step flags as data (replaces host random.random())
    tf_flags = (jax.random.uniform(tf_key, (max_len - 1,))
                < teacher_forcing_ratio).astype(jnp.int32)
    sum_oh = jax.nn.one_hot(summary, V, dtype=jnp.float32)                # (max_len,B,V)
    wout = jnp.concatenate([params["out_wh"], params["out_wc"]], axis=0)  # (2H, V)
    logp_all = run_decoder(tf_flags, sum_oh, hidden0, enc_out,
                           bf(params["dec_emb"]),
                           bf(params["att_wh"]), bf(params["att_we"]),
                           params["att_b"], params["att_v"],
                           bf(params["dec_wih_e"]), bf(params["dec_wih_c"]),
                           bf(params["dec_whh"]),
                           params["dec_bih"], params["dec_bhh"],
                           bf(wout), params["out_b"])                     # (max_len-1,B,V)

    # outputs[0] stays zero, exactly like torch.FloatTensor(...).fill_(0)
    return jnp.concatenate([jnp.zeros((1, batch, V), jnp.float32), logp_all], axis=0)


seq2seq_forward = jax.jit(_forward_impl)


if __name__ == "__main__":
    key = jax.random.PRNGKey(0)
    kp, kt, ks, ktf = jax.random.split(key, 4)
    params = init_params(kp)
    text = jax.random.randint(kt, (SRC_LEN, BATCH), 0, SRC_VOCAB, dtype=jnp.int32)
    summary = jax.random.randint(ks, (SUM_LEN, BATCH), 0, TGT_VOCAB, dtype=jnp.int32)

    outputs = seq2seq_forward(text, summary, params, ktf, 0.5)
    outputs = jax.block_until_ready(outputs)
    assert outputs.shape == (SUM_LEN, BATCH, TGT_VOCAB)
    assert bool(jnp.all(jnp.isfinite(outputs)))
    print("KERNEL_OK")
</pallas_src>

<mosaic_0001>
module attributes {stable_mosaic.version = 11 : i64} {
  func.func @_decoder_kernel(%arg0: i32, %arg1: memref<5xi32, #tpu.memory_space<smem>>, %arg2: memref<6x8x128xf32, #tpu.memory_space<vmem>>, %arg3: memref<8x128xf32, #tpu.memory_space<vmem>>, %arg4: memref<8x8x128xf32, #tpu.memory_space<vmem>>, %arg5: memref<128x32xbf16, #tpu.memory_space<vmem>>, %arg6: memref<128x128xbf16, #tpu.memory_space<vmem>>, %arg7: memref<128x128xbf16, #tpu.memory_space<vmem>>, %arg8: memref<1x128xf32, #tpu.memory_space<vmem>>, %arg9: memref<1x128xf32, #tpu.memory_space<vmem>>, %arg10: memref<32x384xbf16, #tpu.memory_space<vmem>>, %arg11: memref<128x384xbf16, #tpu.memory_space<vmem>>, %arg12: memref<128x384xbf16, #tpu.memory_space<vmem>>, %arg13: memref<1x384xf32, #tpu.memory_space<vmem>>, %arg14: memref<1x384xf32, #tpu.memory_space<vmem>>, %arg15: memref<256x128xbf16, #tpu.memory_space<vmem>>, %arg16: memref<1x128xf32, #tpu.memory_space<vmem>>, %arg17: memref<1x8x128xf32, #tpu.memory_space<vmem>>, %arg18: memref<8x128xf32, #tpu.memory_space<vmem>>, %arg19: memref<8x128xf32, #tpu.memory_space<vmem>>, %arg20: memref<8x8x128xf32, #tpu.memory_space<vmem>>) attributes {dimension_semantics = [#tpu.dimension_semantics<arbitrary>], iteration_bounds = array<i64: 5>, scalar_prefetch = 1 : i64, scratch_operands = 3 : i64, tpu.core_type = #tpu.core_type<tc>, window_params = [{pipeline_mode = #tpu.pipeline_mode<synchronous>, transform_indices = @transform_0, window_bounds = array<i64: 6, 8, 128>}, {pipeline_mode = #tpu.pipeline_mode<synchronous>, transform_indices = @transform_1, window_bounds = array<i64: 8, 128>}, {pipeline_mode = #tpu.pipeline_mode<synchronous>, transform_indices = @transform_2, window_bounds = array<i64: 8, 8, 128>}, {pipeline_mode = #tpu.pipeline_mode<synchronous>, transform_indices = @transform_3, window_bounds = array<i64: 128, 32>}, {pipeline_mode = #tpu.pipeline_mode<synchronous>, transform_indices = @transform_4, window_bounds = array<i64: 128, 128>}, {pipeline_mode = #tpu.pipeline_mode<synchronous>, transform_indices = @transform_5, window_bounds = array<i64: 128, 128>}, {pipeline_mode = #tpu.pipeline_mode<synchronous>, transform_indices = @transform_6, window_bounds = array<i64: 1, 128>}, {pipeline_mode = #tpu.pipeline_mode<synchronous>, transform_indices = @transform_7, window_bounds = array<i64: 1, 128>}, {pipeline_mode = #tpu.pipeline_mode<synchronous>, transform_indices = @transform_8, window_bounds = array<i64: 32, 384>}, {pipeline_mode = #tpu.pipeline_mode<synchronous>, transform_indices = @transform_9, window_bounds = array<i64: 128, 384>}, {pipeline_mode = #tpu.pipeline_mode<synchronous>, transform_indices = @transform_10, window_bounds = array<i64: 128, 384>}, {pipeline_mode = #tpu.pipeline_mode<synchronous>, transform_indices = @transform_11, window_bounds = array<i64: 1, 384>}, {pipeline_mode = #tpu.pipeline_mode<synchronous>, transform_indices = @transform_12, window_bounds = array<i64: 1, 384>}, {pipeline_mode = #tpu.pipeline_mode<synchronous>, transform_indices = @transform_13, window_bounds = array<i64: 256, 128>}, {pipeline_mode = #tpu.pipeline_mode<synchronous>, transform_indices = @transform_14, window_bounds = array<i64: 1, 128>}, {transform_indices = @transform_15, window_bounds = array<i64: 1, 8, 128>}]} {
    %c0_i32 = arith.constant 0 : i32
    %0 = arith.cmpi eq, %arg0, %c0_i32 : i32
    %1 = arith.extui %0 : i1 to i32
    %c0_i32_0 = arith.constant 0 : i32
    %2 = arith.cmpi ne, %1, %c0_i32_0 : i32
    scf.if %2 {
      %c0_60 = arith.constant 0 : index
      %c0_61 = arith.constant 0 : index
      %128 = vector.load %arg3[%c0_60, %c0_61] : memref<8x128xf32, #tpu.memory_space<vmem>>, vector<8x128xf32>
      %c0_62 = arith.constant 0 : index
      %c0_63 = arith.constant 0 : index
      %129 = vector.load %arg18[%c0_62, %c0_63] : memref<8x128xf32, #tpu.memory_space<vmem>>, vector<8x128xf32>
      tpu.vector_store %arg18[%c0_62, %c0_63], %128 {strides = array<i32>} : memref<8x128xf32, #tpu.memory_space<vmem>>, vector<8x128xf32>,
      %c0_64 = arith.constant 0 : index
      %c0_65 = arith.constant 0 : index
      %c0_66 = arith.constant 0 : index
      %130 = vector.load %arg2[%c0_64, %c0_65, %c0_66] : memref<6x8x128xf32, #tpu.memory_space<vmem>>, vector<1x8x128xf32>
      %131 = vector.shape_cast %130 : vector<1x8x128xf32> to vector<8x128xf32>
      %c0_67 = arith.constant 0 : index
      %c0_68 = arith.constant 0 : index
      %132 = vector.load %arg19[%c0_67, %c0_68] : memref<8x128xf32, #tpu.memory_space<vmem>>, vector<8x128xf32>
      tpu.vector_store %arg19[%c0_67, %c0_68], %131 {strides = array<i32>} : memref<8x128xf32, #tpu.memory_space<vmem>>, vector<8x128xf32>,
      %c0_69 = arith.constant 0 : index
      %c0_70 = arith.constant 0 : index
      %c0_71 = arith.constant 0 : index
      %133 = vector.load %arg4[%c0_69, %c0_70, %c0_71] : memref<8x8x128xf32, #tpu.memory_space<vmem>>, vector<8x8x128xf32>
      %134 = vector.shape_cast %133 : vector<8x8x128xf32> to vector<64x128xf32>
      %135 = arith.truncf %134 : vector<64x128xf32> to vector<64x128xbf16>
      %c0_72 = arith.constant 0 : index
      %c0_73 = arith.constant 0 : index
      %136 = vector.load %arg7[%c0_72, %c0_73] : memref<128x128xbf16, #tpu.memory_space<vmem>>, vector<128x128xbf16>
      %cst_74 = arith.constant dense<0.000000e+00> : vector<64x128xf32>
      %137 = tpu.matmul %135, %136, %cst_74 {dimension_numbers = #tpu.dot_dimension_numbers<[1], [0], [0], [1], [0, 0, 1, 1], [], []>} : vector<64x128xbf16>, vector<128x128xbf16>, vector<64x128xf32> -> vector<64x128xf32>
      %138 = vector.shape_cast %137 : vector<64x128xf32> to vector<8x8x128xf32>
      %c0_75 = arith.constant 0 : index
      %c0_76 = arith.constant 0 : index
      %c0_77 = arith.constant 0 : index
      %139 = vector.load %arg20[%c0_75, %c0_76, %c0_77] : memref<8x8x128xf32, #tpu.memory_space<vmem>>, vector<8x8x128xf32>
      tpu.vector_store %arg20[%c0_75, %c0_76, %c0_77], %138 {strides = array<i32>} : memref<8x8x128xf32, #tpu.memory_space<vmem>>, vector<8x8x128xf32>,
    } else {
    }
    %c0 = arith.constant 0 : index
    %c0_1 = arith.constant 0 : index
    %3 = vector.load %arg18[%c0, %c0_1] : memref<8x128xf32, #tpu.memory_space<vmem>>, vector<8x128xf32>
    %c0_2 = arith.constant 0 : index
    %c0_3 = arith.constant 0 : index
    %4 = vector.load %arg19[%c0_2, %c0_3] : memref<8x128xf32, #tpu.memory_space<vmem>>, vector<8x128xf32>
    %5 = arith.truncf %4 : vector<8x128xf32> to vector<8x128xbf16>
    %c0_4 = arith.constant 0 : index
    %c0_5 = arith.constant 0 : index
    %6 = vector.load %arg5[%c0_4, %c0_5] : memref<128x32xbf16, #tpu.memory_space<vmem>>, vector<128x32xbf16>
    %cst = arith.constant dense<0.000000e+00> : vector<8x32xf32>
    %7 = tpu.matmul %5, %6, %cst {dimension_numbers = #tpu.dot_dimension_numbers<[1], [0], [0], [1], [0, 0, 1, 1], [], []>} : vector<8x128xbf16>, vector<128x32xbf16>, vector<8x32xf32> -> vector<8x32xf32>
    %8 = arith.truncf %3 : vector<8x128xf32> to vector<8x128xbf16>
    %c0_6 = arith.constant 0 : index
    %c0_7 = arith.constant 0 : index
    %9 = vector.load %arg6[%c0_6, %c0_7] : memref<128x128xbf16, #tpu.memory_space<vmem>>, vector<128x128xbf16>
    %cst_8 = arith.constant dense<0.000000e+00> : vector<8x128xf32>
    %10 = tpu.matmul %8, %9, %cst_8 {dimension_numbers = #tpu.dot_dimension_numbers<[1], [0], [0], [1], [0, 0, 1, 1], [], []>} : vector<8x128xbf16>, vector<128x128xbf16>, vector<8x128xf32> -> vector<8x128xf32>
    %c0_9 = arith.constant 0 : index
    %c0_10 = arith.constant 0 : index
    %c0_11 = arith.constant 0 : index
    %11 = vector.load %arg20[%c0_9, %c0_10, %c0_11] : memref<8x8x128xf32, #tpu.memory_space<vmem>>, vector<8x8x128xf32>
    %12 = vector.shape_cast %10 : vector<8x128xf32> to vector<1x8x128xf32>
    %13 = vector.broadcast %12 : vector<1x8x128xf32> to vector<8x8x128xf32>
    %14 = arith.addf %11, %13 : vector<8x8x128xf32>
    %c0_12 = arith.constant 0 : index
    %c0_13 = arith.constant 0 : index
    %15 = vector.load %arg8[%c0_12, %c0_13] : memref<1x128xf32, #tpu.memory_space<vmem>>, vector<1x128xf32>
    %16 = vector.shape_cast %15 : vector<1x128xf32> to vector<1x1x128xf32>
    %17 = vector.broadcast %16 : vector<1x1x128xf32> to vector<8x8x128xf32>
    %18 = arith.addf %14, %17 : vector<8x8x128xf32>
    %19 = math.tanh %18 : vector<8x8x128xf32>
    %c0_14 = arith.constant 0 : index
    %c0_15 = arith.constant 0 : index
    %20 = vector.load %arg9[%c0_14, %c0_15] : memref<1x128xf32, #tpu.memory_space<vmem>>, vector<1x128xf32>
    %21 = vector.shape_cast %20 : vector<1x128xf32> to vector<1x1x128xf32>
    %22 = vector.broadcast %21 : vector<1x1x128xf32> to vector<8x8x128xf32>
    %23 = arith.mulf %19, %22 : vector<8x8x128xf32>
    %cst_16 = arith.constant dense<0.000000e+00> : vector<8x8xf32>
    %24 = vector.multi_reduction <add>, %23, %cst_16 [2] : vector<8x8x128xf32> to vector<8x8xf32>
    %25 = vector.shape_cast %24 : vector<8x8xf32> to vector<8x8x1xf32>
    %cst_17 = arith.constant dense<0xFF800000> : vector<8x1xf32>
    %26 = vector.multi_reduction <maximumf>, %25, %cst_17 [0] : vector<8x8x1xf32> to vector<8x1xf32>
    %cst_18 = arith.constant 0xFF800000 : f32
    %27 = vector.broadcast %cst_18 : f32 to vector<8x1xf32>
    %28 = arith.maximumf %27, %26 : vector<8x1xf32>
    %29 = vector.shape_cast %28 : vector<8x1xf32> to vector<1x8x1xf32>
    %30 = vector.broadcast %29 : vector<1x8x1xf32> to vector<8x8x1xf32>
    %31 = arith.subf %25, %30 : vector<8x8x1xf32>
    %32 = math.exp %31 : vector<8x8x1xf32>
    %cst_19 = arith.constant dense<0.000000e+00> : vector<8x1xf32>
    %33 = vector.multi_reduction <add>, %32, %cst_19 [0] : vector<8x8x1xf32> to vector<8x1xf32>
    %34 = vector.shape_cast %33 : vector<8x1xf32> to vector<1x8x1xf32>
    %35 = vector.broadcast %34 : vector<1x8x1xf32> to vector<8x8x1xf32>
    %36 = arith.divf %32, %35 : vector<8x8x1xf32>
    %c0_20 = arith.constant 0 : index
    %c0_21 = arith.constant 0 : index
    %c0_22 = arith.constant 0 : index
    %37 = vector.load %arg4[%c0_20, %c0_21, %c0_22] : memref<8x8x128xf32, #tpu.memory_space<vmem>>, vector<8x8x128xf32>
    %38 = vector.broadcast %36 : vector<8x8x1xf32> to vector<8x8x128xf32>
    %39 = arith.mulf %38, %37 : vector<8x8x128xf32>
    %cst_23 = arith.constant dense<0.000000e+00> : vector<8x128xf32>
    %40 = vector.multi_reduction <add>, %39, %cst_23 [0] : vector<8x8x128xf32> to vector<8x128xf32>
    %41 = arith.truncf %7 : vector<8x32xf32> to vector<8x32xbf16>
    %c0_24 = arith.constant 0 : index
    %c0_25 = arith.constant 0 : index
    %42 = vector.load %arg10[%c0_24, %c0_25] : memref<32x384xbf16, #tpu.memory_space<vmem>>, vector<32x384xbf16>
    %cst_26 = arith.constant dense<0.000000e+00> : vector<8x384xf32>
    %43 = tpu.matmul %41, %42, %cst_26 {dimension_numbers = #tpu.dot_dimension_numbers<[1], [0], [0], [1], [0, 0, 1, 1], [], []>} : vector<8x32xbf16>, vector<32x384xbf16>, vector<8x384xf32> -> vector<8x384xf32>
    %44 = arith.truncf %40 : vector<8x128xf32> to vector<8x128xbf16>
    %c0_27 = arith.constant 0 : index
    %c0_28 = arith.constant 0 : index
    %45 = vector.load %arg11[%c0_27, %c0_28] : memref<128x384xbf16, #tpu.memory_space<vmem>>, vector<128x384xbf16>
    %cst_29 = arith.constant dense<0.000000e+00> : vector<8x384xf32>
    %46 = tpu.matmul %44, %45, %cst_29 {dimension_numbers = #tpu.dot_dimension_numbers<[1], [0], [0], [1], [0, 0, 1, 1], [], []>} : vector<8x128xbf16>, vector<128x384xbf16>, vector<8x384xf32> -> vector<8x384xf32>
    %47 = arith.addf %43, %46 : vector<8x384xf32>
    %c0_30 = arith.constant 0 : index
    %c0_31 = arith.constant 0 : index
    %48 = vector.load %arg13[%c0_30, %c0_31] : memref<1x384xf32, #tpu.memory_space<vmem>>, vector<1x384xf32>
    %49 = vector.broadcast %48 : vector<1x384xf32> to vector<8x384xf32>
    %50 = arith.addf %47, %49 : vector<8x384xf32>
    %51 = arith.truncf %3 : vector<8x128xf32> to vector<8x128xbf16>
    %c0_32 = arith.constant 0 : index
    %c0_33 = arith.constant 0 : index
    %52 = vector.load %arg12[%c0_32, %c0_33] : memref<128x384xbf16, #tpu.memory_space<vmem>>, vector<128x384xbf16>
    %cst_34 = arith.constant dense<0.000000e+00> : vector<8x384xf32>
    %53 = tpu.matmul %51, %52, %cst_34 {dimension_numbers = #tpu.dot_dimension_numbers<[1], [0], [0], [1], [0, 0, 1, 1], [], []>} : vector<8x128xbf16>, vector<128x384xbf16>, vector<8x384xf32> -> vector<8x384xf32>
    %c0_35 = arith.constant 0 : index
    %c0_36 = arith.constant 0 : index
    %54 = vector.load %arg14[%c0_35, %c0_36] : memref<1x384xf32, #tpu.memory_space<vmem>>, vector<1x384xf32>
    %55 = vector.broadcast %54 : vector<1x384xf32> to vector<8x384xf32>
    %56 = arith.addf %53, %55 : vector<8x384xf32>
    %57 = vector.extract_strided_slice %50 {offsets = [0, 0], sizes = [8, 128], strides = [1, 1]} : vector<8x384xf32> to vector<8x128xf32>
    %58 = vector.extract_strided_slice %56 {offsets = [0, 0], sizes = [8, 128], strides = [1, 1]} : vector<8x384xf32> to vector<8x128xf32>
    %59 = arith.addf %57, %58 : vector<8x128xf32>
    %60 = arith.negf %59 : vector<8x128xf32>
    %61 = math.exp %60 : vector<8x128xf32>
    %cst_37 = arith.constant 1.000000e+00 : f32
    %62 = vector.broadcast %cst_37 : f32 to vector<8x128xf32>
    %63 = arith.addf %62, %61 : vector<8x128xf32>
    %64 = arith.divf %62, %63 : vector<8x128xf32>
    %65 = vector.extract_strided_slice %50 {offsets = [0, 128], sizes = [8, 128], strides = [1, 1]} : vector<8x384xf32> to vector<8x128xf32>
    %66 = vector.extract_strided_slice %56 {offsets = [0, 128], sizes = [8, 128], strides = [1, 1]} : vector<8x384xf32> to vector<8x128xf32>
    %67 = arith.addf %65, %66 : vector<8x128xf32>
    %68 = arith.negf %67 : vector<8x128xf32>
    %69 = math.exp %68 : vector<8x128xf32>
    %cst_38 = arith.constant 1.000000e+00 : f32
    %70 = vector.broadcast %cst_38 : f32 to vector<8x128xf32>
    %71 = arith.addf %70, %69 : vector<8x128xf32>
    %72 = arith.divf %70, %71 : vector<8x128xf32>
    %73 = vector.extract_strided_slice %50 {offsets = [0, 256], sizes = [8, 128], strides = [1, 1]} : vector<8x384xf32> to vector<8x128xf32>
    %74 = vector.extract_strided_slice %56 {offsets = [0, 256], sizes = [8, 128], strides = [1, 1]} : vector<8x384xf32> to vector<8x128xf32>
    %75 = arith.mulf %64, %74 : vector<8x128xf32>
    %76 = arith.addf %73, %75 : vector<8x128xf32>
    %77 = math.tanh %76 : vector<8x128xf32>
    %cst_39 = arith.constant 1.000000e+00 : f32
    %78 = vector.broadcast %cst_39 : f32 to vector<8x128xf32>
    %79 = arith.subf %78, %72 : vector<8x128xf32>
    %80 = arith.mulf %79, %77 : vector<8x128xf32>
    %81 = arith.mulf %72, %3 : vector<8x128xf32>
    %82 = arith.addf %80, %81 : vector<8x128xf32>
    %83 = tpu.concatenate %82, %40 in 1 : vector<8x128xf32>, vector<8x128xf32> -> vector<8x256xf32>
    %84 = arith.truncf %83 : vector<8x256xf32> to vector<8x256xbf16>
    %c0_40 = arith.constant 0 : index
    %c0_41 = arith.constant 0 : index
    %85 = vector.load %arg15[%c0_40, %c0_41] : memref<256x128xbf16, #tpu.memory_space<vmem>>, vector<256x128xbf16>
    %cst_42 = arith.constant dense<0.000000e+00> : vector<8x128xf32>
    %86 = tpu.matmul %84, %85, %cst_42 {dimension_numbers = #tpu.dot_dimension_numbers<[1], [0], [0], [1], [0, 0, 1, 1], [], []>} : vector<8x256xbf16>, vector<256x128xbf16>, vector<8x128xf32> -> vector<8x128xf32>
    %c0_43 = arith.constant 0 : index
    %c0_44 = arith.constant 0 : index
    %87 = vector.load %arg16[%c0_43, %c0_44] : memref<1x128xf32, #tpu.memory_space<vmem>>, vector<1x128xf32>
    %88 = vector.broadcast %87 : vector<1x128xf32> to vector<8x128xf32>
    %89 = arith.addf %86, %88 : vector<8x128xf32>
    %cst_45 = arith.constant dense<0xFF800000> : vector<8xf32>
    %90 = vector.multi_reduction <maximumf>, %89, %cst_45 [1] : vector<8x128xf32> to vector<8xf32>
    %cst_46 = arith.constant 0xFF800000 : f32
    %91 = vector.broadcast %cst_46 : f32 to vector<8xf32>
    %92 = arith.maximumf %91, %90 : vector<8xf32>
    %93 = vector.shape_cast %92 : vector<8xf32> to vector<8x1xf32>
    %94 = vector.broadcast %93 : vector<8x1xf32> to vector<8x128xf32>
    %95 = arith.subf %89, %94 : vector<8x128xf32>
    %96 = math.exp %95 : vector<8x128xf32>
    %cst_47 = arith.constant dense<0.000000e+00> : vector<8xf32>
    %97 = vector.multi_reduction <add>, %96, %cst_47 [1] : vector<8x128xf32> to vector<8xf32>
    %98 = vector.shape_cast %97 : vector<8xf32> to vector<8x1xf32>
    %99 = math.log %98 : vector<8x1xf32>
    %100 = vector.broadcast %99 : vector<8x1xf32> to vector<8x128xf32>
    %101 = arith.subf %95, %100 : vector<8x128xf32>
    %c0_48 = arith.constant 0 : index
    %c0_49 = arith.constant 0 : index
    %c0_50 = arith.constant 0 : index
    %102 = vector.load %arg17[%c0_48, %c0_49, %c0_50] : memref<1x8x128xf32, #tpu.memory_space<vmem>>, vector<1x8x128xf32>
    %103 = vector.shape_cast %102 : vector<1x8x128xf32> to vector<8x128xf32>
    %104 = vector.shape_cast %101 : vector<8x128xf32> to vector<1x8x128xf32>
    tpu.vector_store %arg17[%c0_48, %c0_49, %c0_50], %104 {strides = array<i32>} : memref<1x8x128xf32, #tpu.memory_space<vmem>>, vector<1x8x128xf32>,
    %c0_51 = arith.constant 0 : index
    %c0_52 = arith.constant 0 : index
    %105 = vector.load %arg18[%c0_51, %c0_52] : memref<8x128xf32, #tpu.memory_space<vmem>>, vector<8x128xf32>
    tpu.vector_store %arg18[%c0_51, %c0_52], %82 {strides = array<i32>} : memref<8x128xf32, #tpu.memory_space<vmem>>, vector<8x128xf32>,
    %106 = tpu.iota {dimensions = array<i32: 1>} : vector<8x128xi32>
    %cst_53 = arith.constant dense<0xFF800000> : vector<8xf32>
    %107 = vector.multi_reduction <maximumf>, %101, %cst_53 [1] : vector<8x128xf32> to vector<8xf32>
    %108 = vector.shape_cast %107 : vector<8xf32> to vector<8x1xf32>
    %109 = vector.broadcast %108 : vector<8x1xf32> to vector<8x128xf32>
    %110 = arith.cmpf oeq, %101, %109 : vector<8x128xf32>
    %c128_i32 = arith.constant 128 : i32
    %111 = vector.broadcast %c128_i32 : i32 to vector<8x128xi32>
    %112 = arith.select %110, %106, %111 : vector<8x128xi1>, vector<8x128xi32>
    %cst_54 = arith.constant dense<2147483647> : vector<8xi32>
    %113 = vector.multi_reduction <minsi>, %112, %cst_54 [1] : vector<8x128xi32> to vector<8xi32>
    %114 = vector.shape_cast %113 : vector<8xi32> to vector<8x1xi32>
    %115 = vector.broadcast %114 : vector<8x1xi32> to vector<8x128xi32>
    %116 = arith.cmpi eq, %106, %115 : vector<8x128xi32>
    %117 = arith.extui %116 : vector<8x128xi1> to vector<8x128xi32>
    %118 = arith.sitofp %117 : vector<8x128xi32> to vector<8x128xf32>
    %119 = arith.index_cast %arg0 : i32 to index
    %120 = memref.load %arg1[%119] : memref<5xi32, #tpu.memory_space<smem>>
    %c0_i32_55 = arith.constant 0 : i32
    %121 = arith.cmpi ne, %120, %c0_i32_55 : i32
    %c1_i32 = arith.constant 1 : i32
    %122 = arith.addi %arg0, %c1_i32 : i32
    %123 = arith.index_cast %122 : i32 to index
    %c0_56 = arith.constant 0 : index
    %c0_57 = arith.constant 0 : index
    %124 = vector.load %arg2[%123, %c0_56, %c0_57] : memref<6x8x128xf32, #tpu.memory_space<vmem>>, vector<1x8x128xf32>
    %125 = vector.shape_cast %124 : vector<1x8x128xf32> to vector<8x128xf32>
    %126 = arith.select %121, %125, %118 : vector<8x128xf32>
    %c0_58 = arith.constant 0 : index
    %c0_59 = arith.constant 0 : index
    %127 = vector.load %arg19[%c0_58, %c0_59] : memref<8x128xf32, #tpu.memory_space<vmem>>, vector<8x128xf32>
    tpu.vector_store %arg19[%c0_58, %c0_59], %126 {strides = array<i32>} : memref<8x128xf32, #tpu.memory_space<vmem>>, vector<8x128xf32>,
    return
  }
  func.func @transform_0(%arg0: i32, %arg1: memref<5xi32, #tpu.memory_space<smem>>) -> (i32, i32, i32) {
    %c0_i32 = arith.constant 0 : i32
    %c0_i32_0 = arith.constant 0 : i32
    %c0_i32_1 = arith.constant 0 : i32
    %c0_i32_2 = arith.constant 0 : i32
    return %c0_i32, %c0_i32_0, %c0_i32_1 : i32, i32, i32
  }
  func.func @transform_1(%arg0: i32, %arg1: memref<5xi32, #tpu.memory_space<smem>>) -> (i32, i32) {
    %c0_i32 = arith.constant 0 : i32
    %c0_i32_0 = arith.constant 0 : i32
    %c0_i32_1 = arith.constant 0 : i32
    return %c0_i32, %c0_i32_0 : i32, i32
  }
  func.func @transform_2(%arg0: i32, %arg1: memref<5xi32, #tpu.memory_space<smem>>) -> (i32, i32, i32) {
    %c0_i32 = arith.constant 0 : i32
    %c0_i32_0 = arith.constant 0 : i32
    %c0_i32_1 = arith.constant 0 : i32
    %c0_i32_2 = arith.constant 0 : i32
    return %c0_i32, %c0_i32_0, %c0_i32_1 : i32, i32, i32
  }
  func.func @transform_3(%arg0: i32, %arg1: memref<5xi32, #tpu.memory_space<smem>>) -> (i32, i32) {
    %c0_i32 = arith.constant 0 : i32
    %c0_i32_0 = arith.constant 0 : i32
    %c0_i32_1 = arith.constant 0 : i32
    return %c0_i32, %c0_i32_0 : i32, i32
  }
  func.func @transform_4(%arg0: i32, %arg1: memref<5xi32, #tpu.memory_space<smem>>) -> (i32, i32) {
    %c0_i32 = arith.constant 0 : i32
    %c0_i32_0 = arith.constant 0 : i32
    %c0_i32_1 = arith.constant 0 : i32
    return %c0_i32, %c0_i32_0 : i32, i32
  }
  func.func @transform_5(%arg0: i32, %arg1: memref<5xi32, #tpu.memory_space<smem>>) -> (i32, i32) {
    %c0_i32 = arith.constant 0 : i32
    %c0_i32_0 = arith.constant 0 : i32
    %c0_i32_1 = arith.constant 0 : i32
    return %c0_i32, %c0_i32_0 : i32, i32
  }
  func.func @transform_6(%arg0: i32, %arg1: memref<5xi32, #tpu.memory_space<smem>>) -> (i32, i32) {
    %c0_i32 = arith.constant 0 : i32
    %c0_i32_0 = arith.constant 0 : i32
    %c0_i32_1 = arith.constant 0 : i32
    return %c0_i32, %c0_i32_0 : i32, i32
  }
  func.func @transform_7(%arg0: i32, %arg1: memref<5xi32, #tpu.memory_space<smem>>) -> (i32, i32) {
    %c0_i32 = arith.constant 0 : i32
    %c0_i32_0 = arith.constant 0 : i32
    %c0_i32_1 = arith.constant 0 : i32
    return %c0_i32, %c0_i32_0 : i32, i32
  }
  func.func @transform_8(%arg0: i32, %arg1: memref<5xi32, #tpu.memory_space<smem>>) -> (i32, i32) {
    %c0_i32 = arith.constant 0 : i32
    %c0_i32_0 = arith.constant 0 : i32
    %c0_i32_1 = arith.constant 0 : i32
    return %c0_i32, %c0_i32_0 : i32, i32
  }
  func.func @transform_9(%arg0: i32, %arg1: memref<5xi32, #tpu.memory_space<smem>>) -> (i32, i32) {
    %c0_i32 = arith.constant 0 : i32
    %c0_i32_0 = arith.constant 0 : i32
    %c0_i32_1 = arith.constant 0 : i32
    return %c0_i32, %c0_i32_0 : i32, i32
  }
  func.func @transform_10(%arg0: i32, %arg1: memref<5xi32, #tpu.memory_space<smem>>) -> (i32, i32) {
    %c0_i32 = arith.constant 0 : i32
    %c0_i32_0 = arith.constant 0 : i32
    %c0_i32_1 = arith.constant 0 : i32
    return %c0_i32, %c0_i32_0 : i32, i32
  }
  func.func @transform_11(%arg0: i32, %arg1: memref<5xi32, #tpu.memory_space<smem>>) -> (i32, i32) {
    %c0_i32 = arith.constant 0 : i32
    %c0_i32_0 = arith.constant 0 : i32
    %c0_i32_1 = arith.constant 0 : i32
    return %c0_i32, %c0_i32_0 : i32, i32
  }
  func.func @transform_12(%arg0: i32, %arg1: memref<5xi32, #tpu.memory_space<smem>>) -> (i32, i32) {
    %c0_i32 = arith.constant 0 : i32
    %c0_i32_0 = arith.constant 0 : i32
    %c0_i32_1 = arith.constant 0 : i32
    return %c0_i32, %c0_i32_0 : i32, i32
  }
  func.func @transform_13(%arg0: i32, %arg1: memref<5xi32, #tpu.memory_space<smem>>) -> (i32, i32) {
    %c0_i32 = arith.constant 0 : i32
    %c0_i32_0 = arith.constant 0 : i32
    %c0_i32_1 = arith.constant 0 : i32
    return %c0_i32, %c0_i32_0 : i32, i32
  }
  func.func @transform_14(%arg0: i32, %arg1: memref<5xi32, #tpu.memory_space<smem>>) -> (i32, i32) {
    %c0_i32 = arith.constant 0 : i32
    %c0_i32_0 = arith.constant 0 : i32
    %c0_i32_1 = arith.constant 0 : i32
    return %c0_i32, %c0_i32_0 : i32, i32
  }
  func.func @transform_15(%arg0: i32, %arg1: memref<5xi32, #tpu.memory_space<smem>>) -> (i32, i32, i32) {
    %c0_i32 = arith.constant 0 : i32
    %c0_i32_0 = arith.constant 0 : i32
    %c0_i32_1 = arith.constant 0 : i32
    return %arg0, %c0_i32, %c0_i32_0 : i32, i32, i32
  }
}

module attributes {stable_mosaic.version = 11 : i64} {
  func.func @_encoder_kernel(%arg0: memref<8x8x32xf32, #tpu.memory_space<vmem>>, %arg1: memref<32x384xbf16, #tpu.memory_space<vmem>>, %arg2: memref<128x384xbf16, #tpu.memory_space<vmem>>, %arg3: memref<1x384xf32, #tpu.memory_space<vmem>>, %arg4: memref<1x384xf32, #tpu.memory_space<vmem>>, %arg5: memref<8x8x128xf32, #tpu.memory_space<vmem>>) attributes {dimension_semantics = [], scalar_prefetch = 0 : i64, scratch_operands = 0 : i64, tpu.core_type = #tpu.core_type<tc>} {
    %c0 = arith.constant 0 : index
    %c0_0 = arith.constant 0 : index
    %c0_1 = arith.constant 0 : index
    %0 = vector.load %arg0[%c0, %c0_0, %c0_1] : memref<8x8x32xf32, #tpu.memory_space<vmem>>, vector<8x8x32xf32>
    %1 = vector.shape_cast %0 : vector<8x8x32xf32> to vector<64x32xf32>
    %2 = arith.truncf %1 : vector<64x32xf32> to vector<64x32xbf16>
    %c0_2 = arith.constant 0 : index
    %c0_3 = arith.constant 0 : index
    %3 = vector.load %arg1[%c0_2, %c0_3] : memref<32x384xbf16, #tpu.memory_space<vmem>>, vector<32x384xbf16>
    %cst = arith.constant dense<0.000000e+00> : vector<64x384xf32>
    %4 = tpu.matmul %2, %3, %cst {dimension_numbers = #tpu.dot_dimension_numbers<[1], [0], [0], [1], [0, 0, 1, 1], [], []>} : vector<64x32xbf16>, vector<32x384xbf16>, vector<64x384xf32> -> vector<64x384xf32>
    %c0_4 = arith.constant 0 : index
    %c0_5 = arith.constant 0 : index
    %5 = vector.load %arg3[%c0_4, %c0_5] : memref<1x384xf32, #tpu.memory_space<vmem>>, vector<1x384xf32>
    %6 = vector.broadcast %5 : vector<1x384xf32> to vector<64x384xf32>
    %7 = arith.addf %4, %6 : vector<64x384xf32>
    %8 = vector.shape_cast %7 : vector<64x384xf32> to vector<8x8x384xf32>
    %c0_6 = arith.constant 0 : index
    %c0_7 = arith.constant 0 : index
    %9 = vector.load %arg2[%c0_6, %c0_7] : memref<128x384xbf16, #tpu.memory_space<vmem>>, vector<128x384xbf16>
    %c0_8 = arith.constant 0 : index
    %c0_9 = arith.constant 0 : index
    %10 = vector.load %arg4[%c0_8, %c0_9] : memref<1x384xf32, #tpu.memory_space<vmem>>, vector<1x384xf32>
    %cst_10 = arith.constant 0.000000e+00 : f32
    %11 = vector.broadcast %cst_10 : f32 to vector<8x128xf32>
    %12 = vector.extract_strided_slice %8 {offsets = [0, 0, 0], sizes = [1, 8, 384], strides = [1, 1, 1]} : vector<8x8x384xf32> to vector<1x8x384xf32>
    %13 = vector.shape_cast %12 : vector<1x8x384xf32> to vector<8x384xf32>
    %14 = arith.truncf %11 : vector<8x128xf32> to vector<8x128xbf16>
    %cst_11 = arith.constant dense<0.000000e+00> : vector<8x384xf32>
    %15 = tpu.matmul %14, %9, %cst_11 {dimension_numbers = #tpu.dot_dimension_numbers<[1], [0], [0], [1], [0, 0, 1, 1], [], []>} : vector<8x128xbf16>, vector<128x384xbf16>, vector<8x384xf32> -> vector<8x384xf32>
    %16 = vector.broadcast %10 : vector<1x384xf32> to vector<8x384xf32>
    %17 = arith.addf %15, %16 : vector<8x384xf32>
    %18 = vector.extract_strided_slice %13 {offsets = [0, 0], sizes = [8, 128], strides = [1, 1]} : vector<8x384xf32> to vector<8x128xf32>
    %19 = vector.extract_strided_slice %17 {offsets = [0, 0], sizes = [8, 128], strides = [1, 1]} : vector<8x384xf32> to vector<8x128xf32>
    %20 = arith.addf %18, %19 : vector<8x128xf32>
    %21 = arith.negf %20 : vector<8x128xf32>
    %22 = math.exp %21 : vector<8x128xf32>
    %cst_12 = arith.constant 1.000000e+00 : f32
    %23 = vector.broadcast %cst_12 : f32 to vector<8x128xf32>
    %24 = arith.addf %23, %22 : vector<8x128xf32>
    %25 = arith.divf %23, %24 : vector<8x128xf32>
    %26 = vector.extract_strided_slice %13 {offsets = [0, 128], sizes = [8, 128], strides = [1, 1]} : vector<8x384xf32> to vector<8x128xf32>
    %27 = vector.extract_strided_slice %17 {offsets = [0, 128], sizes = [8, 128], strides = [1, 1]} : vector<8x384xf32> to vector<8x128xf32>
    %28 = arith.addf %26, %27 : vector<8x128xf32>
    %29 = arith.negf %28 : vector<8x128xf32>
    %30 = math.exp %29 : vector<8x128xf32>
    %cst_13 = arith.constant 1.000000e+00 : f32
    %31 = vector.broadcast %cst_13 : f32 to vector<8x128xf32>
    %32 = arith.addf %31, %30 : vector<8x128xf32>
    %33 = arith.divf %31, %32 : vector<8x128xf32>
    %34 = vector.extract_strided_slice %13 {offsets = [0, 256], sizes = [8, 128], strides = [1, 1]} : vector<8x384xf32> to vector<8x128xf32>
    %35 = vector.extract_strided_slice %17 {offsets = [0, 256], sizes = [8, 128], strides = [1, 1]} : vector<8x384xf32> to vector<8x128xf32>
    %36 = arith.mulf %25, %35 : vector<8x128xf32>
    %37 = arith.addf %34, %36 : vector<8x128xf32>
    %38 = math.tanh %37 : vector<8x128xf32>
    %cst_14 = arith.constant 1.000000e+00 : f32
    %39 = vector.broadcast %cst_14 : f32 to vector<8x128xf32>
    %40 = arith.subf %39, %33 : vector<8x128xf32>
    %41 = arith.mulf %40, %38 : vector<8x128xf32>
    %42 = arith.mulf %33, %11 : vector<8x128xf32>
    %43 = arith.addf %41, %42 : vector<8x128xf32>
    %c0_15 = arith.constant 0 : index
    %c0_16 = arith.constant 0 : index
    %c0_17 = arith.constant 0 : index
    %44 = vector.load %arg5[%c0_15, %c0_16, %c0_17] : memref<8x8x128xf32, #tpu.memory_space<vmem>>, vector<1x8x128xf32>
    %45 = vector.shape_cast %44 : vector<1x8x128xf32> to vector<8x128xf32>
    %46 = vector.shape_cast %43 : vector<8x128xf32> to vector<1x8x128xf32>
    tpu.vector_store %arg5[%c0_15, %c0_16, %c0_17], %46 {strides = array<i32>} : memref<8x8x128xf32, #tpu.memory_space<vmem>>, vector<1x8x128xf32>,
    %47 = vector.extract_strided_slice %8 {offsets = [1, 0, 0], sizes = [1, 8, 384], strides = [1, 1, 1]} : vector<8x8x384xf32> to vector<1x8x384xf32>
    %48 = vector.shape_cast %47 : vector<1x8x384xf32> to vector<8x384xf32>
    %49 = arith.truncf %43 : vector<8x128xf32> to vector<8x128xbf16>
    %cst_18 = arith.constant dense<0.000000e+00> : vector<8x384xf32>
    %50 = tpu.matmul %49, %9, %cst_18 {dimension_numbers = #tpu.dot_dimension_numbers<[1], [0], [0], [1], [0, 0, 1, 1], [], []>} : vector<8x128xbf16>, vector<128x384xbf16>, vector<8x384xf32> -> vector<8x384xf32>
    %51 = vector.broadcast %10 : vector<1x384xf32> to vector<8x384xf32>
    %52 = arith.addf %50, %51 : vector<8x384xf32>
    %53 = vector.extract_strided_slice %48 {offsets = [0, 0], sizes = [8, 128], strides = [1, 1]} : vector<8x384xf32> to vector<8x128xf32>
    %54 = vector.extract_strided_slice %52 {offsets = [0, 0], sizes = [8, 128], strides = [1, 1]} : vector<8x384xf32> to vector<8x128xf32>
    %55 = arith.addf %53, %54 : vector<8x128xf32>
    %56 = arith.negf %55 : vector<8x128xf32>
    %57 = math.exp %56 : vector<8x128xf32>
    %cst_19 = arith.constant 1.000000e+00 : f32
    %58 = vector.broadcast %cst_19 : f32 to vector<8x128xf32>
    %59 = arith.addf %58, %57 : vector<8x128xf32>
    %60 = arith.divf %58, %59 : vector<8x128xf32>
    %61 = vector.extract_strided_slice %48 {offsets = [0, 128], sizes = [8, 128], strides = [1, 1]} : vector<8x384xf32> to vector<8x128xf32>
    %62 = vector.extract_strided_slice %52 {offsets = [0, 128], sizes = [8, 128], strides = [1, 1]} : vector<8x384xf32> to vector<8x128xf32>
    %63 = arith.addf %61, %62 : vector<8x128xf32>
    %64 = arith.negf %63 : vector<8x128xf32>
    %65 = math.exp %64 : vector<8x128xf32>
    %cst_20 = arith.constant 1.000000e+00 : f32
    %66 = vector.broadcast %cst_20 : f32 to vector<8x128xf32>
    %67 = arith.addf %66, %65 : vector<8x128xf32>
    %68 = arith.divf %66, %67 : vector<8x128xf32>
    %69 = vector.extract_strided_slice %48 {offsets = [0, 256], sizes = [8, 128], strides = [1, 1]} : vector<8x384xf32> to vector<8x128xf32>
    %70 = vector.extract_strided_slice %52 {offsets = [0, 256], sizes = [8, 128], strides = [1, 1]} : vector<8x384xf32> to vector<8x128xf32>
    %71 = arith.mulf %60, %70 : vector<8x128xf32>
    %72 = arith.addf %69, %71 : vector<8x128xf32>
    %73 = math.tanh %72 : vector<8x128xf32>
    %cst_21 = arith.constant 1.000000e+00 : f32
    %74 = vector.broadcast %cst_21 : f32 to vector<8x128xf32>
    %75 = arith.subf %74, %68 : vector<8x128xf32>
    %76 = arith.mulf %75, %73 : vector<8x128xf32>
    %77 = arith.mulf %68, %43 : vector<8x128xf32>
    %78 = arith.addf %76, %77 : vector<8x128xf32>
    %c1 = arith.constant 1 : index
    %c0_22 = arith.constant 0 : index
    %c0_23 = arith.constant 0 : index
    %79 = vector.load %arg5[%c1, %c0_22, %c0_23] : memref<8x8x128xf32, #tpu.memory_space<vmem>>, vector<1x8x128xf32>
    %80 = vector.shape_cast %79 : vector<1x8x128xf32> to vector<8x128xf32>
    %81 = vector.shape_cast %78 : vector<8x128xf32> to vector<1x8x128xf32>
    tpu.vector_store %arg5[%c1, %c0_22, %c0_23], %81 {strides = array<i32>} : memref<8x8x128xf32, #tpu.memory_space<vmem>>, vector<1x8x128xf32>,
    %82 = vector.extract_strided_slice %8 {offsets = [2, 0, 0], sizes = [1, 8, 384], strides = [1, 1, 1]} : vector<8x8x384xf32> to vector<1x8x384xf32>
    %83 = vector.shape_cast %82 : vector<1x8x384xf32> to vector<8x384xf32>
    %84 = arith.truncf %78 : vector<8x128xf32> to vector<8x128xbf16>
    %cst_24 = arith.constant dense<0.000000e+00> : vector<8x384xf32>
    %85 = tpu.matmul %84, %9, %cst_24 {dimension_numbers = #tpu.dot_dimension_numbers<[1], [0], [0], [1], [0, 0, 1, 1], [], []>} : vector<8x128xbf16>, vector<128x384xbf16>, vector<8x384xf32> -> vector<8x384xf32>
    %86 = vector.broadcast %10 : vector<1x384xf32> to vector<8x384xf32>
    %87 = arith.addf %85, %86 : vector<8x384xf32>
    %88 = vector.extract_strided_slice %83 {offsets = [0, 0], sizes = [8, 128], strides = [1, 1]} : vector<8x384xf32> to vector<8x128xf32>
    %89 = vector.extract_strided_slice %87 {offsets = [0, 0], sizes = [8, 128], strides = [1, 1]} : vector<8x384xf32> to vector<8x128xf32>
    %90 = arith.addf %88, %89 : vector<8x128xf32>
    %91 = arith.negf %90 : vector<8x128xf32>
    %92 = math.exp %91 : vector<8x128xf32>
    %cst_25 = arith.constant 1.000000e+00 : f32
    %93 = vector.broadcast %cst_25 : f32 to vector<8x128xf32>
    %94 = arith.addf %93, %92 : vector<8x128xf32>
    %95 = arith.divf %93, %94 : vector<8x128xf32>
    %96 = vector.extract_strided_slice %83 {offsets = [0, 128], sizes = [8, 128], strides = [1, 1]} : vector<8x384xf32> to vector<8x128xf32>
    %97 = vector.extract_strided_slice %87 {offsets = [0, 128], sizes = [8, 128], strides = [1, 1]} : vector<8x384xf32> to vector<8x128xf32>
    %98 = arith.addf %96, %97 : vector<8x128xf32>
    %99 = arith.negf %98 : vector<8x128xf32>
    %100 = math.exp %99 : vector<8x128xf32>
    %cst_26 = arith.constant 1.000000e+00 : f32
    %101 = vector.broadcast %cst_26 : f32 to vector<8x128xf32>
    %102 = arith.addf %101, %100 : vector<8x128xf32>
    %103 = arith.divf %101, %102 : vector<8x128xf32>
    %104 = vector.extract_strided_slice %83 {offsets = [0, 256], sizes = [8, 128], strides = [1, 1]} : vector<8x384xf32> to vector<8x128xf32>
    %105 = vector.extract_strided_slice %87 {offsets = [0, 256], sizes = [8, 128], strides = [1, 1]} : vector<8x384xf32> to vector<8x128xf32>
    %106 = arith.mulf %95, %105 : vector<8x128xf32>
    %107 = arith.addf %104, %106 : vector<8x128xf32>
    %108 = math.tanh %107 : vector<8x128xf32>
    %cst_27 = arith.constant 1.000000e+00 : f32
    %109 = vector.broadcast %cst_27 : f32 to vector<8x128xf32>
    %110 = arith.subf %109, %103 : vector<8x128xf32>
    %111 = arith.mulf %110, %108 : vector<8x128xf32>
    %112 = arith.mulf %103, %78 : vector<8x128xf32>
    %113 = arith.addf %111, %112 : vector<8x128xf32>
    %c2 = arith.constant 2 : index
    %c0_28 = arith.constant 0 : index
    %c0_29 = arith.constant 0 : index
    %114 = vector.load %arg5[%c2, %c0_28, %c0_29] : memref<8x8x128xf32, #tpu.memory_space<vmem>>, vector<1x8x128xf32>
    %115 = vector.shape_cast %114 : vector<1x8x128xf32> to vector<8x128xf32>
    %116 = vector.shape_cast %113 : vector<8x128xf32> to vector<1x8x128xf32>
    tpu.vector_store %arg5[%c2, %c0_28, %c0_29], %116 {strides = array<i32>} : memref<8x8x128xf32, #tpu.memory_space<vmem>>, vector<1x8x128xf32>,
    %117 = vector.extract_strided_slice %8 {offsets = [3, 0, 0], sizes = [1, 8, 384], strides = [1, 1, 1]} : vector<8x8x384xf32> to vector<1x8x384xf32>
    %118 = vector.shape_cast %117 : vector<1x8x384xf32> to vector<8x384xf32>
    %119 = arith.truncf %113 : vector<8x128xf32> to vector<8x128xbf16>
    %cst_30 = arith.constant dense<0.000000e+00> : vector<8x384xf32>
    %120 = tpu.matmul %119, %9, %cst_30 {dimension_numbers = #tpu.dot_dimension_numbers<[1], [0], [0], [1], [0, 0, 1, 1], [], []>} : vector<8x128xbf16>, vector<128x384xbf16>, vector<8x384xf32> -> vector<8x384xf32>
    %121 = vector.broadcast %10 : vector<1x384xf32> to vector<8x384xf32>
    %122 = arith.addf %120, %121 : vector<8x384xf32>
    %123 = vector.extract_strided_slice %118 {offsets = [0, 0], sizes = [8, 128], strides = [1, 1]} : vector<8x384xf32> to vector<8x128xf32>
    %124 = vector.extract_strided_slice %122 {offsets = [0, 0], sizes = [8, 128], strides = [1, 1]} : vector<8x384xf32> to vector<8x128xf32>
    %125 = arith.addf %123, %124 : vector<8x128xf32>
    %126 = arith.negf %125 : vector<8x128xf32>
    %127 = math.exp %126 : vector<8x128xf32>
    %cst_31 = arith.constant 1.000000e+00 : f32
    %128 = vector.broadcast %cst_31 : f32 to vector<8x128xf32>
    %129 = arith.addf %128, %127 : vector<8x128xf32>
    %130 = arith.divf %128, %129 : vector<8x128xf32>
    %131 = vector.extract_strided_slice %118 {offsets = [0, 128], sizes = [8, 128], strides = [1, 1]} : vector<8x384xf32> to vector<8x128xf32>
    %132 = vector.extract_strided_slice %122 {offsets = [0, 128], sizes = [8, 128], strides = [1, 1]} : vector<8x384xf32> to vector<8x128xf32>
    %133 = arith.addf %131, %132 : vector<8x128xf32>
    %134 = arith.negf %133 : vector<8x128xf32>
    %135 = math.exp %134 : vector<8x128xf32>
    %cst_32 = arith.constant 1.000000e+00 : f32
    %136 = vector.broadcast %cst_32 : f32 to vector<8x128xf32>
    %137 = arith.addf %136, %135 : vector<8x128xf32>
    %138 = arith.divf %136, %137 : vector<8x128xf32>
    %139 = vector.extract_strided_slice %118 {offsets = [0, 256], sizes = [8, 128], strides = [1, 1]} : vector<8x384xf32> to vector<8x128xf32>
    %140 = vector.extract_strided_slice %122 {offsets = [0, 256], sizes = [8, 128], strides = [1, 1]} : vector<8x384xf32> to vector<8x128xf32>
    %141 = arith.mulf %130, %140 : vector<8x128xf32>
    %142 = arith.addf %139, %141 : vector<8x128xf32>
    %143 = math.tanh %142 : vector<8x128xf32>
    %cst_33 = arith.constant 1.000000e+00 : f32
    %144 = vector.broadcast %cst_33 : f32 to vector<8x128xf32>
    %145 = arith.subf %144, %138 : vector<8x128xf32>
    %146 = arith.mulf %145, %143 : vector<8x128xf32>
    %147 = arith.mulf %138, %113 : vector<8x128xf32>
    %148 = arith.addf %146, %147 : vector<8x128xf32>
    %c3 = arith.constant 3 : index
    %c0_34 = arith.constant 0 : index
    %c0_35 = arith.constant 0 : index
    %149 = vector.load %arg5[%c3, %c0_34, %c0_35] : memref<8x8x128xf32, #tpu.memory_space<vmem>>, vector<1x8x128xf32>
    %150 = vector.shape_cast %149 : vector<1x8x128xf32> to vector<8x128xf32>
    %151 = vector.shape_cast %148 : vector<8x128xf32> to vector<1x8x128xf32>
    tpu.vector_store %arg5[%c3, %c0_34, %c0_35], %151 {strides = array<i32>} : memref<8x8x128xf32, #tpu.memory_space<vmem>>, vector<1x8x128xf32>,
    %152 = vector.extract_strided_slice %8 {offsets = [4, 0, 0], sizes = [1, 8, 384], strides = [1, 1, 1]} : vector<8x8x384xf32> to vector<1x8x384xf32>
    %153 = vector.shape_cast %152 : vector<1x8x384xf32> to vector<8x384xf32>
    %154 = arith.truncf %148 : vector<8x128xf32> to vector<8x128xbf16>
    %cst_36 = arith.constant dense<0.000000e+00> : vector<8x384xf32>
    %155 = tpu.matmul %154, %9, %cst_36 {dimension_numbers = #tpu.dot_dimension_numbers<[1], [0], [0], [1], [0, 0, 1, 1], [], []>} : vector<8x128xbf16>, vector<128x384xbf16>, vector<8x384xf32> -> vector<8x384xf32>
    %156 = vector.broadcast %10 : vector<1x384xf32> to vector<8x384xf32>
    %157 = arith.addf %155, %156 : vector<8x384xf32>
    %158 = vector.extract_strided_slice %153 {offsets = [0, 0], sizes = [8, 128], strides = [1, 1]} : vector<8x384xf32> to vector<8x128xf32>
    %159 = vector.extract_strided_slice %157 {offsets = [0, 0], sizes = [8, 128], strides = [1, 1]} : vector<8x384xf32> to vector<8x128xf32>
    %160 = arith.addf %158, %159 : vector<8x128xf32>
    %161 = arith.negf %160 : vector<8x128xf32>
    %162 = math.exp %161 : vector<8x128xf32>
    %cst_37 = arith.constant 1.000000e+00 : f32
    %163 = vector.broadcast %cst_37 : f32 to vector<8x128xf32>
    %164 = arith.addf %163, %162 : vector<8x128xf32>
    %165 = arith.divf %163, %164 : vector<8x128xf32>
    %166 = vector.extract_strided_slice %153 {offsets = [0, 128], sizes = [8, 128], strides = [1, 1]} : vector<8x384xf32> to vector<8x128xf32>
    %167 = vector.extract_strided_slice %157 {offsets = [0, 128], sizes = [8, 128], strides = [1, 1]} : vector<8x384xf32> to vector<8x128xf32>
    %168 = arith.addf %166, %167 : vector<8x128xf32>
    %169 = arith.negf %168 : vector<8x128xf32>
    %170 = math.exp %169 : vector<8x128xf32>
    %cst_38 = arith.constant 1.000000e+00 : f32
    %171 = vector.broadcast %cst_38 : f32 to vector<8x128xf32>
    %172 = arith.addf %171, %170 : vector<8x128xf32>
    %173 = arith.divf %171, %172 : vector<8x128xf32>
    %174 = vector.extract_strided_slice %153 {offsets = [0, 256], sizes = [8, 128], strides = [1, 1]} : vector<8x384xf32> to vector<8x128xf32>
    %175 = vector.extract_strided_slice %157 {offsets = [0, 256], sizes = [8, 128], strides = [1, 1]} : vector<8x384xf32> to vector<8x128xf32>
    %176 = arith.mulf %165, %175 : vector<8x128xf32>
    %177 = arith.addf %174, %176 : vector<8x128xf32>
    %178 = math.tanh %177 : vector<8x128xf32>
    %cst_39 = arith.constant 1.000000e+00 : f32
    %179 = vector.broadcast %cst_39 : f32 to vector<8x128xf32>
    %180 = arith.subf %179, %173 : vector<8x128xf32>
    %181 = arith.mulf %180, %178 : vector<8x128xf32>
    %182 = arith.mulf %173, %148 : vector<8x128xf32>
    %183 = arith.addf %181, %182 : vector<8x128xf32>
    %c4 = arith.constant 4 : index
    %c0_40 = arith.constant 0 : index
    %c0_41 = arith.constant 0 : index
    %184 = vector.load %arg5[%c4, %c0_40, %c0_41] : memref<8x8x128xf32, #tpu.memory_space<vmem>>, vector<1x8x128xf32>
    %185 = vector.shape_cast %184 : vector<1x8x128xf32> to vector<8x128xf32>
    %186 = vector.shape_cast %183 : vector<8x128xf32> to vector<1x8x128xf32>
    tpu.vector_store %arg5[%c4, %c0_40, %c0_41], %186 {strides = array<i32>} : memref<8x8x128xf32, #tpu.memory_space<vmem>>, vector<1x8x128xf32>,
    %187 = vector.extract_strided_slice %8 {offsets = [5, 0, 0], sizes = [1, 8, 384], strides = [1, 1, 1]} : vector<8x8x384xf32> to vector<1x8x384xf32>
    %188 = vector.shape_cast %187 : vector<1x8x384xf32> to vector<8x384xf32>
    %189 = arith.truncf %183 : vector<8x128xf32> to vector<8x128xbf16>
    %cst_42 = arith.constant dense<0.000000e+00> : vector<8x384xf32>
    %190 = tpu.matmul %189, %9, %cst_42 {dimension_numbers = #tpu.dot_dimension_numbers<[1], [0], [0], [1], [0, 0, 1, 1], [], []>} : vector<8x128xbf16>, vector<128x384xbf16>, vector<8x384xf32> -> vector<8x384xf32>
    %191 = vector.broadcast %10 : vector<1x384xf32> to vector<8x384xf32>
    %192 = arith.addf %190, %191 : vector<8x384xf32>
    %193 = vector.extract_strided_slice %188 {offsets = [0, 0], sizes = [8, 128], strides = [1, 1]} : vector<8x384xf32> to vector<8x128xf32>
    %194 = vector.extract_strided_slice %192 {offsets = [0, 0], sizes = [8, 128], strides = [1, 1]} : vector<8x384xf32> to vector<8x128xf32>
    %195 = arith.addf %193, %194 : vector<8x128xf32>
    %196 = arith.negf %195 : vector<8x128xf32>
    %197 = math.exp %196 : vector<8x128xf32>
    %cst_43 = arith.constant 1.000000e+00 : f32
    %198 = vector.broadcast %cst_43 : f32 to vector<8x128xf32>
    %199 = arith.addf %198, %197 : vector<8x128xf32>
    %200 = arith.divf %198, %199 : vector<8x128xf32>
    %201 = vector.extract_strided_slice %188 {offsets = [0, 128], sizes = [8, 128], strides = [1, 1]} : vector<8x384xf32> to vector<8x128xf32>
    %202 = vector.extract_strided_slice %192 {offsets = [0, 128], sizes = [8, 128], strides = [1, 1]} : vector<8x384xf32> to vector<8x128xf32>
    %203 = arith.addf %201, %202 : vector<8x128xf32>
    %204 = arith.negf %203 : vector<8x128xf32>
    %205 = math.exp %204 : vector<8x128xf32>
    %cst_44 = arith.constant 1.000000e+00 : f32
    %206 = vector.broadcast %cst_44 : f32 to vector<8x128xf32>
    %207 = arith.addf %206, %205 : vector<8x128xf32>
    %208 = arith.divf %206, %207 : vector<8x128xf32>
    %209 = vector.extract_strided_slice %188 {offsets = [0, 256], sizes = [8, 128], strides = [1, 1]} : vector<8x384xf32> to vector<8x128xf32>
    %210 = vector.extract_strided_slice %192 {offsets = [0, 256], sizes = [8, 128], strides = [1, 1]} : vector<8x384xf32> to vector<8x128xf32>
    %211 = arith.mulf %200, %210 : vector<8x128xf32>
    %212 = arith.addf %209, %211 : vector<8x128xf32>
    %213 = math.tanh %212 : vector<8x128xf32>
    %cst_45 = arith.constant 1.000000e+00 : f32
    %214 = vector.broadcast %cst_45 : f32 to vector<8x128xf32>
    %215 = arith.subf %214, %208 : vector<8x128xf32>
    %216 = arith.mulf %215, %213 : vector<8x128xf32>
    %217 = arith.mulf %208, %183 : vector<8x128xf32>
    %218 = arith.addf %216, %217 : vector<8x128xf32>
    %c5 = arith.constant 5 : index
    %c0_46 = arith.constant 0 : index
    %c0_47 = arith.constant 0 : index
    %219 = vector.load %arg5[%c5, %c0_46, %c0_47] : memref<8x8x128xf32, #tpu.memory_space<vmem>>, vector<1x8x128xf32>
    %220 = vector.shape_cast %219 : vector<1x8x128xf32> to vector<8x128xf32>
    %221 = vector.shape_cast %218 : vector<8x128xf32> to vector<1x8x128xf32>
    tpu.vector_store %arg5[%c5, %c0_46, %c0_47], %221 {strides = array<i32>} : memref<8x8x128xf32, #tpu.memory_space<vmem>>, vector<1x8x128xf32>,
    %222 = vector.extract_strided_slice %8 {offsets = [6, 0, 0], sizes = [1, 8, 384], strides = [1, 1, 1]} : vector<8x8x384xf32> to vector<1x8x384xf32>
    %223 = vector.shape_cast %222 : vector<1x8x384xf32> to vector<8x384xf32>
    %224 = arith.truncf %218 : vector<8x128xf32> to vector<8x128xbf16>
    %cst_48 = arith.constant dense<0.000000e+00> : vector<8x384xf32>
    %225 = tpu.matmul %224, %9, %cst_48 {dimension_numbers = #tpu.dot_dimension_numbers<[1], [0], [0], [1], [0, 0, 1, 1], [], []>} : vector<8x128xbf16>, vector<128x384xbf16>, vector<8x384xf32> -> vector<8x384xf32>
    %226 = vector.broadcast %10 : vector<1x384xf32> to vector<8x384xf32>
    %227 = arith.addf %225, %226 : vector<8x384xf32>
    %228 = vector.extract_strided_slice %223 {offsets = [0, 0], sizes = [8, 128], strides = [1, 1]} : vector<8x384xf32> to vector<8x128xf32>
    %229 = vector.extract_strided_slice %227 {offsets = [0, 0], sizes = [8, 128], strides = [1, 1]} : vector<8x384xf32> to vector<8x128xf32>
    %230 = arith.addf %228, %229 : vector<8x128xf32>
    %231 = arith.negf %230 : vector<8x128xf32>
    %232 = math.exp %231 : vector<8x128xf32>
    %cst_49 = arith.constant 1.000000e+00 : f32
    %233 = vector.broadcast %cst_49 : f32 to vector<8x128xf32>
    %234 = arith.addf %233, %232 : vector<8x128xf32>
    %235 = arith.divf %233, %234 : vector<8x128xf32>
    %236 = vector.extract_strided_slice %223 {offsets = [0, 128], sizes = [8, 128], strides = [1, 1]} : vector<8x384xf32> to vector<8x128xf32>
    %237 = vector.extract_strided_slice %227 {offsets = [0, 128], sizes = [8, 128], strides = [1, 1]} : vector<8x384xf32> to vector<8x128xf32>
    %238 = arith.addf %236, %237 : vector<8x128xf32>
    %239 = arith.negf %238 : vector<8x128xf32>
    %240 = math.exp %239 : vector<8x128xf32>
    %cst_50 = arith.constant 1.000000e+00 : f32
    %241 = vector.broadcast %cst_50 : f32 to vector<8x128xf32>
    %242 = arith.addf %241, %240 : vector<8x128xf32>
    %243 = arith.divf %241, %242 : vector<8x128xf32>
    %244 = vector.extract_strided_slice %223 {offsets = [0, 256], sizes = [8, 128], strides = [1, 1]} : vector<8x384xf32> to vector<8x128xf32>
    %245 = vector.extract_strided_slice %227 {offsets = [0, 256], sizes = [8, 128], strides = [1, 1]} : vector<8x384xf32> to vector<8x128xf32>
    %246 = arith.mulf %235, %245 : vector<8x128xf32>
    %247 = arith.addf %244, %246 : vector<8x128xf32>
    %248 = math.tanh %247 : vector<8x128xf32>
    %cst_51 = arith.constant 1.000000e+00 : f32
    %249 = vector.broadcast %cst_51 : f32 to vector<8x128xf32>
    %250 = arith.subf %249, %243 : vector<8x128xf32>
    %251 = arith.mulf %250, %248 : vector<8x128xf32>
    %252 = arith.mulf %243, %218 : vector<8x128xf32>
    %253 = arith.addf %251, %252 : vector<8x128xf32>
    %c6 = arith.constant 6 : index
    %c0_52 = arith.constant 0 : index
    %c0_53 = arith.constant 0 : index
    %254 = vector.load %arg5[%c6, %c0_52, %c0_53] : memref<8x8x128xf32, #tpu.memory_space<vmem>>, vector<1x8x128xf32>
    %255 = vector.shape_cast %254 : vector<1x8x128xf32> to vector<8x128xf32>
    %256 = vector.shape_cast %253 : vector<8x128xf32> to vector<1x8x128xf32>
    tpu.vector_store %arg5[%c6, %c0_52, %c0_53], %256 {strides = array<i32>} : memref<8x8x128xf32, #tpu.memory_space<vmem>>, vector<1x8x128xf32>,
    %257 = vector.extract_strided_slice %8 {offsets = [7, 0, 0], sizes = [1, 8, 384], strides = [1, 1, 1]} : vector<8x8x384xf32> to vector<1x8x384xf32>
    %258 = vector.shape_cast %257 : vector<1x8x384xf32> to vector<8x384xf32>
    %259 = arith.truncf %253 : vector<8x128xf32> to vector<8x128xbf16>
    %cst_54 = arith.constant dense<0.000000e+00> : vector<8x384xf32>
    %260 = tpu.matmul %259, %9, %cst_54 {dimension_numbers = #tpu.dot_dimension_numbers<[1], [0], [0], [1], [0, 0, 1, 1], [], []>} : vector<8x128xbf16>, vector<128x384xbf16>, vector<8x384xf32> -> vector<8x384xf32>
    %261 = vector.broadcast %10 : vector<1x384xf32> to vector<8x384xf32>
    %262 = arith.addf %260, %261 : vector<8x384xf32>
    %263 = vector.extract_strided_slice %258 {offsets = [0, 0], sizes = [8, 128], strides = [1, 1]} : vector<8x384xf32> to vector<8x128xf32>
    %264 = vector.extract_strided_slice %262 {offsets = [0, 0], sizes = [8, 128], strides = [1, 1]} : vector<8x384xf32> to vector<8x128xf32>
    %265 = arith.addf %263, %264 : vector<8x128xf32>
    %266 = arith.negf %265 : vector<8x128xf32>
    %267 = math.exp %266 : vector<8x128xf32>
    %cst_55 = arith.constant 1.000000e+00 : f32
    %268 = vector.broadcast %cst_55 : f32 to vector<8x128xf32>
    %269 = arith.addf %268, %267 : vector<8x128xf32>
    %270 = arith.divf %268, %269 : vector<8x128xf32>
    %271 = vector.extract_strided_slice %258 {offsets = [0, 128], sizes = [8, 128], strides = [1, 1]} : vector<8x384xf32> to vector<8x128xf32>
    %272 = vector.extract_strided_slice %262 {offsets = [0, 128], sizes = [8, 128], strides = [1, 1]} : vector<8x384xf32> to vector<8x128xf32>
    %273 = arith.addf %271, %272 : vector<8x128xf32>
    %274 = arith.negf %273 : vector<8x128xf32>
    %275 = math.exp %274 : vector<8x128xf32>
    %cst_56 = arith.constant 1.000000e+00 : f32
    %276 = vector.broadcast %cst_56 : f32 to vector<8x128xf32>
    %277 = arith.addf %276, %275 : vector<8x128xf32>
    %278 = arith.divf %276, %277 : vector<8x128xf32>
    %279 = vector.extract_strided_slice %258 {offsets = [0, 256], sizes = [8, 128], strides = [1, 1]} : vector<8x384xf32> to vector<8x128xf32>
    %280 = vector.extract_strided_slice %262 {offsets = [0, 256], sizes = [8, 128], strides = [1, 1]} : vector<8x384xf32> to vector<8x128xf32>
    %281 = arith.mulf %270, %280 : vector<8x128xf32>
    %282 = arith.addf %279, %281 : vector<8x128xf32>
    %283 = math.tanh %282 : vector<8x128xf32>
    %cst_57 = arith.constant 1.000000e+00 : f32
    %284 = vector.broadcast %cst_57 : f32 to vector<8x128xf32>
    %285 = arith.subf %284, %278 : vector<8x128xf32>
    %286 = arith.mulf %285, %283 : vector<8x128xf32>
    %287 = arith.mulf %278, %253 : vector<8x128xf32>
    %288 = arith.addf %286, %287 : vector<8x128xf32>
    %c7 = arith.constant 7 : index
    %c0_58 = arith.constant 0 : index
    %c0_59 = arith.constant 0 : index
    %289 = vector.load %arg5[%c7, %c0_58, %c0_59] : memref<8x8x128xf32, #tpu.memory_space<vmem>>, vector<1x8x128xf32>
    %290 = vector.shape_cast %289 : vector<1x8x128xf32> to vector<8x128xf32>
    %291 = vector.shape_cast %288 : vector<8x128xf32> to vector<1x8x128xf32>
    tpu.vector_store %arg5[%c7, %c0_58, %c0_59], %291 {strides = array<i32>} : memref<8x8x128xf32, #tpu.memory_space<vmem>>, vector<1x8x128xf32>,
    return
  }
}

</mosaic_0001>

<bundles_post_ra>
// kernel: _forward_impl.2
= control target key start
LH: loop header
LB: loop body
LE: loop exit
PB: predicated region body
PF: predicated region fallthrough
CT: control target
= control target key end

     0   :  { %v2460_v1 = vmov 0   ;;  %vm90_vm0 = vcmask 261120   ;;  %v2462_v25 = vmov 0.0   ;;  %vm1720_vm1 = vmmov 0   ;;  %s2454_s1 = inlined_call_operand.vmem [shape: bf16[32,384], index: 1, kind: input, shape index: {}]   ;;  %s2455_s0 = inlined_call_operand.vmem [shape: f32[8,8,32], index: 0, kind: input, shape index: {}]   ;;  %s2456_s2 = inlined_call_operand.vmem [shape: bf16[128,384], index: 2, kind: input, shape index: {}]   ;;  %s2457_s3 = inlined_call_operand.vmem [shape: f32[1,384], index: 3, kind: input, shape index: {}]   ;;  %s2458_s4 = inlined_call_operand.vmem [shape: f32[1,384], index: 4, kind: input, shape index: {}]   ;;  %s2459_s5 = inlined_call_operand.vmem [shape: f32[8,8,128], index: 5, kind: output, shape index: {}]  }
   0x1   :  { %v1574_v0 = vld [vmem:[%s2454_s1 + $0x4] ss:$12 sps:$4 sm:$0xff]   ;;  %135 = vmatprep.mubr.bf16.mxu0 %v2460_v1  ;;  %v1576_v2 = vld [vmem:[%s2454_s1] ss:$12 sps:$4 sm:$0xff]   ;;  %v1577_v3 = vld [vmem:[%s2454_s1 + $0x1c] ss:$12 sps:$4 sm:$0xff]   ;;  %v43_v44 = vlaneseq }
   0x2   :  { %103 = vmatprep.subr.bf16.mxu0 %v1574_v0  ;;  %v1579_v4 = vld [vmem:[%s2454_s1 + $0x18] ss:$12 sps:$4 sm:$0xff]   ;;  %v22_v6 = vld [vmem:[%s2455_s0 + $0x8] sm:$0xff]  ;;  %v23_v12 = vld [vmem:[%s2455_s0 + $0x10] sm:$0xff] }
   0x3   :  { %v21_v5 = vld [vmem:[%s2455_s0] sm:$0xff]  ;;  %104 = vmatpush1.bf16.msra.mxu0 %v1576_v2  ;;  %v1785_v10 = vld [vmem:[%s2456_s2 + $0x1c] ss:$12 sps:$4 sm:$0xff]   ;;  %v1823_v19 = vld [vmem:[%s2456_s2 + $0x4c] ss:$12 sps:$4 sm:$0xff]   ;;  %v1999_v45 = vshrl.u32 %v43_v44, 7 }
   0x4   :  { %105 = vmatprep.subr.bf16.mxu0 %v1577_v3  ;;  %v29_v7 = vpack.c.bf16 %v22_v6, %v21_v5  ;;  %v1773_v8 = vld [vmem:[%s2456_s2 + $0x4] ss:$12 sps:$4 sm:$0xff]   ;;  %v1779_v9 = vld [vmem:[%s2456_s2] ss:$12 sps:$4 sm:$0xff]   ;;  %v24_v13 = vld [vmem:[%s2455_s0 + $0x18] sm:$0xff] }
   0x5   :  { %v1790_v11 = vld [vmem:[%s2456_s2 + $0x18] ss:$12 sps:$4 sm:$0xff]   ;;  %v1804_v14 = vld [vmem:[%s2456_s2 + $0x34] ss:$12 sps:$4 sm:$0xff]   ;;  %v30_v16 = vpack.c.bf16 %v24_v13, %v23_v12  ;;  %v1817_v18 = vld [vmem:[%s2456_s2 + $0x30] ss:$12 sps:$4 sm:$0xff]  }
   0x6   :  { %1403 = vmatprep.mubr.msk.bf16.mxu1 %vm90_vm0, %v29_v7  ;;  %v1595_v15 = vld [vmem:[%s2454_s1 + $0x8] ss:$12 sps:$4 sm:$0xff]   ;;  %v1599_v17 = vld [vmem:[%s2454_s1 + $0x20] ss:$12 sps:$4 sm:$0xff]   ;;  %v1842_v23 = vld [vmem:[%s2456_s2 + $0x64] ss:$12 sps:$4 sm:$0xff]  }
   0x7   :  { %106 = vmatpush1.bf16.msra.mxu0 %v1579_v4  ;;  %1399 = vmatprep.subr.bf16.mxu1 %v1595_v15  ;;  %v1828_v20 = vld [vmem:[%s2456_s2 + $0x48] ss:$12 sps:$4 sm:$0xff]   ;;  %v25_v21 = vld [vmem:[%s2455_s0 + $0x20] sm:$0xff]  ;;  %v28_v31 = vld [vmem:[%s2455_s0 + $0x38] sm:$0xff]  ;;  %v45_v46 = vsub.s32 0, %v1999_v45  ;;  %v49_v48 = vsub.s32 1, %v1999_v45 }
   0x8   :  { %418 = vmatprep.subr.bf16.mxu0 %v1773_v8  ;;  %1400 = vmatpush3.bf16.msra.mxu1 %v1595_v15  ;;  %v26_v22 = vld [vmem:[%s2455_s0 + $0x28] sm:$0xff]  ;;  %v27_v30 = vld [vmem:[%s2455_s0 + $0x30] sm:$0xff]  ;;  %v1883_v32 = vld [vmem:[%s2456_s2 + $0x78] ss:$12 sps:$4 sm:$0xff]   ;;  %v2464_v57 = vsub.s32 2, %v1999_v45 }
   0x9   :  { %1401 = vmatprep.subr.bf16.mxu1 %v1599_v17  ;;  %v1848_v24 = vld [vmem:[%s2456_s2 + $0x8] ss:$12 sps:$4 sm:$0xff]   ;;  %v31_v26 = vpack.c.bf16 %v26_v22, %v25_v21  ;;  %v1854_v27 = vld [vmem:[%s2456_s2 + $0x60] ss:$12 sps:$4 sm:$0xff]   ;;  %v1896_v34 = vld [vmem:[%s2456_s2 + $0x38] ss:$12 sps:$4 sm:$0xff]   ;;  %v32_v35 = vpack.c.bf16 %v28_v31, %v27_v30 }
   0xa   :  { %1266 = vmatmul.mubr.msk.bf16.vlgmr.msra.gmra.mrb[0].mxu0 %vm90_vm0, %v29_v7  ;;  %v1860_v28 = vld [vmem:[%s2456_s2 + $0x7c] ss:$12 sps:$4 sm:$0xff]   ;;  %v1868_v29 = vld [vmem:[%s2456_s2 + $0x20] ss:$12 sps:$4 sm:$0xff]   ;;  %v1953_v42 = vld [vmem:[%s2456_s2 + $0x98] ss:$12 sps:$4 sm:$0xff]  }
   0xb   :  { %419 = vmatpush1.bf16.msra.mxu0 %v1779_v9  ;;  %145 = vmatprep.mubr.bf16.mxu0 %v2460_v1  ;;  %v1890_v33 = vld [vmem:[%s2456_s2 + $0x94] ss:$12 sps:$4 sm:$0xff]   ;;  %v1903_v36 = vld [vmem:[%s2456_s2 + $0x90] ss:$12 sps:$4 sm:$0xff]   ;;  %v1910_v37 = vld [vmem:[%s2456_s2 + $0xac] ss:$12 sps:$4 sm:$0xff]  }
   0xc   :  { %420 = vmatprep.subr.bf16.mxu0 %v1785_v10  ;;  %1402 = vmatpush3.bf16.msra.mxu1 %v1599_v17  ;;  %v1916_v38 = vld [vmem:[%s2456_s2 + $0x50] ss:$12 sps:$4 sm:$0xff]   ;;  %v1926_v39 = vld [vmem:[%s2456_s2 + $0xa8] ss:$12 sps:$4 sm:$0xff]   ;;  %v1942_v41 = vld [vmem:[%s2456_s2 + $0x80] ss:$12 sps:$4 sm:$0xff]  }
   0xd   :  { %1411 = vmatprep.subr.bf16.mxu1 %v2462_v25  ;;  %v1934_v40 = vld [vmem:[%s2456_s2 + $0x68] ss:$12 sps:$4 sm:$0xff]   ;;  %v1962_v43 = vld [vmem:[%s2456_s2 + $0xb0] ss:$12 sps:$4 sm:$0xff]   ;;  %v41_v47 = vld [vmem:[%s2457_s3] sm:$0x7] }
   0xe   :  { %v46_v50 = vrot.slane %v41_v47, %v45_v46  ;;  %v50_v52 = vrot.slane %v41_v47, %v49_v48  ;;  %v2017_v63 = vrot.slane %v41_v47, %v2464_v57 }
   0xf   :  { %421 = vmatpush1.bf16.msra.mxu0 %v1790_v11  ;;  %1404 = vmatmul.mubr.msk.bf16.vlgmr.msra.gmra.mrb[0].mxu1 %vm90_vm0, %v30_v16 }
  0x10   :  { %422 = vmatprep.subr.bf16.mxu0 %v1804_v14  ;;  %1412 = vmatpush3.bf16.msra.mxu1 %v1848_v24 }
  0x11   :  { %1413 = vmatprep.subr.bf16.mxu1 %v2462_v25  ;;  %1407 = vmatprep.mubr.msk.bf16.mxu1 %vm90_vm0, %v31_v26 }
  0x12   :  { %1267 = vmatmul.mubr.msk.bf16.gmra.mrb[4].mxu0 %vm90_vm0, %v30_v16 }
  0x13   :  { %423 = vmatpush1.bf16.msra.mxu0 %v1817_v18  ;;  %155 = vmatprep.mubr.bf16.mxu0 %v2460_v1 }
  0x14   :  { %424 = vmatprep.subr.bf16.mxu0 %v1823_v19  ;;  %1414 = vmatpush3.bf16.msra.mxu1 %v1868_v29 }
  0x15   :  { %1415 = vmatprep.subr.bf16.mxu1 %v2462_v25 }
  0x17   :  { %425 = vmatpush1.bf16.msra.mxu0 %v1828_v20  ;;  %1408 = vmatmul.mubr.msk.bf16.gmra.mrb[4].mxu1 %vm90_vm0, %v32_v35 }
  0x18   :  { %426 = vmatprep.subr.bf16.mxu0 %v1842_v23  ;;  %1416 = vmatpush3.bf16.msra.mxu1 %v1896_v34 }
  0x19   :  { %1417 = vmatprep.subr.bf16.mxu1 %v2462_v25  ;;  %1427 = vmatprep.mubr.msk.bf16.mxu1 %vm1720_vm1, %v2462_v25 }
  0x1a   :  { %1268 = vmatmul.mubr.msk.bf16.gmra.mrb[8].mxu0 %vm90_vm0, %v31_v26 }
  0x1b   :  { %427 = vmatpush1.bf16.msra.mxu0 %v1854_v27  ;;  %165 = vmatprep.mubr.bf16.mxu0 %v2460_v1 }
  0x1c   :  { %428 = vmatprep.subr.bf16.mxu0 %v1860_v28  ;;  %1418 = vmatpush3.bf16.msra.mxu1 %v1916_v38 }
  0x1d   :  { %1419 = vmatprep.subr.bf16.mxu1 %v2462_v25 }
  0x1f   :  { %429 = vmatpush1.bf16.msra.mxu0 %v1883_v32 }
  0x20   :  { %430 = vmatprep.subr.bf16.mxu0 %v1890_v33  ;;  %1420 = vmatpush3.bf16.msra.mxu1 %v1934_v40 }
  0x21   :  { %1421 = vmatprep.subr.bf16.mxu1 %v2462_v25 }
  0x22   :  { %1269 = vmatmul.mubr.msk.bf16.gmra.mrb[12].mxu0 %vm90_vm0, %v32_v35 }
  0x23   :  { %431 = vmatpush1.bf16.msra.mxu0 %v1903_v36  ;;  %450 = vmatprep.mubr.bf16.mxu0 %v2460_v1 }
  0x24   :  { %432 = vmatprep.subr.bf16.mxu0 %v1910_v37  ;;  %1422 = vmatpush3.bf16.msra.mxu1 %v1942_v41 }
  0x25   :  { %1423 = vmatprep.subr.bf16.mxu1 %v2462_v25 }
  0x27   :  { %433 = vmatpush1.bf16.msra.mxu0 %v1926_v39 }
  0x28   :  { %522 = vmatprep.subr.bf16.mxu0 %v1773_v8  ;;  %1424 = vmatpush3.bf16.msra.mxu1 %v1953_v42 }
  0x29   :  { %1425 = vmatprep.subr.bf16.mxu1 %v2462_v25 }
  0x2a   :  { %451 = vmatmul.mubr.bf16.vlgmr.msra.gmra.mrb[16].mxu0 %v2460_v1 }
  0x2b   :  { %523 = vmatpush1.bf16.msra.mxu0 %v1779_v9  ;;  %554 = vmatprep.mubr.bf16.mxu0 %v2460_v1 }
  0x2c   :  { %524 = vmatprep.subr.bf16.mxu0 %v1785_v10  ;;  %1426 = vmatpush3.bf16.msra.mxu1 %v1962_v43 }
  0x2d   :  { %1431 = vmatprep.subr.bf16.mxu1 %v2462_v25 }
  0x2f   :  { %525 = vmatpush1.bf16.msra.mxu0 %v1790_v11  ;;  %1428 = vmatmul.mubr.bf16.vlgmr.msra.gmra.mrb[8].mxu1 %v2460_v1 }
  0x30   :  { %526 = vmatprep.subr.bf16.mxu0 %v1804_v14  ;;  %1432 = vmatpush3.bf16.msra.mxu1 %v1848_v24 }
  0x31   :  { %1433 = vmatprep.subr.bf16.mxu1 %v2462_v25  ;;  %1447 = vmatprep.mubr.msk.bf16.mxu1 %vm1720_vm1, %v2462_v25 }
  0x33   :  { %527 = vmatpush1.bf16.msra.mxu0 %v1817_v18 }
  0x34   :  { %528 = vmatprep.subr.bf16.mxu0 %v1823_v19  ;;  %1434 = vmatpush3.bf16.msra.mxu1 %v1868_v29 }
  0x35   :  { %1435 = vmatprep.subr.bf16.mxu1 %v2462_v25 }
  0x37   :  { %529 = vmatpush1.bf16.msra.mxu0 %v1828_v20 }
  0x38   :  { %530 = vmatprep.subr.bf16.mxu0 %v1842_v23  ;;  %1436 = vmatpush3.bf16.msra.mxu1 %v1896_v34 }
  0x39   :  { %1437 = vmatprep.subr.bf16.mxu1 %v2462_v25 }
  0x3b   :  { %531 = vmatpush1.bf16.msra.mxu0 %v1854_v27 }
  0x3c   :  { %532 = vmatprep.subr.bf16.mxu0 %v1860_v28  ;;  %1438 = vmatpush3.bf16.msra.mxu1 %v1916_v38 }
  0x3d   :  { %1439 = vmatprep.subr.bf16.mxu1 %v2462_v25 }
  0x3f   :  { %533 = vmatpush1.bf16.msra.mxu0 %v1883_v32 }
  0x40   :  { %534 = vmatprep.subr.bf16.mxu0 %v1890_v33  ;;  %1440 = vmatpush3.bf16.msra.mxu1 %v1934_v40 }
  0x41   :  { %1441 = vmatprep.subr.bf16.mxu1 %v2462_v25 }
  0x43   :  { %535 = vmatpush1.bf16.msra.mxu0 %v1903_v36 }
  0x44   :  { %536 = vmatprep.subr.bf16.mxu0 %v1910_v37  ;;  %1442 = vmatpush3.bf16.msra.mxu1 %v1942_v41 }
  0x45   :  { %1443 = vmatprep.subr.bf16.mxu1 %v2462_v25 }
  0x47   :  { %537 = vmatpush1.bf16.msra.mxu0 %v1926_v39 }
  0x48   :  { %627 = vmatprep.subr.bf16.mxu0 %v1773_v8  ;;  %1444 = vmatpush3.bf16.msra.mxu1 %v1953_v42 }
  0x49   :  { %1445 = vmatprep.subr.bf16.mxu1 %v2462_v25 }
  0x4c   :  { %1446 = vmatpush3.bf16.msra.mxu1 %v1962_v43 }
  0x4d   :  { %1451 = vmatprep.subr.bf16.mxu1 %v2462_v25 }
  0xdd   :  { %v137_v49 = vpop.f32.mrb[0].mxu0 }
  0xde   :  { %v139_v51 = vpop.f32.mrb[1].mxu0  ;;  %v138_v25 = vadd.f32 %v137_v49, %v46_v50 }
  0xdf   :  { %v141_v53 = vpop.f32.mrb[2].mxu0  ;;  %v140_v57 = vadd.f32 %v139_v51, %v50_v52 }
  0xe0   :  { %v2006_v54 = vadd.f32 %v141_v53, %v46_v50  ;;  %v143_v55 = vpop.f32.mrb[3].mxu0 }
  0xe1   :  { %v2008_v56 = vadd.f32 %v143_v55, %v50_v52 }
  0xe2   :  { %v1405_v4 = vpop.f32.mrb[0].mxu1 }
  0xe3   :  { %v2024_v5 = vadd.f32 %v1405_v4, %v2017_v63  ;;  %v210_v6 = vpop.f32.mrb[1].mxu1 }
  0xe4   :  { %v1406_v7 = vpop.f32.mrb[2].mxu1 }
  0xe5   :  { %v147_v58 = vpop.f32.mrb[4].mxu0  ;;  %v2027_v13 = vadd.f32 %v1406_v7, %v2017_v63  ;;  %v213_v15 = vpop.f32.mrb[3].mxu1 }
  0xe6   :  { %v2011_v59 = vadd.f32 %v147_v58, %v46_v50  ;;  %v149_v60 = vpop.f32.mrb[5].mxu0  ;;  %v2032_v21 = vadd.f32 %v213_v15, %v2017_v63 }
  0xe7   :  { %v2013_v61 = vadd.f32 %v149_v60, %v50_v52  ;;  %v151_v62 = vpop.f32.mrb[6].mxu0 }
  0xe8   :  { %v2019_v0 = vadd.f32 %v151_v62, %v46_v50  ;;  %v153_v2 = vpop.f32.mrb[7].mxu0 }
  0xe9   :  { %v2021_v3 = vadd.f32 %v153_v2, %v50_v52 }
  0xea   :  { %v1409_v44 = vpop.f32.mrb[4].mxu1 }
  0xeb   :  { %v2041_v47 = vadd.f32 %v1409_v44, %v2017_v63  ;;  %v226_v53 = vpop.f32.mrb[5].mxu1 }
  0xec   :  { %v2044_v55 = vadd.f32 %v226_v53, %v2017_v63  ;;  %v1410_v58 = vpop.f32.mrb[6].mxu1 }
  0xed   :  { %v157_v12 = vpop.f32.mrb[8].mxu0  ;;  %2466 = vst [vmem:[#allocation3_spill] sm:$0xff] %v2041_v47  ;;  %v2047_v62 = vadd.f32 %v1410_v58, %v2017_v63  ;;  %v229_v2 = vpop.f32.mrb[7].mxu1 }
  0xee   :  { %v2029_v16 = vadd.f32 %v157_v12, %v46_v50  ;;  %v159_v17 = vpop.f32.mrb[9].mxu0  ;;  %v2052_v12 = vadd.f32 %v229_v2, %v2017_v63 }
  0xef   :  { %v2034_v22 = vadd.f32 %v159_v17, %v50_v52  ;;  %v161_v26 = vpop.f32.mrb[10].mxu0  ;;  %2467 = vst [vmem:[#allocation4_spill] sm:$0xff] %v2047_v62 }
  0xf0   :  { %v2036_v30 = vadd.f32 %v161_v26, %v46_v50  ;;  %v163_v31 = vpop.f32.mrb[11].mxu0  ;;  %2469 = vst [vmem:[#allocation6_spill] sm:$0xff] %v2052_v12  ;;  %v273_v26 = vld [vmem:[%s2458_s4] sm:$0x7] }
  0xf1   :  { %v2038_v35 = vadd.f32 %v163_v31, %v50_v52  ;;  %v2063_v58 = vrot.slane %v273_v26, %v45_v46 }
  0xf3   :  { %2465 = vst [vmem:[#allocation2_spill] sm:$0xff] %v2038_v35 }
  0xf5   :  { %v167_v60 = vpop.f32.mrb[12].mxu0 }
  0xf6   :  { %v2049_v4 = vadd.f32 %v167_v60, %v46_v50  ;;  %v169_v7 = vpop.f32.mrb[13].mxu0  ;;  %v2065_v60 = vrot.slane %v273_v26, %v49_v48 }
  0xf7   :  { %v2054_v15 = vadd.f32 %v169_v7, %v50_v52  ;;  %v171_v17 = vpop.f32.mrb[14].mxu0 }
  0xf8   :  { %2468 = vst [vmem:[#allocation5_spill] sm:$0xff] %v2049_v4  ;;  %v2059_v31 = vadd.f32 %v171_v17, %v46_v50  ;;  %v173_v44 = vpop.f32.mrb[15].mxu0 }
  0xf9   :  { %2470 = vst [vmem:[#allocation7_spill] sm:$0xff] %v2054_v15  ;;  %v2061_v53 = vadd.f32 %v173_v44, %v50_v52 }
  0xfa   :  { %2471 = vst [vmem:[#allocation8_spill] sm:$0xff] %v2059_v31 }
  0xfb   :  { %2472 = vst [vmem:[#allocation9_spill] sm:$0xff] %v2061_v53 }
  0xfd   :  { %v452_v1 = vpop.f32.mrb[16].mxu0 }
  0xfe   :  { %v453_v2 = vadd.f32 %v452_v1, %v2063_v58  ;;  %v454_v7 = vpop.f32.mrb[17].mxu0  ;;  %v2473_v1 = vsub.s32 2, %v1999_v45 }
  0xff   :  { %v455_v62 = vadd.f32 %v454_v7, %v2065_v60  ;;  %v456_v47 = vpop.f32.mrb[18].mxu0 }
 0x100   :  { %v499_v15 = vadd.f32 %v453_v2, %v138_v25  ;;  %v457_v4 = vpop.f32.mrb[19].mxu0  ;;  %v2071_v50 = vrot.slane %v273_v26, %v2473_v1  ;;  %v211_v47 = vadd.f32 %v210_v6, %v2017_v63  ;;  %v2474_v63 = vmov 0.0  }
 0x101   :  { %v506_v17 = vadd.f32 %v455_v62, %v140_v57  ;;  %v2475_v6 = vmov 0  }
 0x102   :  { %v1298_v31 = vmul.f32 -1.442695, %v499_v15  ;;  %v493_v53 = vpop.f32.mrb[8].mxu1 }
 0x103   :  { %v1299_v44 = vmul.f32 -1.442695, %v506_v17  ;;  %v1429_v46 = vpop.f32.mrb[9].mxu1  ;;  %v494_v25 = vadd.f32 %v493_v53, %v2071_v50 }
 0x104   :  { %1614 = vpow2.f32 %v1298_v31  ;;  %v496_v48 = vpop.f32.mrb[10].mxu1 }
 0x105   :  { %1616 = vpow2.f32 %v1299_v44  ;;  %v1430_v12 = vpop.f32.mrb[11].mxu1 }
 0x10e   :  { %v1615_v35 = vpop.eup %1614 }
 0x10f   :  { %v503_v49 = vadd.f32 1.0, %v1615_v35  ;;  %v1617_v51 = vpop.eup %1616 }
 0x110   :  { %v510_v52 = vadd.f32 1.0, %v1617_v51 }
 0x111   :  { %1618 = vrcp.f32 %v503_v49 }
 0x112   :  { %1620 = vrcp.f32 %v510_v52 }
 0x11b   :  { %v1619_v57 = vpop.eup %1618 }
 0x11c   :  { %v513_v62 = vmul.f32 %v1619_v57, %v494_v25  ;;  %v1621_v15 = vpop.eup %1620 }
 0x11d   :  { %v516_v12 = vsub.f32 1.0, %v1621_v15  ;;  %v518_v2 = vmul.f32 0.0, %v1621_v15 }
 0x11e   :  { %v514_v4 = vadd.f32 %v513_v62, %v211_v47 }
 0x120   :  { %1622 = vtanh.f32 %v514_v4 }
 0x12a   :  { %v1623_v31 = vpop.eup %1622 }
 0x12b   :  { %v517_v35 = vmul.f32 %v1623_v31, %v516_v12 }
 0x12d   :  { %v2075_v7 = vadd.f32 %v518_v2, %v517_v35 }
 0x12f   :  { %520 = vst [vmem:[%s2459_s5] sm:$0xff] %v2075_v7  ;;  %v521_v45 = vpack.c.bf16 %v2075_v7, %v2075_v7 }
 0x131   :  { %555 = vmatmul.mubr.bf16.vlgmr.msra.gmra.mrb[20].mxu0 %v521_v45  ;;  %1448 = vmatmul.mubr.bf16.vlgmr.msra.gmra.mrb[12].mxu1 %v521_v45 }
 0x132   :  { %628 = vmatpush1.bf16.msra.mxu0 %v1779_v9  ;;  %1452 = vmatpush3.bf16.msra.mxu1 %v1848_v24 }
 0x133   :  { %629 = vmatprep.subr.bf16.mxu0 %v1785_v10  ;;  %1453 = vmatprep.subr.bf16.mxu1 %v2474_v63 }
 0x134   :  { %659 = vmatprep.mubr.bf16.mxu0 %v2475_v6  ;;  %1467 = vmatprep.mubr.msk.bf16.mxu1 %vm1720_vm1, %v2474_v63 }
 0x136   :  { %630 = vmatpush1.bf16.msra.mxu0 %v1790_v11  ;;  %1454 = vmatpush3.bf16.msra.mxu1 %v1868_v29 }
 0x137   :  { %631 = vmatprep.subr.bf16.mxu0 %v1804_v14  ;;  %1455 = vmatprep.subr.bf16.mxu1 %v2474_v63 }
 0x13a   :  { %632 = vmatpush1.bf16.msra.mxu0 %v1817_v18  ;;  %1456 = vmatpush3.bf16.msra.mxu1 %v1896_v34 }
 0x13b   :  { %633 = vmatprep.subr.bf16.mxu0 %v1823_v19  ;;  %1457 = vmatprep.subr.bf16.mxu1 %v2474_v63 }
 0x13e   :  { %634 = vmatpush1.bf16.msra.mxu0 %v1828_v20  ;;  %1458 = vmatpush3.bf16.msra.mxu1 %v1916_v38 }
 0x13f   :  { %635 = vmatprep.subr.bf16.mxu0 %v1842_v23  ;;  %1459 = vmatprep.subr.bf16.mxu1 %v2474_v63 }
 0x142   :  { %636 = vmatpush1.bf16.msra.mxu0 %v1854_v27  ;;  %1460 = vmatpush3.bf16.msra.mxu1 %v1934_v40 }
 0x143   :  { %637 = vmatprep.subr.bf16.mxu0 %v1860_v28  ;;  %1461 = vmatprep.subr.bf16.mxu1 %v2474_v63 }
 0x146   :  { %638 = vmatpush1.bf16.msra.mxu0 %v1883_v32  ;;  %1462 = vmatpush3.bf16.msra.mxu1 %v1942_v41 }
 0x147   :  { %639 = vmatprep.subr.bf16.mxu0 %v1890_v33  ;;  %1463 = vmatprep.subr.bf16.mxu1 %v2474_v63 }
 0x14a   :  { %640 = vmatpush1.bf16.msra.mxu0 %v1903_v36  ;;  %1464 = vmatpush3.bf16.msra.mxu1 %v1953_v42 }
 0x14b   :  { %641 = vmatprep.subr.bf16.mxu0 %v1910_v37  ;;  %1465 = vmatprep.subr.bf16.mxu1 %v2474_v63 }
 0x14e   :  { %642 = vmatpush1.bf16.msra.mxu0 %v1926_v39  ;;  %1466 = vmatpush3.bf16.msra.mxu1 %v1962_v43 }
 0x14f   :  { %732 = vmatprep.subr.bf16.mxu0 %v1773_v8  ;;  %1471 = vmatprep.subr.bf16.mxu1 %v2474_v63 }
 0x204   :  { %v556_v26 = vpop.f32.mrb[20].mxu0  ;;  %v597_v53 = vpop.f32.mrb[12].mxu1 }
 0x205   :  { %v557_v17 = vadd.f32 %v556_v26, %v2063_v58  ;;  %v558_v44 = vpop.f32.mrb[21].mxu0  ;;  %v1449_v46 = vpop.f32.mrb[13].mxu1  ;;  %v598_v35 = vadd.f32 %v597_v53, %v2071_v50 }
 0x206   :  { %v559_v48 = vadd.f32 %v558_v44, %v2065_v60  ;;  %v560_v49 = vpop.f32.mrb[22].mxu0  ;;  %v600_v1 = vpop.f32.mrb[14].mxu1 }
 0x207   :  { %v603_v51 = vadd.f32 %v557_v17, %v2006_v54  ;;  %v561_v52 = vpop.f32.mrb[23].mxu0  ;;  %v1450_v25 = vpop.f32.mrb[15].mxu1 }
 0x208   :  { %v610_v57 = vadd.f32 %v559_v48, %v2008_v56 }
 0x209   :  { %v1300_v47 = vmul.f32 -1.442695, %v603_v51 }
 0x20a   :  { %v1301_v62 = vmul.f32 -1.442695, %v610_v57 }
 0x20b   :  { %1624 = vpow2.f32 %v1300_v47 }
 0x20c   :  { %1626 = vpow2.f32 %v1301_v62 }
 0x215   :  { %v1625_v4 = vpop.eup %1624 }
 0x216   :  { %v607_v15 = vadd.f32 1.0, %v1625_v4  ;;  %v1627_v12 = vpop.eup %1626 }
 0x217   :  { %v614_v31 = vadd.f32 1.0, %v1627_v12 }
 0x218   :  { %1628 = vrcp.f32 %v607_v15 }
 0x219   :  { %1630 = vrcp.f32 %v614_v31 }
 0x222   :  { %v1629_v2 = vpop.eup %1628 }
 0x223   :  { %v617_v45 = vmul.f32 %v1629_v2, %v598_v35  ;;  %v1631_v26 = vpop.eup %1630 }
 0x224   :  { %v620_v17 = vsub.f32 1.0, %v1631_v26  ;;  %v622_v46 = vmul.f32 %v1631_v26, %v2075_v7 }
 0x225   :  { %v618_v54 = vadd.f32 %v617_v45, %v2032_v21 }
 0x227   :  { %1632 = vtanh.f32 %v618_v54 }
 0x231   :  { %v1633_v56 = vpop.eup %1632 }
 0x232   :  { %v621_v44 = vmul.f32 %v1633_v56, %v620_v17 }
 0x234   :  { %v2125_v48 = vadd.f32 %v622_v46, %v621_v44 }
 0x236   :  { %1302 = vst [vmem:[%s2459_s5 + $0x8] sm:$0xff] %v2125_v48  ;;  %v626_v53 = vpack.c.bf16 %v2125_v48, %v2125_v48 }
 0x238   :  { %660 = vmatmul.mubr.bf16.vlgmr.msra.gmra.mrb[24].mxu0 %v626_v53  ;;  %1468 = vmatmul.mubr.bf16.vlgmr.msra.gmra.mrb[16].mxu1 %v626_v53 }
 0x239   :  { %733 = vmatpush1.bf16.msra.mxu0 %v1779_v9  ;;  %1472 = vmatpush3.bf16.msra.mxu1 %v1848_v24 }
 0x23a   :  { %734 = vmatprep.subr.bf16.mxu0 %v1785_v10  ;;  %1473 = vmatprep.subr.bf16.mxu1 %v2474_v63 }
 0x23b   :  { %764 = vmatprep.mubr.bf16.mxu0 %v2475_v6  ;;  %1487 = vmatprep.mubr.msk.bf16.mxu1 %vm1720_vm1, %v2474_v63 }
 0x23d   :  { %735 = vmatpush1.bf16.msra.mxu0 %v1790_v11  ;;  %1474 = vmatpush3.bf16.msra.mxu1 %v1868_v29 }
 0x23e   :  { %736 = vmatprep.subr.bf16.mxu0 %v1804_v14  ;;  %1475 = vmatprep.subr.bf16.mxu1 %v2474_v63 }
 0x241   :  { %737 = vmatpush1.bf16.msra.mxu0 %v1817_v18  ;;  %1476 = vmatpush3.bf16.msra.mxu1 %v1896_v34 }
 0x242   :  { %738 = vmatprep.subr.bf16.mxu0 %v1823_v19  ;;  %1477 = vmatprep.subr.bf16.mxu1 %v2474_v63 }
 0x245   :  { %739 = vmatpush1.bf16.msra.mxu0 %v1828_v20  ;;  %1478 = vmatpush3.bf16.msra.mxu1 %v1916_v38 }
 0x246   :  { %740 = vmatprep.subr.bf16.mxu0 %v1842_v23  ;;  %1479 = vmatprep.subr.bf16.mxu1 %v2474_v63 }
 0x249   :  { %741 = vmatpush1.bf16.msra.mxu0 %v1854_v27  ;;  %1480 = vmatpush3.bf16.msra.mxu1 %v1934_v40 }
 0x24a   :  { %742 = vmatprep.subr.bf16.mxu0 %v1860_v28  ;;  %1481 = vmatprep.subr.bf16.mxu1 %v2474_v63 }
 0x24d   :  { %743 = vmatpush1.bf16.msra.mxu0 %v1883_v32  ;;  %1482 = vmatpush3.bf16.msra.mxu1 %v1942_v41 }
 0x24e   :  { %744 = vmatprep.subr.bf16.mxu0 %v1890_v33  ;;  %1483 = vmatprep.subr.bf16.mxu1 %v2474_v63 }
 0x251   :  { %745 = vmatpush1.bf16.msra.mxu0 %v1903_v36  ;;  %1484 = vmatpush3.bf16.msra.mxu1 %v1953_v42 }
 0x252   :  { %746 = vmatprep.subr.bf16.mxu0 %v1910_v37  ;;  %1485 = vmatprep.subr.bf16.mxu1 %v2474_v63 }
 0x255   :  { %747 = vmatpush1.bf16.msra.mxu0 %v1926_v39  ;;  %1486 = vmatpush3.bf16.msra.mxu1 %v1962_v43 }
 0x256   :  { %837 = vmatprep.subr.bf16.mxu0 %v1773_v8  ;;  %1491 = vmatprep.subr.bf16.mxu1 %v2474_v63 }
 0x30b   :  { %v661_v21 = vpop.f32.mrb[24].mxu0  ;;  %v702_v7 = vpop.f32.mrb[16].mxu1 }
 0x30c   :  { %v662_v49 = vadd.f32 %v661_v21, %v2063_v58  ;;  %v663_v1 = vpop.f32.mrb[25].mxu0  ;;  %v1469_v51 = vpop.f32.mrb[17].mxu1  ;;  %v703_v26 = vadd.f32 %v702_v7, %v2071_v50 }
 0x30d   :  { %v664_v52 = vadd.f32 %v663_v1, %v2065_v60  ;;  %v665_v25 = vpop.f32.mrb[26].mxu0  ;;  %v705_v57 = vpop.f32.mrb[18].mxu1 }
 0x30e   :  { %v708_v47 = vadd.f32 %v662_v49, %v2011_v59  ;;  %v666_v62 = vpop.f32.mrb[27].mxu0  ;;  %v1470_v4 = vpop.f32.mrb[19].mxu1 }
 0x30f   :  { %v715_v15 = vadd.f32 %v664_v52, %v2013_v61 }
 0x310   :  { %v1303_v12 = vmul.f32 -1.442695, %v708_v47 }
 0x311   :  { %v1304_v31 = vmul.f32 -1.442695, %v715_v15 }
 0x312   :  { %1634 = vpow2.f32 %v1303_v12 }
 0x313   :  { %1636 = vpow2.f32 %v1304_v31 }
 0x31c   :  { %v1635_v35 = vpop.eup %1634 }
 0x31d   :  { %v712_v2 = vadd.f32 1.0, %v1635_v35  ;;  %v1637_v45 = vpop.eup %1636 }
 0x31e   :  { %v719_v54 = vadd.f32 1.0, %v1637_v45 }
 0x31f   :  { %1638 = vrcp.f32 %v712_v2 }
 0x320   :  { %1640 = vrcp.f32 %v719_v54 }
 0x329   :  { %v1639_v17 = vpop.eup %1638 }
 0x32a   :  { %v722_v56 = vmul.f32 %v1639_v17, %v703_v26  ;;  %v1641_v44 = vpop.eup %1640 }
 0x32b   :  { %v725_v46 = vsub.f32 1.0, %v1641_v44  ;;  %v727_v21 = vmul.f32 %v1641_v44, %v2125_v48 }
 0x32c   :  { %v723_v59 = vadd.f32 %v722_v56, %v2024_v5 }
 0x32e   :  { %1642 = vtanh.f32 %v723_v59 }
 0x338   :  { %v1643_v61 = vpop.eup %1642 }
 0x339   :  { %v726_v53 = vmul.f32 %v1643_v61, %v725_v46 }
 0x33b   :  { %v2175_v49 = vadd.f32 %v727_v21, %v726_v53 }
 0x33d   :  { %1305 = vst [vmem:[%s2459_s5 + $0x10] sm:$0xff] %v2175_v49  ;;  %v731_v7 = vpack.c.bf16 %v2175_v49, %v2175_v49 }
 0x33f   :  { %765 = vmatmul.mubr.bf16.vlgmr.msra.gmra.mrb[28].mxu0 %v731_v7  ;;  %1488 = vmatmul.mubr.bf16.vlgmr.msra.gmra.mrb[20].mxu1 %v731_v7 }
 0x340   :  { %838 = vmatpush1.bf16.msra.mxu0 %v1779_v9  ;;  %1492 = vmatpush3.bf16.msra.mxu1 %v1848_v24 }
 0x341   :  { %839 = vmatprep.subr.bf16.mxu0 %v1785_v10  ;;  %1493 = vmatprep.subr.bf16.mxu1 %v2474_v63 }
 0x342   :  { %869 = vmatprep.mubr.bf16.mxu0 %v2475_v6  ;;  %1507 = vmatprep.mubr.msk.bf16.mxu1 %vm1720_vm1, %v2474_v63 }
 0x344   :  { %840 = vmatpush1.bf16.msra.mxu0 %v1790_v11  ;;  %1494 = vmatpush3.bf16.msra.mxu1 %v1868_v29 }
 0x345   :  { %841 = vmatprep.subr.bf16.mxu0 %v1804_v14  ;;  %1495 = vmatprep.subr.bf16.mxu1 %v2474_v63 }
 0x348   :  { %842 = vmatpush1.bf16.msra.mxu0 %v1817_v18  ;;  %1496 = vmatpush3.bf16.msra.mxu1 %v1896_v34 }
 0x349   :  { %843 = vmatprep.subr.bf16.mxu0 %v1823_v19  ;;  %1497 = vmatprep.subr.bf16.mxu1 %v2474_v63 }
 0x34c   :  { %844 = vmatpush1.bf16.msra.mxu0 %v1828_v20  ;;  %1498 = vmatpush3.bf16.msra.mxu1 %v1916_v38 }
 0x34d   :  { %845 = vmatprep.subr.bf16.mxu0 %v1842_v23  ;;  %1499 = vmatprep.subr.bf16.mxu1 %v2474_v63 }
 0x350   :  { %846 = vmatpush1.bf16.msra.mxu0 %v1854_v27  ;;  %1500 = vmatpush3.bf16.msra.mxu1 %v1934_v40 }
 0x351   :  { %847 = vmatprep.subr.bf16.mxu0 %v1860_v28  ;;  %1501 = vmatprep.subr.bf16.mxu1 %v2474_v63 }
 0x354   :  { %848 = vmatpush1.bf16.msra.mxu0 %v1883_v32  ;;  %1502 = vmatpush3.bf16.msra.mxu1 %v1942_v41 }
 0x355   :  { %849 = vmatprep.subr.bf16.mxu0 %v1890_v33  ;;  %1503 = vmatprep.subr.bf16.mxu1 %v2474_v63 }
 0x358   :  { %850 = vmatpush1.bf16.msra.mxu0 %v1903_v36  ;;  %1504 = vmatpush3.bf16.msra.mxu1 %v1953_v42 }
 0x359   :  { %851 = vmatprep.subr.bf16.mxu0 %v1910_v37  ;;  %1505 = vmatprep.subr.bf16.mxu1 %v2474_v63 }
 0x35c   :  { %852 = vmatpush1.bf16.msra.mxu0 %v1926_v39  ;;  %1506 = vmatpush3.bf16.msra.mxu1 %v1962_v43 }
 0x35d   :  { %942 = vmatprep.subr.bf16.mxu0 %v1773_v8  ;;  %1511 = vmatprep.subr.bf16.mxu1 %v2474_v63 }
 0x412   :  { %v766_v5 = vpop.f32.mrb[28].mxu0  ;;  %v807_v48 = vpop.f32.mrb[20].mxu1 }
 0x413   :  { %v767_v1 = vadd.f32 %v766_v5, %v2063_v58  ;;  %v768_v51 = vpop.f32.mrb[29].mxu0  ;;  %v1489_v52 = vpop.f32.mrb[21].mxu1  ;;  %v808_v17 = vadd.f32 %v807_v48, %v2071_v50 }
 0x414   :  { %v769_v25 = vadd.f32 %v768_v51, %v2065_v60  ;;  %v770_v57 = vpop.f32.mrb[30].mxu0  ;;  %v810_v47 = vpop.f32.mrb[22].mxu1 }
 0x415   :  { %v813_v62 = vadd.f32 %v767_v1, %v2019_v0  ;;  %v771_v4 = vpop.f32.mrb[31].mxu0  ;;  %v1490_v15 = vpop.f32.mrb[23].mxu1 }
 0x416   :  { %v820_v12 = vadd.f32 %v769_v25, %v2021_v3 }
 0x417   :  { %v1306_v31 = vmul.f32 -1.442695, %v813_v62 }
 0x418   :  { %v1307_v35 = vmul.f32 -1.442695, %v820_v12 }
 0x419   :  { %1644 = vpow2.f32 %v1306_v31 }
 0x41a   :  { %1646 = vpow2.f32 %v1307_v35 }
 0x423   :  { %v1645_v2 = vpop.eup %1644 }
 0x424   :  { %v817_v45 = vadd.f32 1.0, %v1645_v2  ;;  %v1647_v54 = vpop.eup %1646 }
 0x425   :  { %v824_v26 = vadd.f32 1.0, %v1647_v54 }
 0x426   :  { %1648 = vrcp.f32 %v817_v45 }
 0x427   :  { %1650 = vrcp.f32 %v824_v26  ;;  %v2293_v26 = vld [vmem:[%s2456_s2 + $0x1c] ss:$12 sps:$4 sm:$0xff]  }
 0x430   :  { %v1649_v56 = vpop.eup %1648 }
 0x431   :  { %v827_v59 = vmul.f32 %v1649_v56, %v808_v17  ;;  %v1651_v44 = vpop.eup %1650  ;;  %v2303_v17 = vld [vmem:[%s2456_s2 + $0x18] ss:$12 sps:$4 sm:$0xff]   ;;  %v2317_v56 = vld [vmem:[%s2456_s2 + $0x30] ss:$12 sps:$4 sm:$0xff]  }
 0x432   :  { %v830_v46 = vsub.f32 1.0, %v1651_v44  ;;  %v832_v53 = vmul.f32 %v1651_v44, %v2175_v49 }
 0x433   :  { %v828_v0 = vadd.f32 %v827_v59, %v2027_v13  ;;  %v2331_v59 = vld [vmem:[%s2456_s2 + $0x48] ss:$12 sps:$4 sm:$0xff]  }
 0x435   :  { %1652 = vtanh.f32 %v828_v0 }
 0x43f   :  { %v1653_v3 = vpop.eup %1652 }
 0x440   :  { %v831_v61 = vmul.f32 %v1653_v3, %v830_v46 }
 0x442   :  { %v2225_v21 = vadd.f32 %v832_v53, %v831_v61 }
 0x444   :  { %1308 = vst [vmem:[%s2459_s5 + $0x18] sm:$0xff] %v2225_v21  ;;  %v836_v7 = vpack.c.bf16 %v2225_v21, %v2225_v21 }
 0x446   :  { %870 = vmatmul.mubr.bf16.vlgmr.msra.gmra.mrb[32].mxu0 %v836_v7  ;;  %1508 = vmatmul.mubr.bf16.vlgmr.msra.gmra.mrb[24].mxu1 %v836_v7 }
 0x447   :  { %943 = vmatpush1.bf16.msra.mxu0 %v1779_v9  ;;  %1512 = vmatpush3.bf16.msra.mxu1 %v1848_v24 }
 0x448   :  { %944 = vmatprep.subr.bf16.mxu0 %v1785_v10  ;;  %1513 = vmatprep.subr.bf16.mxu1 %v2474_v63 }
 0x449   :  { %974 = vmatprep.mubr.bf16.mxu0 %v2475_v6  ;;  %1527 = vmatprep.mubr.msk.bf16.mxu1 %vm1720_vm1, %v2474_v63 }
 0x44b   :  { %945 = vmatpush1.bf16.msra.mxu0 %v1790_v11  ;;  %1514 = vmatpush3.bf16.msra.mxu1 %v1868_v29 }
 0x44c   :  { %946 = vmatprep.subr.bf16.mxu0 %v1804_v14  ;;  %1515 = vmatprep.subr.bf16.mxu1 %v2474_v63 }
 0x44f   :  { %947 = vmatpush1.bf16.msra.mxu0 %v1817_v18  ;;  %1516 = vmatpush3.bf16.msra.mxu1 %v1896_v34 }
 0x450   :  { %948 = vmatprep.subr.bf16.mxu0 %v1823_v19  ;;  %1517 = vmatprep.subr.bf16.mxu1 %v2474_v63 }
 0x453   :  { %949 = vmatpush1.bf16.msra.mxu0 %v1828_v20  ;;  %1518 = vmatpush3.bf16.msra.mxu1 %v1916_v38 }
 0x454   :  { %950 = vmatprep.subr.bf16.mxu0 %v1842_v23  ;;  %1519 = vmatprep.subr.bf16.mxu1 %v2474_v63 }
 0x457   :  { %951 = vmatpush1.bf16.msra.mxu0 %v1854_v27  ;;  %1520 = vmatpush3.bf16.msra.mxu1 %v1934_v40 }
 0x458   :  { %952 = vmatprep.subr.bf16.mxu0 %v1860_v28  ;;  %1521 = vmatprep.subr.bf16.mxu1 %v2474_v63 }
 0x45b   :  { %953 = vmatpush1.bf16.msra.mxu0 %v1883_v32  ;;  %1522 = vmatpush3.bf16.msra.mxu1 %v1942_v41 }
 0x45c   :  { %954 = vmatprep.subr.bf16.mxu0 %v1890_v33  ;;  %1523 = vmatprep.subr.bf16.mxu1 %v2474_v63 }
 0x45f   :  { %955 = vmatpush1.bf16.msra.mxu0 %v1903_v36  ;;  %1524 = vmatpush3.bf16.msra.mxu1 %v1953_v42 }
 0x460   :  { %956 = vmatprep.subr.bf16.mxu0 %v1910_v37  ;;  %1525 = vmatprep.subr.bf16.mxu1 %v2474_v63 }
 0x463   :  { %957 = vmatpush1.bf16.msra.mxu0 %v1926_v39  ;;  %1526 = vmatpush3.bf16.msra.mxu1 %v1962_v43 }
 0x464   :  { %1047 = vmatprep.subr.bf16.mxu0 %v1773_v8  ;;  %1531 = vmatprep.subr.bf16.mxu1 %v2474_v63 }
 0x519   :  { %v871_v9 = vpop.f32.mrb[32].mxu0  ;;  %v912_v10 = vpop.f32.mrb[24].mxu1 }
 0x51a   :  { %v872_v11 = vadd.f32 %v871_v9, %v2063_v58  ;;  %v873_v14 = vpop.f32.mrb[33].mxu0  ;;  %v1509_v18 = vpop.f32.mrb[25].mxu1  ;;  %v913_v62 = vadd.f32 %v912_v10, %v2071_v50  ;;  %v2477_v10 = vld [vmem:[#allocation6_spill] sm:$0xff] }
 0x51b   :  { %v874_v19 = vadd.f32 %v873_v14, %v2065_v60  ;;  %v875_v20 = vpop.f32.mrb[34].mxu0  ;;  %v915_v13 = vpop.f32.mrb[26].mxu1 }
 0x51c   :  { %v918_v49 = vadd.f32 %v872_v11, %v2029_v16  ;;  %v876_v5 = vpop.f32.mrb[35].mxu0  ;;  %v1510_v48 = vpop.f32.mrb[27].mxu1 }
 0x51d   :  { %v925_v1 = vadd.f32 %v874_v19, %v2034_v22  ;;  %v1702_v5 = vld [vmem:[%s2456_s2 + $0x8] ss:$12 sps:$4 sm:$0xff]   ;;  %v1703_v48 = vld [vmem:[%s2456_s2 + $0x20] ss:$12 sps:$4 sm:$0xff]  }
 0x51e   :  { %v1309_v51 = vmul.f32 -1.442695, %v918_v49 }
 0x51f   :  { %v1310_v8 = vmul.f32 -1.442695, %v925_v1  ;;  %v1705_v1 = vld [vmem:[%s2456_s2 + $0x50] ss:$12 sps:$4 sm:$0xff]  }
 0x520   :  { %1654 = vpow2.f32 %v1309_v51  ;;  %v1706_v51 = vld [vmem:[%s2456_s2 + $0x64] ss:$12 sps:$4 sm:$0xff]  }
 0x521   :  { %1656 = vpow2.f32 %v1310_v8  ;;  %v1707_v8 = vld [vmem:[%s2456_s2 + $0x60] ss:$12 sps:$4 sm:$0xff]  }
 0x52a   :  { %v1655_v52 = vpop.eup %1654 }
 0x52b   :  { %v922_v25 = vadd.f32 1.0, %v1655_v52  ;;  %v1657_v57 = vpop.eup %1656  ;;  %v1708_v52 = vld [vmem:[%s2456_s2 + $0x68] ss:$12 sps:$4 sm:$0xff]  }
 0x52c   :  { %v929_v47 = vadd.f32 1.0, %v1657_v57  ;;  %v1710_v57 = vld [vmem:[%s2456_s2 + $0x78] ss:$12 sps:$4 sm:$0xff]  }
 0x52d   :  { %1658 = vrcp.f32 %v922_v25  ;;  %v1709_v25 = vld [vmem:[%s2456_s2 + $0x7c] ss:$12 sps:$4 sm:$0xff]  }
 0x52e   :  { %1660 = vrcp.f32 %v929_v47  ;;  %v1711_v47 = vld [vmem:[%s2456_s2 + $0x80] ss:$12 sps:$4 sm:$0xff]  }
 0x537   :  { %v1659_v4 = vpop.eup %1658 }
 0x538   :  { %v932_v15 = vmul.f32 %v1659_v4, %v913_v62  ;;  %v1661_v12 = vpop.eup %1660  ;;  %v1712_v62 = vld [vmem:[%s2456_s2 + $0x94] ss:$12 sps:$4 sm:$0xff]   ;;  %v1713_v4 = vld [vmem:[%s2456_s2 + $0x90] ss:$12 sps:$4 sm:$0xff]  }
 0x539   :  { %v935_v31 = vsub.f32 1.0, %v1661_v12  ;;  %v937_v2 = vmul.f32 %v1661_v12, %v2225_v21  ;;  %v1716_v12 = vld [vmem:[%s2456_s2 + $0xa8] ss:$12 sps:$4 sm:$0xff]  }
 0x53a   :  { %v933_v16 = vadd.f32 %v932_v15, %v2044_v55  ;;  %v2286_v55 = vld [vmem:[%s2456_s2] ss:$12 sps:$4 sm:$0xff]   ;;  %v1714_v15 = vld [vmem:[%s2456_s2 + $0x98] ss:$12 sps:$4 sm:$0xff]  }
 0x53c   :  { %1662 = vtanh.f32 %v933_v16  ;;  %v1715_v16 = vld [vmem:[%s2456_s2 + $0xac] ss:$12 sps:$4 sm:$0xff]  }
 0x546   :  { %v1663_v22 = vpop.eup %1662 }
 0x547   :  { %v936_v35 = vmul.f32 %v1663_v22, %v935_v31  ;;  %v1717_v31 = vld [vmem:[%s2456_s2 + $0xb0] ss:$12 sps:$4 sm:$0xff]  }
 0x549   :  { %v2275_v45 = vadd.f32 %v937_v2, %v936_v35 }
 0x54b   :  { %1311 = vst [vmem:[%s2459_s5 + $0x20] sm:$0xff] %v2275_v45  ;;  %v941_v54 = vpack.c.bf16 %v2275_v45, %v2275_v45 }
 0x54d   :  { %975 = vmatmul.mubr.bf16.vlgmr.msra.gmra.mrb[36].mxu0 %v941_v54  ;;  %1528 = vmatmul.mubr.bf16.vlgmr.msra.gmra.mrb[28].mxu1 %v941_v54 }
 0x54e   :  { %1048 = vmatpush1.bf16.msra.mxu0 %v2286_v55  ;;  %1532 = vmatpush3.bf16.msra.mxu1 %v1848_v24  ;;  %v2310_v24 = vld [vmem:[%s2456_s2 + $0x34] ss:$12 sps:$4 sm:$0xff]  }
 0x54f   :  { %1049 = vmatprep.subr.bf16.mxu0 %v2293_v26  ;;  %1533 = vmatprep.subr.bf16.mxu1 %v2474_v63 }
 0x550   :  { %1079 = vmatprep.mubr.bf16.mxu0 %v2475_v6  ;;  %1547 = vmatprep.mubr.msk.bf16.mxu1 %vm1720_vm1, %v2474_v63 }
 0x552   :  { %1050 = vmatpush1.bf16.msra.mxu0 %v2303_v17  ;;  %1534 = vmatpush3.bf16.msra.mxu1 %v1868_v29  ;;  %v2324_v29 = vld [vmem:[%s2456_s2 + $0x4c] ss:$12 sps:$4 sm:$0xff]  }
 0x553   :  { %1051 = vmatprep.subr.bf16.mxu0 %v2310_v24  ;;  %1535 = vmatprep.subr.bf16.mxu1 %v2474_v63 }
 0x556   :  { %1052 = vmatpush1.bf16.msra.mxu0 %v2317_v56  ;;  %1536 = vmatpush3.bf16.msra.mxu1 %v1896_v34 }
 0x557   :  { %1053 = vmatprep.subr.bf16.mxu0 %v2324_v29  ;;  %1537 = vmatprep.subr.bf16.mxu1 %v2474_v63 }
 0x55a   :  { %1054 = vmatpush1.bf16.msra.mxu0 %v2331_v59  ;;  %1538 = vmatpush3.bf16.msra.mxu1 %v1916_v38 }
 0x55b   :  { %1055 = vmatprep.subr.bf16.mxu0 %v1842_v23  ;;  %1539 = vmatprep.subr.bf16.mxu1 %v2474_v63  ;;  %v1701_v23 = vld [vmem:[%s2456_s2 + $0x4] ss:$12 sps:$4 sm:$0xff]  }
 0x55e   :  { %1056 = vmatpush1.bf16.msra.mxu0 %v1854_v27  ;;  %1540 = vmatpush3.bf16.msra.mxu1 %v1934_v40 }
 0x55f   :  { %1057 = vmatprep.subr.bf16.mxu0 %v1860_v28  ;;  %1541 = vmatprep.subr.bf16.mxu1 %v2474_v63 }
 0x562   :  { %1058 = vmatpush1.bf16.msra.mxu0 %v1883_v32  ;;  %1542 = vmatpush3.bf16.msra.mxu1 %v1942_v41 }
 0x563   :  { %1059 = vmatprep.subr.bf16.mxu0 %v1890_v33  ;;  %1543 = vmatprep.subr.bf16.mxu1 %v2474_v63 }
 0x566   :  { %1060 = vmatpush1.bf16.msra.mxu0 %v1903_v36  ;;  %1544 = vmatpush3.bf16.msra.mxu1 %v1953_v42  ;;  %v2476_v42 = vld [vmem:[#allocation2_spill] sm:$0xff] }
 0x567   :  { %1061 = vmatprep.subr.bf16.mxu0 %v1910_v37  ;;  %1545 = vmatprep.subr.bf16.mxu1 %v2474_v63 }
 0x56a   :  { %1062 = vmatpush1.bf16.msra.mxu0 %v1926_v39  ;;  %1546 = vmatpush3.bf16.msra.mxu1 %v1962_v43 }
 0x56b   :  { %1152 = vmatprep.subr.bf16.mxu0 %v1701_v23  ;;  %1551 = vmatprep.subr.bf16.mxu1 %v2474_v63 }
 0x620   :  { %v976_v27 = vpop.f32.mrb[36].mxu0  ;;  %v1017_v28 = vpop.f32.mrb[28].mxu1 }
 0x621   :  { %v977_v32 = vadd.f32 %v976_v27, %v2063_v58  ;;  %v978_v33 = vpop.f32.mrb[37].mxu0  ;;  %v1529_v34 = vpop.f32.mrb[29].mxu1  ;;  %v1018_v21 = vadd.f32 %v1017_v28, %v2071_v50 }
 0x622   :  { %v979_v36 = vadd.f32 %v978_v33, %v2065_v60  ;;  %v980_v37 = vpop.f32.mrb[38].mxu0  ;;  %v1020_v38 = vpop.f32.mrb[30].mxu1 }
 0x623   :  { %v1023_v39 = vadd.f32 %v977_v32, %v2036_v30  ;;  %v981_v40 = vpop.f32.mrb[39].mxu0  ;;  %v1530_v41 = vpop.f32.mrb[31].mxu1 }
 0x624   :  { %v1030_v43 = vadd.f32 %v979_v36, %v2476_v42  ;;  %v2480_v40 = vld [vmem:[#allocation3_spill] sm:$0xff] }
 0x625   :  { %v1312_v0 = vmul.f32 -1.442695, %v1023_v39 }
 0x626   :  { %v1313_v44 = vmul.f32 -1.442695, %v1030_v43 }
 0x627   :  { %1664 = vpow2.f32 %v1312_v0 }
 0x628   :  { %1666 = vpow2.f32 %v1313_v44 }
 0x631   :  { %v1665_v46 = vpop.eup %1664 }
 0x632   :  { %v1027_v3 = vadd.f32 1.0, %v1665_v46  ;;  %v1667_v61 = vpop.eup %1666 }
 0x633   :  { %v1034_v53 = vadd.f32 1.0, %v1667_v61 }
 0x634   :  { %1668 = vrcp.f32 %v1027_v3 }
 0x635   :  { %1670 = vrcp.f32 %v1034_v53 }
 0x63e   :  { %v1669_v7 = vpop.eup %1668 }
 0x63f   :  { %v1037_v9 = vmul.f32 %v1669_v7, %v1018_v21  ;;  %v1671_v11 = vpop.eup %1670 }
 0x640   :  { %v1040_v14 = vsub.f32 1.0, %v1671_v11  ;;  %v1042_v20 = vmul.f32 %v1671_v11, %v2275_v45 }
 0x641   :  { %v1038_v30 = vadd.f32 %v1037_v9, %v2477_v10 }
 0x643   :  { %1672 = vtanh.f32 %v1038_v30 }
 0x64d   :  { %v1673_v18 = vpop.eup %1672 }
 0x64e   :  { %v1041_v19 = vmul.f32 %v1673_v18, %v1040_v14  ;;  %v2481_v18 = vld [vmem:[#allocation8_spill] sm:$0xff] }
 0x650   :  { %v2362_v13 = vadd.f32 %v1042_v20, %v1041_v19 }
 0x652   :  { %1314 = vst [vmem:[%s2459_s5 + $0x28] sm:$0xff] %v2362_v13  ;;  %v1046_v49 = vpack.c.bf16 %v2362_v13, %v2362_v13 }
 0x654   :  { %1080 = vmatmul.mubr.bf16.vlgmr.msra.gmra.mrb[40].mxu0 %v1046_v49  ;;  %1548 = vmatmul.mubr.bf16.vlgmr.msra.gmra.mrb[32].mxu1 %v1046_v49  ;;  %v2482_v49 = vld [vmem:[#allocation9_spill] sm:$0xff] }
 0x655   :  { %1153 = vmatpush1.bf16.msra.mxu0 %v2286_v55  ;;  %1552 = vmatpush3.bf16.msra.mxu1 %v1702_v5 }
 0x656   :  { %1154 = vmatprep.subr.bf16.mxu0 %v2293_v26  ;;  %1553 = vmatprep.subr.bf16.mxu1 %v2474_v63 }
 0x657   :  { %1184 = vmatprep.mubr.bf16.mxu0 %v2475_v6  ;;  %1567 = vmatprep.mubr.msk.bf16.mxu1 %vm1720_vm1, %v2474_v63  ;;  %v1704_v6 = vld [vmem:[%s2456_s2 + $0x38] ss:$12 sps:$4 sm:$0xff]  }
 0x659   :  { %1155 = vmatpush1.bf16.msra.mxu0 %v2303_v17  ;;  %1554 = vmatpush3.bf16.msra.mxu1 %v1703_v48  ;;  %v2478_v17 = vld [vmem:[#allocation5_spill] sm:$0xff] }
 0x65a   :  { %1156 = vmatprep.subr.bf16.mxu0 %v2310_v24  ;;  %1555 = vmatprep.subr.bf16.mxu1 %v2474_v63 }
 0x65d   :  { %1157 = vmatpush1.bf16.msra.mxu0 %v2317_v56  ;;  %1556 = vmatpush3.bf16.msra.mxu1 %v1704_v6 }
 0x65e   :  { %1158 = vmatprep.subr.bf16.mxu0 %v2324_v29  ;;  %1557 = vmatprep.subr.bf16.mxu1 %v2474_v63 }
 0x661   :  { %1159 = vmatpush1.bf16.msra.mxu0 %v2331_v59  ;;  %1558 = vmatpush3.bf16.msra.mxu1 %v1705_v1  ;;  %v2479_v59 = vld [vmem:[#allocation7_spill] sm:$0xff] }
 0x662   :  { %1160 = vmatprep.subr.bf16.mxu0 %v1706_v51  ;;  %1559 = vmatprep.subr.bf16.mxu1 %v2474_v63 }
 0x665   :  { %1161 = vmatpush1.bf16.msra.mxu0 %v1707_v8  ;;  %1560 = vmatpush3.bf16.msra.mxu1 %v1708_v52 }
 0x666   :  { %1162 = vmatprep.subr.bf16.mxu0 %v1709_v25  ;;  %1561 = vmatprep.subr.bf16.mxu1 %v2474_v63 }
 0x669   :  { %1163 = vmatpush1.bf16.msra.mxu0 %v1710_v57  ;;  %1562 = vmatpush3.bf16.msra.mxu1 %v1711_v47  ;;  %v2483_v57 = vld [vmem:[#allocation4_spill] sm:$0xff] }
 0x66a   :  { %1164 = vmatprep.subr.bf16.mxu0 %v1712_v62  ;;  %1563 = vmatprep.subr.bf16.mxu1 %v2474_v63 }
 0x66d   :  { %1165 = vmatpush1.bf16.msra.mxu0 %v1713_v4  ;;  %1564 = vmatpush3.bf16.msra.mxu1 %v1714_v15 }
 0x66e   :  { %1166 = vmatprep.subr.bf16.mxu0 %v1715_v16  ;;  %1565 = vmatprep.subr.bf16.mxu1 %v2474_v63 }
 0x671   :  { %1167 = vmatpush1.bf16.msra.mxu0 %v1716_v12  ;;  %1566 = vmatpush3.bf16.msra.mxu1 %v1717_v31 }
 0x727   :  { %v1081_v22 = vpop.f32.mrb[40].mxu0  ;;  %v1122_v35 = vpop.f32.mrb[32].mxu1 }
 0x728   :  { %v1082_v2 = vadd.f32 %v1081_v22, %v2063_v58  ;;  %v1083_v45 = vpop.f32.mrb[41].mxu0  ;;  %v1549_v54 = vpop.f32.mrb[33].mxu1  ;;  %v1123_v37 = vadd.f32 %v1122_v35, %v2071_v50 }
 0x729   :  { %v1084_v55 = vadd.f32 %v1083_v45, %v2065_v60  ;;  %v1085_v26 = vpop.f32.mrb[42].mxu0  ;;  %v1125_v63 = vpop.f32.mrb[34].mxu1 }
 0x72a   :  { %v1128_v24 = vadd.f32 %v1082_v2, %v2478_v17  ;;  %v1086_v56 = vpop.f32.mrb[43].mxu0  ;;  %v1550_v29 = vpop.f32.mrb[35].mxu1 }
 0x72b   :  { %v1135_v23 = vadd.f32 %v1084_v55, %v2479_v59 }
 0x72c   :  { %v1315_v27 = vmul.f32 -1.442695, %v1128_v24 }
 0x72d   :  { %v1316_v28 = vmul.f32 -1.442695, %v1135_v23 }
 0x72e   :  { %1674 = vpow2.f32 %v1315_v27 }
 0x72f   :  { %1676 = vpow2.f32 %v1316_v28 }
 0x738   :  { %v1675_v32 = vpop.eup %1674 }
 0x739   :  { %v1132_v33 = vadd.f32 1.0, %v1675_v32  ;;  %v1677_v34 = vpop.eup %1676 }
 0x73a   :  { %v1139_v36 = vadd.f32 1.0, %v1677_v34 }
 0x73b   :  { %1678 = vrcp.f32 %v1132_v33 }
 0x73c   :  { %1680 = vrcp.f32 %v1139_v36 }
 0x745   :  { %v1679_v38 = vpop.eup %1678 }
 0x746   :  { %v1142_v39 = vmul.f32 %v1679_v38, %v1123_v37  ;;  %v1681_v42 = vpop.eup %1680 }
 0x747   :  { %v1145_v43 = vsub.f32 1.0, %v1681_v42  ;;  %v1147_v46 = vmul.f32 %v1681_v42, %v2362_v13 }
 0x748   :  { %v1143_v41 = vadd.f32 %v1142_v39, %v2480_v40 }
 0x74a   :  { %1682 = vtanh.f32 %v1143_v41 }
 0x754   :  { %v1683_v0 = vpop.eup %1682 }
 0x755   :  { %v1146_v44 = vmul.f32 %v1683_v0, %v1145_v43 }
 0x757   :  { %v1148_v3 = vadd.f32 %v1147_v46, %v1146_v44 }
 0x759   :  { %1317 = vst [vmem:[%s2459_s5 + $0x30] sm:$0xff] %v1148_v3  ;;  %v1151_v61 = vpack.c.bf16 %v1148_v3, %v1148_v3 }
 0x75b   :  { %1185 = vmatmul.mubr.bf16.vlgmr.msra.gmra.mrb[44].mxu0 %v1151_v61  ;;  %1568 = vmatmul.mubr.bf16.vlgmr.msra.gmra.mrb[36].mxu1 %v1151_v61 }
 0x82e   :  { %v1186_v53 = vpop.f32.mrb[44].mxu0  ;;  %v1227_v21 = vpop.f32.mrb[36].mxu1 }
 0x82f   :  { %v1187_v7 = vadd.f32 %v1186_v53, %v2063_v58  ;;  %v1188_v9 = vpop.f32.mrb[45].mxu0  ;;  %v1569_v10 = vpop.f32.mrb[37].mxu1  ;;  %v1228_v52 = vadd.f32 %v1227_v21, %v2071_v50 }
 0x830   :  { %v1189_v30 = vadd.f32 %v1188_v9, %v2065_v60  ;;  %v1190_v11 = vpop.f32.mrb[46].mxu0  ;;  %v1230_v14 = vpop.f32.mrb[38].mxu1 }
 0x831   :  { %v1233_v19 = vadd.f32 %v1187_v7, %v2481_v18  ;;  %v1191_v20 = vpop.f32.mrb[47].mxu0  ;;  %v1570_v13 = vpop.f32.mrb[39].mxu1 }
 0x832   :  { %v1240_v5 = vadd.f32 %v1189_v30, %v2482_v49 }
 0x833   :  { %v1318_v48 = vmul.f32 -1.442695, %v1233_v19 }
 0x834   :  { %v1319_v6 = vmul.f32 -1.442695, %v1240_v5 }
 0x835   :  { %1684 = vpow2.f32 %v1318_v48 }
 0x836   :  { %1686 = vpow2.f32 %v1319_v6 }
 0x83f   :  { %v1685_v1 = vpop.eup %1684 }
 0x840   :  { %v1237_v51 = vadd.f32 1.0, %v1685_v1  ;;  %v1687_v58 = vpop.eup %1686 }
 0x841   :  { %v1244_v8 = vadd.f32 1.0, %v1687_v58 }
 0x842   :  { %1688 = vrcp.f32 %v1237_v51 }
 0x843   :  { %1690 = vrcp.f32 %v1244_v8 }
 0x84c   :  { %v1689_v60 = vpop.eup %1688 }
 0x84d   :  { %v1247_v25 = vmul.f32 %v1689_v60, %v1228_v52  ;;  %v1691_v62 = vpop.eup %1690 }
 0x84e   :  { %v1250_v4 = vsub.f32 1.0, %v1691_v62  ;;  %v1252_v12 = vmul.f32 %v1691_v62, %v1148_v3 }
 0x84f   :  { %v1248_v47 = vadd.f32 %v1247_v25, %v2483_v57 }
 0x851   :  { %1692 = vtanh.f32 %v1248_v47 }
 0x85b   :  { %v1693_v15 = vpop.eup %1692 }
 0x85c   :  { %v1251_v16 = vmul.f32 %v1693_v15, %v1250_v4 }
 0x85e   :  { %v1253_v31 = vadd.f32 %v1252_v12, %v1251_v16 }
 0x860   :  { %1320 = vst [vmem:[%s2459_s5 + $0x38] sm:$0xff] %v1253_v31 }

// kernel: _forward_impl.3
= control target key start
LH: loop header
LB: loop body
LE: loop exit
PB: predicated region body
PF: predicated region fallthrough
CT: control target
= control target key end

     0   :  { %s2979_s0 = inlined_call_operand.vmem [shape: s32[5], index: 0, kind: input, shape index: {}]   ;;  %s2980_s1 = inlined_call_operand.vmem [shape: f32[6,8,128], index: 1, kind: input, shape index: {}]   ;;  %s2981_s2 = inlined_call_operand.vmem [shape: f32[8,128], index: 2, kind: input, shape index: {}]   ;;  %s2982_s3 = inlined_call_operand.vmem [shape: f32[8,8,128], index: 3, kind: input, shape index: {}]   ;;  %s2983_s4 = inlined_call_operand.vmem [shape: bf16[128,32], index: 4, kind: input, shape index: {}]   ;;  %s2984_s5 = inlined_call_operand.vmem [shape: bf16[128,128], index: 5, kind: input, shape index: {}]   ;;  %s2985_s6 = inlined_call_operand.vmem [shape: bf16[128,128], index: 6, kind: input, shape index: {}]   ;;  %s2986_s7 = inlined_call_operand.vmem [shape: f32[1,128], index: 7, kind: input, shape index: {}]   ;;  %s2987_s8 = inlined_call_operand.vmem [shape: f32[1,128], index: 8, kind: input, shape index: {}]   ;;  %s2988_s9 = inlined_call_operand.vmem [shape: bf16[32,384], index: 9, kind: input, shape index: {}]   ;;  %s2989_s10 = inlined_call_operand.vmem [shape: bf16[128,384], index: 10, kind: input, shape index: {}]   ;;  %s2990_s11 = inlined_call_operand.vmem [shape: bf16[128,384], index: 11, kind: input, shape index: {}]   ;;  %s2991_s12 = inlined_call_operand.vmem [shape: f32[1,384], index: 12, kind: input, shape index: {}]   ;;  %s2992_s13 = inlined_call_operand.vmem [shape: f32[1,384], index: 13, kind: input, shape index: {}]   ;;  %s2993_s14 = inlined_call_operand.vmem [shape: bf16[256,128], index: 14, kind: input, shape index: {}]   ;;  %s2994_s15 = inlined_call_operand.vmem [shape: f32[1,128], index: 15, kind: input, shape index: {}]   ;;  %s2995_s16 = inlined_call_operand.vmem [shape: f32[5,8,128], index: 16, kind: output, shape index: {}]  }
   0x1   :  { %2997 = sst [smem:[#allocation8_spill]] %s2979_s0 }
   0x2   :  { %2998 = sst [smem:[#allocation9_spill]] %s2988_s9  ;;  %s2999_s23 = sld [smem:[#allocation8_spill]] }
   0x8   :  { %s21_s9 = sshll.u32 %s2999_s23, 4  ;;  %s22_s9 = int_to_ptr.vmem [resolvable:$true] %s21_s9 }
   0x9   :  { %s2416_s24 = scalar_lea.vmem %s22_s9, 16  ;;  %p2421_p1 = scmp.lt.s32.totalorder %s22_s9, %s22_s9 }
   0xa   :  { %p2417_p0 = scmp.ne.s32.totalorder %s22_s9, %s2416_s24  ;;  %p2422_p2 = scmp.lt.s32.totalorder %s2416_s24, %s2416_s24 }
   0xc   :  { %p2423_p3 = por %p2422_p2, %p2421_p1 }
   0xe   :  { %p2424_p4 = pnand %p2423_p3, %p2417_p0 }
  0x10   :  { %2427 = shalt.err (!%p2424_p4)  }
  0x11   :  { %s2438_s25 = smov [#allocation6]  }
  0x12   :  { %24 = dma.vmem_to_smem %s22_s9, 16, %s2438_s25, [#allocation5] }
  0x13   :  { %2432 = dma.done.wait [#allocation5], 16 }
  0x14   :  { %2433 = vsyncadd [#allocation5], 4294967280 }
  0x15   :  { %26 = sfence }
  0x16   :  { %s2530_s26 = smov 0  }
  0x17 LB: > { %s2536_s27 = sadd.s32 4294967295, %s2436_s26   ;;  %p1926_p5 = scmp.ge.s32.totalorder %s2436_s26, 1  ;;  %s2436_s26 = sphi %s2530_s26, %s32_s26  }
  0x18   : > { %p434_p6 = scmp.lt.s32.totalorder %s2436_s26, 6 }
  0x1a   : > { %p435_p7 = pnand %p1926_p5, %p434_p6 }
  0x1b   : > { %p476_p8 = scmp.lt.s32.totalorder (!%p435_p7), %s2536_s27, 4  ;;  %p1928_p9 = scmp.ne.s32.totalorder (!%p435_p7), %s2536_s27, 0 }
  0x1c   : > { %438 = sbr.rel (%p435_p7) target bundleno = 2037 (0x7f5), region = 80 }
  0x23   : > { %s477_s9 = scalar_select %p476_p8, %s2536_s27, 4 }
  0x24   : > { %484 = sbr.rel (%p1928_p9) target bundleno = 287 (0x11f), region = 84  ;;  %v485_v0 = vld [vmem:[%s2981_s2] sm:$0xff] (!%p1928_p9)  ;;  %v2257_v3 = vld [vmem:[%s2985_s6 + $0x8] sm:$0xff] (!%p1928_p9)   ;;  %v2258_v4 = vld [vmem:[%s2985_s6 + $0x10] sm:$0xff] (!%p1928_p9)  }
  0x25   : > { %s1927_s28 = sshll.u32 %s477_s9, 3  ;;  %v487_v1 = vld [vmem:[%s2980_s1] sm:$0xff] (!%p1928_p9)  ;;  %486 = vst [vmem:[#allocation2] sm:$0xff] (!%p1928_p9), %v485_v0  ;;  %v2259_v5 = vld [vmem:[%s2985_s6 + $0x18] sm:$0xff] (!%p1928_p9)   ;;  %v490_v7 = vld [vmem:[%s2982_s3 + $0x8] sm:$0xff] (!%p1928_p9) }
  0x26   : > { %s2545_s0 = scalar_lea.vmem %s2995_s16, %s1927_s28  ;;  %488 = vst [vmem:[#allocation3] sm:$0xff] (!%p1928_p9), %v487_v1  ;;  %v2256_v2 = vld [vmem:[%s2985_s6] sm:$0xff] (!%p1928_p9)   ;;  %v494_v9 = vld [vmem:[%s2982_s3 + $0x28] sm:$0xff] (!%p1928_p9)  ;;  %v2262_v14 = vld [vmem:[%s2985_s6 + $0x30] sm:$0xff] (!%p1928_p9)  }
  0x27   : > { %2108 = vmatprep.subr.bf16.mxu0 (!%p1928_p9), %v2256_v2  ;;  %2220 = vmatprep.subr.bf16.mxu1 (!%p1928_p9), %v2256_v2  ;;  %v489_v6 = vld [vmem:[%s2982_s3] sm:$0xff] (!%p1928_p9)  ;;  %v2261_v13 = vld [vmem:[%s2985_s6 + $0x28] sm:$0xff] (!%p1928_p9)   ;;  %v2263_v15 = vld [vmem:[%s2985_s6 + $0x38] sm:$0xff] (!%p1928_p9)  }
  0x28   : > { %2109 = vmatpush3.bf16.msra.mxu0 (!%p1928_p9), %v2256_v2  ;;  %2228 = vmatpush3.bf16.msra.mxu1 (!%p1928_p9), %v2256_v2  ;;  %v493_v8 = vld [vmem:[%s2982_s3 + $0x20] sm:$0xff] (!%p1928_p9)  ;;  %v497_v10 = vpack.c.bf16 (!%p1928_p9), %v490_v7, %v489_v6  ;;  %v491_v16 = vld [vmem:[%s2982_s3 + $0x10] sm:$0xff] (!%p1928_p9)  ;;  %v492_v17 = vld [vmem:[%s2982_s3 + $0x18] sm:$0xff] (!%p1928_p9) }
  0x29   : > { %2110 = vmatprep.subr.bf16.mxu0 (!%p1928_p9), %v2257_v3  ;;  %2221 = vmatprep.subr.bf16.mxu1 (!%p1928_p9), %v2257_v3  ;;  %v499_v11 = vpack.c.bf16 (!%p1928_p9), %v494_v9, %v493_v8  ;;  %v2260_v12 = vld [vmem:[%s2985_s6 + $0x20] sm:$0xff] (!%p1928_p9)   ;;  %v495_v18 = vld [vmem:[%s2982_s3 + $0x30] sm:$0xff] (!%p1928_p9)  ;;  %v496_v19 = vld [vmem:[%s2982_s3 + $0x38] sm:$0xff] (!%p1928_p9)  ;;  %v498_v20 = vpack.c.bf16 (!%p1928_p9), %v492_v17, %v491_v16 }
  0x2a   : > { %2124 = vmatprep.mubr.bf16.mxu0 (!%p1928_p9), %v497_v10  ;;  %v500_v21 = vpack.c.bf16 (!%p1928_p9), %v496_v19, %v495_v18 }
  0x2b   : > { %2128 = vmatprep.mubr.bf16.mxu1 %v499_v11 }
  0x2c   : > { %2111 = vmatpush3.bf16.msra.mxu0 %v2257_v3  ;;  %2229 = vmatpush3.bf16.msra.mxu1 %v2257_v3 }
  0x2d   : > { %2112 = vmatprep.subr.bf16.mxu0 %v2258_v4  ;;  %2222 = vmatprep.subr.bf16.mxu1 %v2258_v4 }
  0x30   : > { %2113 = vmatpush3.bf16.msra.mxu0 %v2258_v4  ;;  %2230 = vmatpush3.bf16.msra.mxu1 %v2258_v4 }
  0x31   : > { %2114 = vmatprep.subr.bf16.mxu0 %v2259_v5  ;;  %2223 = vmatprep.subr.bf16.mxu1 %v2259_v5 }
  0x34   : > { %2115 = vmatpush3.bf16.msra.mxu0 %v2259_v5  ;;  %2231 = vmatpush3.bf16.msra.mxu1 %v2259_v5 }
  0x35   : > { %2116 = vmatprep.subr.bf16.mxu0 %v2260_v12  ;;  %2224 = vmatprep.subr.bf16.mxu1 %v2260_v12 }
  0x38   : > { %2117 = vmatpush3.bf16.msra.mxu0 %v2260_v12  ;;  %2232 = vmatpush3.bf16.msra.mxu1 %v2260_v12 }
  0x39   : > { %2118 = vmatprep.subr.bf16.mxu0 %v2261_v13  ;;  %2225 = vmatprep.subr.bf16.mxu1 %v2261_v13 }
  0x3c   : > { %2119 = vmatpush3.bf16.msra.mxu0 %v2261_v13  ;;  %2233 = vmatpush3.bf16.msra.mxu1 %v2261_v13 }
  0x3d   : > { %2120 = vmatprep.subr.bf16.mxu0 %v2262_v14  ;;  %2226 = vmatprep.subr.bf16.mxu1 %v2262_v14 }
  0x40   : > { %2121 = vmatpush3.bf16.msra.mxu0 %v2262_v14  ;;  %2234 = vmatpush3.bf16.msra.mxu1 %v2262_v14 }
  0x41   : > { %2122 = vmatprep.subr.bf16.mxu0 %v2263_v15  ;;  %2227 = vmatprep.subr.bf16.mxu1 %v2263_v15 }
  0x44   : > { %2123 = vmatpush3.bf16.msra.mxu0 %v2263_v15  ;;  %2235 = vmatpush3.bf16.msra.mxu1 %v2263_v15 }
  0x47   : > { %2125 = vmatmul.mubr.bf16.vlgmr.msra.gmra.mrb[0].mxu0 %v498_v20  ;;  %2129 = vmatmul.mubr.bf16.vlgmr.msra.gmra.mrb[0].mxu1 %v500_v21 }
 0x11a   : > { %v2126_v22 = vpop.f32.mrb[0].mxu0  ;;  %v2130_v23 = vpop.f32.mrb[0].mxu1 }
 0x11b   : > { %632 = vst [vmem:[#allocation4 + $0x10] sm:$0xff] %v2126_v22  ;;  %636 = vst [vmem:[#allocation4 + $0x30] sm:$0xff] %v2130_v23  ;;  %v599_v24 = vpop.f32.mrb[1].mxu0  ;;  %v615_v25 = vpop.f32.mrb[1].mxu1 }
 0x11c   : > { %630 = vst [vmem:[#allocation4] sm:$0xff] %v599_v24  ;;  %634 = vst [vmem:[#allocation4 + $0x20] sm:$0xff] %v615_v25  ;;  %v2127_v26 = vpop.f32.mrb[2].mxu0  ;;  %v2131_v27 = vpop.f32.mrb[2].mxu1 }
 0x11d   : > { %633 = vst [vmem:[#allocation4 + $0x18] sm:$0xff] %v2127_v26  ;;  %637 = vst [vmem:[#allocation4 + $0x38] sm:$0xff] %v2131_v27  ;;  %v602_v28 = vpop.f32.mrb[3].mxu0  ;;  %v618_v29 = vpop.f32.mrb[3].mxu1 }
 0x11e   : > { %631 = vst [vmem:[#allocation4 + $0x8] sm:$0xff] %v602_v28  ;;  %635 = vst [vmem:[#allocation4 + $0x28] sm:$0xff] %v618_v29 }
 0x11f PF: > { %v2264_v30 = vld [vmem:[%s2984_s5] sm:$0xff]   ;;  %v2439_v31 = vmov 0.0   ;;  %v2265_v32 = vld [vmem:[%s2984_s5 + $0x8] sm:$0xff]   ;;  %vm2440_vm0 = vmmov 0   ;;  %v2266_v33 = vld [vmem:[%s2984_s5 + $0x10] sm:$0xff]   ;;  %s3000_s24 = sld [smem:[#allocation9_spill]] }
 0x120   : > { %2152 = vmatprep.subr.bf16.mxu1 %v2439_v31  ;;  %2132 = vmatprep.subr.bf16.mxu0 %v2439_v31  ;;  %v2267_v34 = vld [vmem:[%s2984_s5 + $0x18] sm:$0xff]   ;;  %v2268_v35 = vld [vmem:[%s2984_s5 + $0x20] sm:$0xff]   ;;  %v2269_v36 = vld [vmem:[%s2984_s5 + $0x28] sm:$0xff]   ;;  %vm1273_vm1 = vcmask 261120   ;;  %s1868_s28 = sld [smem:[#allocation6 + %s2536_s27]] }
 0x121   : > { %2153 = vmatpush3.bf16.msra.mxu1 %v2264_v30  ;;  %2168 = vmatprep.mubr.msk.bf16.mxu1 %vm2440_vm0, %v2439_v31  ;;  %v2270_v37 = vld [vmem:[%s2984_s5 + $0x30] sm:$0xff]   ;;  %v2271_v38 = vld [vmem:[%s2984_s5 + $0x38] sm:$0xff]   ;;  %v2638_v39 = vld [vmem:[#allocation2] sm:$0xff] }
 0x122   : > { %2154 = vmatprep.subr.bf16.mxu1 %v2439_v31  ;;  %2148 = vmatprep.mubr.msk.bf16.mxu0 %vm2440_vm0, %v2439_v31  ;;  %v2643_v40 = vpack.c.bf16 %v2638_v39, %v2638_v39  ;;  %v2272_v41 = vld [vmem:[%s2983_s4] sm:$0xff]   ;;  %v2273_v42 = vld [vmem:[%s2983_s4 + $0x8] sm:$0xff]   ;;  %v2274_v43 = vld [vmem:[%s2983_s4 + $0x10] sm:$0xff]  }
 0x123   : > { %2133 = vmatpush3.bf16.msra.mxu0 %v2272_v41  ;;  %v2275_v44 = vld [vmem:[%s2983_s4 + $0x18] sm:$0xff]   ;;  %v2276_v45 = vld [vmem:[%s2983_s4 + $0x20] sm:$0xff]   ;;  %v2277_v46 = vld [vmem:[%s2983_s4 + $0x28] sm:$0xff]  }
 0x124   : > { %2134 = vmatprep.subr.bf16.mxu0 %v2439_v31  ;;  %v2278_v47 = vld [vmem:[%s2983_s4 + $0x30] sm:$0xff]   ;;  %v2279_v48 = vld [vmem:[%s2983_s4 + $0x38] sm:$0xff]   ;;  %v639_v49 = vld [vmem:[#allocation3] sm:$0xff] }
 0x125   : > { %2155 = vmatpush3.bf16.msra.mxu1 %v2265_v32  ;;  %v640_v50 = vpack.c.bf16 %v639_v49, %v639_v49  ;;  %v852_v51 = vld [vmem:[#allocation4 + $0x10] sm:$0xff]  ;;  %v850_v52 = vld [vmem:[#allocation4] sm:$0xff]  ;;  %v853_v53 = vld [vmem:[#allocation4 + $0x18] sm:$0xff] }
 0x126   : > { %2156 = vmatprep.subr.bf16.mxu1 %v2439_v31  ;;  %v851_v54 = vld [vmem:[#allocation4 + $0x8] sm:$0xff]  ;;  %v1953_v56 = vld [vmem:[%s2986_s7] ss:$0 sm:$0xff]  ;;  %v854_v63 = vld [vmem:[#allocation4 + $0x20] sm:$0xff]  ;;  %p1869_p10 = scmp.ne.s32.totalorder %s1868_s28, 0 }
 0x127   : > { %2135 = vmatpush3.bf16.msra.mxu0 %v2273_v42  ;;  %v855_v57 = vld [vmem:[#allocation4 + $0x28] sm:$0xff]  ;;  %v857_v8 = vld [vmem:[#allocation4 + $0x38] sm:$0xff]  ;;  %v856_v9 = vld [vmem:[#allocation4 + $0x30] sm:$0xff] }
 0x128   : > { %2136 = vmatprep.subr.bf16.mxu0 %v2439_v31  ;;  %v1954_v16 = vld [vmem:[%s2987_s8] ss:$0 sm:$0xff]  ;;  %s1874_s29 = scalar_select %p1869_p10, 1, 0 }
 0x129   : > { %2157 = vmatpush3.bf16.msra.mxu1 %v2266_v33  ;;  %v2287_v41 = vld [vmem:[%s2989_s10 + $0x20] ss:$12 sps:$4 sm:$0xff]  }
 0x12a   : > { %2158 = vmatprep.subr.bf16.mxu1 %v2439_v31  ;;  %v2290_v42 = vld [vmem:[%s2989_s10 + $0x34] ss:$12 sps:$4 sm:$0xff]  }
 0x12b   : > { %2137 = vmatpush3.bf16.msra.mxu0 %v2274_v43  ;;  %v2288_v43 = vld [vmem:[%s2989_s10 + $0x30] ss:$12 sps:$4 sm:$0xff]   ;;  %v2296_v49 = vld [vmem:[%s2989_s10 + $0x60] ss:$12 sps:$4 sm:$0xff]  }
 0x12c   : > { %2138 = vmatprep.subr.bf16.mxu0 %v2439_v31 }
 0x12d   : > { %2159 = vmatpush3.bf16.msra.mxu1 %v2267_v34  ;;  %v2282_v34 = vld [vmem:[%s2989_s10 + $0x4] ss:$12 sps:$4 sm:$0xff]  }
 0x12e   : > { %2160 = vmatprep.subr.bf16.mxu1 %v2439_v31 }
 0x12f   : > { %2139 = vmatpush3.bf16.msra.mxu0 %v2275_v44  ;;  %v2291_v44 = vld [vmem:[%s2989_s10 + $0x38] ss:$12 sps:$4 sm:$0xff]  }
 0x130   : > { %2140 = vmatprep.subr.bf16.mxu0 %v2439_v31 }
 0x131   : > { %2161 = vmatpush3.bf16.msra.mxu1 %v2268_v35  ;;  %v2280_v35 = vld [vmem:[%s2989_s10] ss:$12 sps:$4 sm:$0xff]  }
 0x132   : > { %2162 = vmatprep.subr.bf16.mxu1 %v2439_v31 }
 0x133   : > { %2141 = vmatpush3.bf16.msra.mxu0 %v2276_v45  ;;  %v2294_v45 = vld [vmem:[%s2989_s10 + $0x4c] ss:$12 sps:$4 sm:$0xff]  }
 0x134   : > { %2142 = vmatprep.subr.bf16.mxu0 %v2439_v31 }
 0x135   : > { %2163 = vmatpush3.bf16.msra.mxu1 %v2269_v36  ;;  %v2283_v36 = vld [vmem:[%s2989_s10 + $0x8] ss:$12 sps:$4 sm:$0xff]  }
 0x136   : > { %2164 = vmatprep.subr.bf16.mxu1 %v2439_v31 }
 0x137   : > { %2143 = vmatpush3.bf16.msra.mxu0 %v2277_v46  ;;  %v2292_v46 = vld [vmem:[%s2989_s10 + $0x48] ss:$12 sps:$4 sm:$0xff]  }
 0x138   : > { %2144 = vmatprep.subr.bf16.mxu0 %v2439_v31 }
 0x139   : > { %2165 = vmatpush3.bf16.msra.mxu1 %v2270_v37  ;;  %v2286_v37 = vld [vmem:[%s2989_s10 + $0x1c] ss:$12 sps:$4 sm:$0xff]  }
 0x13a   : > { %2166 = vmatprep.subr.bf16.mxu1 %v2439_v31 }
 0x13b   : > { %2145 = vmatpush3.bf16.msra.mxu0 %v2278_v47  ;;  %v2295_v47 = vld [vmem:[%s2989_s10 + $0x50] ss:$12 sps:$4 sm:$0xff]  }
 0x13c   : > { %2146 = vmatprep.subr.bf16.mxu0 %v2439_v31 }
 0x13d   : > { %2167 = vmatpush3.bf16.msra.mxu1 %v2271_v38  ;;  %v2284_v38 = vld [vmem:[%s2989_s10 + $0x18] ss:$12 sps:$4 sm:$0xff]  }
 0x13e   : > { %2172 = vmatprep.subr.bf16.mxu1 %v2439_v31 }
 0x13f   : > { %2147 = vmatpush3.bf16.msra.mxu0 %v2279_v48  ;;  %v2298_v48 = vld [vmem:[%s2989_s10 + $0x64] ss:$12 sps:$4 sm:$0xff]  }
 0x140   : > { %2169 = vmatmul.mubr.bf16.vlgmr.msra.gmra.mrb[0].mxu1 %v2643_v40  ;;  %1160 = vmatprep.subr.bf16.mxu0 %v2282_v34 }
 0x141   : > { %2188 = vmatprep.mubr.msk.bf16.mxu1 %vm2440_vm0, %v2439_v31  ;;  %2173 = vmatpush3.bf16.msra.mxu1 %v2283_v36 }
 0x142   : > { %2149 = vmatmul.mubr.bf16.vlgmr.msra.gmra.mrb[0].mxu0 %v640_v50  ;;  %2174 = vmatprep.subr.bf16.mxu1 %v2439_v31  ;;  %v2441_v50 = vmov 0  }
 0x143   : > { %1161 = vmatpush1.bf16.msra.mxu0 %v2280_v35  ;;  %1192 = vmatprep.mubr.bf16.mxu0 %v2441_v50 }
 0x144   : > { %1162 = vmatprep.subr.bf16.mxu0 %v2286_v37 }
 0x145   : > { %2175 = vmatpush3.bf16.msra.mxu1 %v2287_v41 }
 0x146   : > { %2176 = vmatprep.subr.bf16.mxu1 %v2439_v31 }
 0x147   : > { %1163 = vmatpush1.bf16.msra.mxu0 %v2284_v38 }
 0x148   : > { %1164 = vmatprep.subr.bf16.mxu0 %v2290_v42 }
 0x149   : > { %2177 = vmatpush3.bf16.msra.mxu1 %v2291_v44 }
 0x14a   : > { %2178 = vmatprep.subr.bf16.mxu1 %v2439_v31 }
 0x14b   : > { %1165 = vmatpush1.bf16.msra.mxu0 %v2288_v43 }
 0x14c   : > { %1166 = vmatprep.subr.bf16.mxu0 %v2294_v45 }
 0x14d   : > { %2179 = vmatpush3.bf16.msra.mxu1 %v2295_v47 }
 0x14e   : > { %2180 = vmatprep.subr.bf16.mxu1 %v2439_v31 }
 0x14f   : > { %1167 = vmatpush1.bf16.msra.mxu0 %v2292_v46 }
 0x150   : > { %1168 = vmatprep.subr.bf16.mxu0 %v2298_v48 }
 0x153   : > { %1169 = vmatpush1.bf16.msra.mxu0 %v2296_v49 }
 0x213   : > { %v844_v55 = vpop.f32.mrb[0].mxu1 }
 0x214   : > { %v2170_v58 = vpop.f32.mrb[1].mxu1  ;;  %v860_v59 = vadd.f32 %v852_v51, %v844_v55  ;;  %v858_v60 = vadd.f32 %v850_v52, %v844_v55  ;;  %v861_v61 = vadd.f32 %v853_v53, %v844_v55  ;;  %v859_v62 = vadd.f32 %v851_v54, %v844_v55  ;;  %v2299_v51 = vld [vmem:[%s2989_s10 + $0x68] ss:$12 sps:$4 sm:$0xff]   ;;  %v2300_v53 = vld [vmem:[%s2989_s10 + $0x78] ss:$12 sps:$4 sm:$0xff]  }
 0x215   : > { %v847_v0 = vpop.f32.mrb[2].mxu1  ;;  %v863_v5 = vadd.f32 %v855_v57, %v844_v55  ;;  %v862_v7 = vadd.f32 %v854_v63, %v844_v55  ;;  %v865_v11 = vadd.f32 %v857_v8, %v844_v55  ;;  %v864_v13 = vadd.f32 %v856_v9, %v844_v55  ;;  %v2302_v52 = vld [vmem:[%s2989_s10 + $0x7c] ss:$12 sps:$4 sm:$0xff]   ;;  %2181 = vmatpush3.bf16.msra.mxu1 %v2299_v51  ;;  %v2303_v54 = vld [vmem:[%s2989_s10 + $0x80] ss:$12 sps:$4 sm:$0xff]   ;;  %v2772_v63 = vpop.f32.mrb[0].mxu0 }
 0x216   : > { %v2171_v1 = vpop.f32.mrb[3].mxu1  ;;  %v875_v2 = vadd.f32 %v1953_v56, %v860_v59  ;;  %v873_v3 = vadd.f32 %v1953_v56, %v858_v60  ;;  %v876_v4 = vadd.f32 %v1953_v56, %v861_v61  ;;  %v874_v6 = vadd.f32 %v1953_v56, %v859_v62  ;;  %1170 = vmatprep.subr.bf16.mxu0 %v2302_v52  ;;  %v2306_v55 = vld [vmem:[%s2989_s10 + $0x94] ss:$12 sps:$4 sm:$0xff]   ;;  %v2307_v57 = vld [vmem:[%s2989_s10 + $0x98] ss:$12 sps:$4 sm:$0xff]   ;;  %v2150_v0 = vpop.f32.mrb[1].mxu0 }
 0x217   : > { %v878_v10 = vadd.f32 %v1953_v56, %v863_v5  ;;  %v877_v12 = vadd.f32 %v1953_v56, %v862_v7  ;;  %v880_v14 = vadd.f32 %v1953_v56, %v865_v11  ;;  %v879_v15 = vadd.f32 %v1953_v56, %v864_v13  ;;  %2182 = vmatprep.subr.bf16.mxu1 %v2439_v31  ;;  %v2304_v56 = vld [vmem:[%s2989_s10 + $0x90] ss:$12 sps:$4 sm:$0xff]   ;;  %v2310_v58 = vld [vmem:[%s2989_s10 + $0xac] ss:$12 sps:$4 sm:$0xff]   ;;  %v2308_v59 = vld [vmem:[%s2989_s10 + $0xa8] ss:$12 sps:$4 sm:$0xff]  }
 0x218   : > { %2368 = vtanh.f32 %v875_v2  ;;  %1171 = vmatpush1.bf16.msra.mxu0 %v2300_v53  ;;  %v2311_v60 = vld [vmem:[%s2989_s10 + $0xb0] ss:$12 sps:$4 sm:$0xff]   ;;  %v742_v1 = vpop.f32.mrb[2].mxu0 }
 0x219   : > { %2370 = vtanh.f32 %v873_v3  ;;  %2183 = vmatpush3.bf16.msra.mxu1 %v2303_v54  ;;  %1172 = vmatprep.subr.bf16.mxu0 %v2306_v55  ;;  %v2314_v61 = vld [vmem:[%s2990_s11 + $0x4] ss:$12 sps:$4 sm:$0xff]   ;;  %v2151_v2 = vpop.f32.mrb[3].mxu0  ;;  %v968_v55 = vld [vmem:[%s2982_s3 + $0x8] sm:$0xff]  ;;  %v970_v0 = vld [vmem:[%s2982_s3 + $0x18] sm:$0xff] }
 0x21a   : > { %2372 = vtanh.f32 %v876_v4  ;;  %2184 = vmatprep.subr.bf16.mxu1 %v2439_v31  ;;  %v2317_v62 = vld [vmem:[%s3000_s24 + $0x4] ss:$12 sps:$4 sm:$0xff]  }
 0x21b   : > { %2374 = vtanh.f32 %v874_v6  ;;  %v967_v54 = vld [vmem:[%s2982_s3] sm:$0xff] }
 0x21c   : > { %2376 = vtanh.f32 %v878_v10  ;;  %1173 = vmatpush1.bf16.msra.mxu0 %v2304_v56 }
 0x21d   : > { %2378 = vtanh.f32 %v877_v12  ;;  %2185 = vmatpush3.bf16.msra.mxu1 %v2307_v57  ;;  %1174 = vmatprep.subr.bf16.mxu0 %v2310_v58 }
 0x21e   : > { %2380 = vtanh.f32 %v880_v14  ;;  %2186 = vmatprep.subr.bf16.mxu1 %v2439_v31 }
 0x21f   : > { %2382 = vtanh.f32 %v879_v15 }
 0x220   : > { %1175 = vmatpush1.bf16.msra.mxu0 %v2308_v59  ;;  %v969_v59 = vld [vmem:[%s2982_s3 + $0x10] sm:$0xff] }
 0x221   : > { %2187 = vmatpush3.bf16.msra.mxu1 %v2311_v60  ;;  %1555 = vmatprep.subr.bf16.mxu0 %v2314_v61 }
 0x222   : > { %v2369_v17 = vpop.eup %2368  ;;  %1277 = vmatprep.subr.bf16.mxu1 %v2317_v62 }
 0x223   : > { %v2371_v18 = vpop.eup %2370  ;;  %v898_v19 = vmul.f32 %v2369_v17, %v1954_v16 }
 0x224   : > { %v2373_v20 = vpop.eup %2372  ;;  %v896_v21 = vmul.f32 %v2371_v18, %v1954_v16 }
 0x225   : > { %v2375_v22 = vpop.eup %2374  ;;  %908 = vadd.xlane.f32.xlu1 %v898_v19  ;;  %v899_v23 = vmul.f32 %v2373_v20, %v1954_v16 }
 0x226   : > { %904 = vadd.xlane.f32.xlu0 %v896_v21  ;;  %v2377_v24 = vpop.eup %2376  ;;  %v897_v25 = vmul.f32 %v2375_v22, %v1954_v16 }
 0x227   : > { %v2379_v26 = vpop.eup %2378  ;;  %v901_v27 = vmul.f32 %v2377_v24, %v1954_v16 }
 0x228   : > { %v2381_v28 = vpop.eup %2380  ;;  %v900_v29 = vmul.f32 %v2379_v26, %v1954_v16 }
 0x229   : > { %910 = vadd.xlane.f32.xlu1 %v899_v23  ;;  %v2383_v30 = vpop.eup %2382  ;;  %v903_v32 = vmul.f32 %v2381_v28, %v1954_v16 }
 0x22a   : > { %906 = vadd.xlane.f32.xlu0 %v897_v25  ;;  %v902_v33 = vmul.f32 %v2383_v30, %v1954_v16 }
 0x22d   : > { %914 = vadd.xlane.f32.xlu1 %v901_v27 }
 0x22e   : > { %912 = vadd.xlane.f32.xlu0 %v900_v29 }
 0x231   : > { %918 = vadd.xlane.f32.xlu1 %v903_v32 }
 0x232   : > { %916 = vadd.xlane.f32.xlu0 %v902_v33 }
 0x2b2   : > { %v909_v3 = vpop.xlane.xlu1 %908 }
 0x2b3   : > { %v905_v4 = vpop.xlane.xlu0 %904 }
 0x2b6   : > { %v911_v5 = vpop.xlane.xlu1 %910 }
 0x2b7   : > { %v907_v6 = vpop.xlane.xlu0 %906 }
 0x2ba   : > { %v915_v7 = vpop.xlane.xlu1 %914 }
 0x2bb   : > { %v913_v8 = vpop.xlane.xlu0 %912  ;;  %v921_v9 = vmax.f32 %v907_v6, %v915_v7 }
 0x2bc   : > { %v920_v10 = vmax.f32 %v905_v4, %v913_v8 }
 0x2be   : > { %v919_v11 = vpop.xlane.xlu1 %918  ;;  %v924_v15 = vmax.f32 %v920_v10, %v921_v9 }
 0x2bf   : > { %v923_v12 = vmax.f32 %v911_v5, %v919_v11  ;;  %v917_v13 = vpop.xlane.xlu0 %916 }
 0x2c0   : > { %v922_v14 = vmax.f32 %v909_v3, %v917_v13 }
 0x2c2   : > { %v925_v16 = vmax.f32 %v922_v14, %v923_v12  ;;  %v973_v12 = vld [vmem:[%s2982_s3 + $0x30] sm:$0xff] }
 0x2c4   : > { %v926_v17 = vmax.f32 %v924_v15, %v925_v16  ;;  %v974_v16 = vld [vmem:[%s2982_s3 + $0x38] sm:$0xff] }
 0x2c6   : > { %v927_v18 = vsub.f32 %v905_v4, %v926_v17  ;;  %v928_v19 = vsub.f32 %v907_v6, %v926_v17  ;;  %v929_v20 = vsub.f32 %v909_v3, %v926_v17  ;;  %v930_v21 = vsub.f32 %v911_v5, %v926_v17  ;;  %v971_v4 = vld [vmem:[%s2982_s3 + $0x20] sm:$0xff] }
 0x2c7   : > { %v931_v24 = vsub.f32 %v913_v8, %v926_v17  ;;  %v932_v26 = vsub.f32 %v915_v7, %v926_v17  ;;  %v933_v28 = vsub.f32 %v917_v13, %v926_v17  ;;  %v934_v30 = vsub.f32 %v919_v11, %v926_v17  ;;  %v972_v8 = vld [vmem:[%s2982_s3 + $0x28] sm:$0xff] }
 0x2c8   : > { %v935_v22 = vmul.f32 1.442695, %v927_v18  ;;  %v937_v23 = vmul.f32 1.442695, %v928_v19  ;;  %v939_v25 = vmul.f32 1.442695, %v929_v20 }
 0x2c9   : > { %v941_v27 = vmul.f32 1.442695, %v930_v21  ;;  %v943_v29 = vmul.f32 1.442695, %v931_v24  ;;  %v945_v32 = vmul.f32 1.442695, %v932_v26 }
 0x2ca   : > { %2384 = vpow2.f32 %v935_v22  ;;  %v947_v33 = vmul.f32 1.442695, %v933_v28  ;;  %v949_v34 = vmul.f32 1.442695, %v934_v30  ;;  %v2312_v22 = vld [vmem:[%s2990_s11] ss:$12 sps:$4 sm:$0xff]   ;;  %v990_v30 = vpack.c.bf16 %v2772_v63, %v2772_v63 }
 0x2cb   : > { %2386 = vpow2.f32 %v937_v23  ;;  %v2315_v23 = vld [vmem:[%s3000_s24] ss:$12 sps:$4 sm:$0xff]   ;;  %v2323_v26 = vld [vmem:[%s3000_s24 + $0x1c] ss:$12 sps:$4 sm:$0xff]   ;;  %v2321_v28 = vld [vmem:[%s3000_s24 + $0x18] ss:$12 sps:$4 sm:$0xff]  }
 0x2cc   : > { %2388 = vpow2.f32 %v939_v25  ;;  %v2320_v25 = vld [vmem:[%s2990_s11 + $0x1c] ss:$12 sps:$4 sm:$0xff]  }
 0x2cd   : > { %2390 = vpow2.f32 %v941_v27  ;;  %v2318_v27 = vld [vmem:[%s2990_s11 + $0x18] ss:$12 sps:$4 sm:$0xff]   ;;  %v2328_v63 = vld [vmem:[%s2990_s11 + $0x48] ss:$12 sps:$4 sm:$0xff]  }
 0x2ce   : > { %2392 = vpow2.f32 %v943_v29  ;;  %v2326_v29 = vld [vmem:[%s2990_s11 + $0x34] ss:$12 sps:$4 sm:$0xff]  }
 0x2cf   : > { %2394 = vpow2.f32 %v945_v32  ;;  %v2324_v32 = vld [vmem:[%s2990_s11 + $0x30] ss:$12 sps:$4 sm:$0xff]  }
 0x2d0   : > { %2396 = vpow2.f32 %v947_v33  ;;  %v2327_v33 = vld [vmem:[%s3000_s24 + $0x8] ss:$12 sps:$4 sm:$0xff]  }
 0x2d1   : > { %2398 = vpow2.f32 %v949_v34  ;;  %v2331_v34 = vld [vmem:[%s3000_s24 + $0x20] ss:$12 sps:$4 sm:$0xff]  }
 0x2d4   : > { %v2385_v35 = vpop.eup %2384 }
 0x2d5   : > { %v2387_v36 = vpop.eup %2386 }
 0x2d6   : > { %v951_v37 = vadd.f32 %v2387_v36, %v2385_v35  ;;  %v2389_v38 = vpop.eup %2388 }
 0x2d7   : > { %v2391_v42 = vpop.eup %2390 }
 0x2d8   : > { %v952_v41 = vadd.f32 %v2389_v38, %v951_v37  ;;  %v2393_v44 = vpop.eup %2392  ;;  %v2341_v37 = vld [vmem:[%s2990_s11 + $0x8] ss:$12 sps:$4 sm:$0xff]  }
 0x2d9   : > { %v2395_v46 = vpop.eup %2394 }
 0x2da   : > { %v953_v43 = vadd.f32 %v2391_v42, %v952_v41  ;;  %v2397_v48 = vpop.eup %2396  ;;  %v2335_v41 = vld [vmem:[%s2990_s11 + $0x78] ss:$12 sps:$4 sm:$0xff]  }
 0x2db   : > { %v2399_v51 = vpop.eup %2398 }
 0x2dc   : > { %v954_v45 = vadd.f32 %v2393_v44, %v953_v43  ;;  %v2340_v43 = vld [vmem:[%s2990_s11 + $0x94] ss:$12 sps:$4 sm:$0xff]  }
 0x2de   : > { %v955_v47 = vadd.f32 %v2395_v46, %v954_v45  ;;  %v2346_v45 = vld [vmem:[%s2990_s11 + $0x38] ss:$12 sps:$4 sm:$0xff]  }
 0x2e0   : > { %v956_v49 = vadd.f32 %v2397_v48, %v955_v47  ;;  %v2342_v47 = vld [vmem:[%s2990_s11 + $0xa8] ss:$12 sps:$4 sm:$0xff]  }
 0x2e2   : > { %v957_v52 = vadd.f32 %v2399_v51, %v956_v49  ;;  %v2348_v49 = vld [vmem:[%s2990_s11 + $0x68] ss:$12 sps:$4 sm:$0xff]  }
 0x2e4   : > { %2400 = vrcp.f32 %v957_v52  ;;  %v2350_v52 = vld [vmem:[%s2990_s11 + $0x98] ss:$12 sps:$4 sm:$0xff]  }
 0x2ee   : > { %v2401_v53 = vpop.eup %2400 }
 0x2ef   : > { %v959_v56 = vmul.f32 %v2401_v53, %v2385_v35  ;;  %v960_v57 = vmul.f32 %v2401_v53, %v2387_v36  ;;  %v961_v58 = vmul.f32 %v2401_v53, %v2389_v38  ;;  %v962_v60 = vmul.f32 %v2401_v53, %v2391_v42  ;;  %v2334_v35 = vld [vmem:[%s2990_s11 + $0x64] ss:$12 sps:$4 sm:$0xff]   ;;  %v2332_v36 = vld [vmem:[%s2990_s11 + $0x60] ss:$12 sps:$4 sm:$0xff]   ;;  %v2337_v38 = vld [vmem:[%s2990_s11 + $0x7c] ss:$12 sps:$4 sm:$0xff]  }
 0x2f0   : > { %v963_v1 = vmul.f32 %v2401_v53, %v2393_v44  ;;  %v964_v5 = vmul.f32 %v2401_v53, %v2395_v46  ;;  %v965_v9 = vmul.f32 %v2401_v53, %v2397_v48  ;;  %v966_v13 = vmul.f32 %v2401_v53, %v2399_v51  ;;  %v2345_v42 = vld [vmem:[%s2990_s11 + $0x20] ss:$12 sps:$4 sm:$0xff]   ;;  %v2338_v44 = vld [vmem:[%s2990_s11 + $0x90] ss:$12 sps:$4 sm:$0xff]  }
 0x2f1   : > { %v975_v61 = vmul.f32 %v967_v54, %v959_v56  ;;  %v976_v62 = vmul.f32 %v968_v55, %v960_v57  ;;  %v977_v2 = vmul.f32 %v969_v59, %v961_v58  ;;  %v978_v6 = vmul.f32 %v970_v0, %v962_v60  ;;  %v2344_v46 = vld [vmem:[%s2990_s11 + $0xac] ss:$12 sps:$4 sm:$0xff]   ;;  %v2347_v48 = vld [vmem:[%s2990_s11 + $0x50] ss:$12 sps:$4 sm:$0xff]   ;;  %v2352_v54 = vld [vmem:[%s2993_s14 + $0x40] sm:$0xff]  }
 0x2f2   : > { %v979_v10 = vmul.f32 %v971_v4, %v963_v1  ;;  %v980_v14 = vmul.f32 %v972_v8, %v964_v5  ;;  %v981_v17 = vmul.f32 %v973_v12, %v965_v9  ;;  %v982_v19 = vmul.f32 %v974_v16, %v966_v13  ;;  %v2349_v51 = vld [vmem:[%s2990_s11 + $0x80] ss:$12 sps:$4 sm:$0xff]   ;;  %v2351_v53 = vld [vmem:[%s2990_s11 + $0xb0] ss:$12 sps:$4 sm:$0xff]  }
 0x2f3   : > { %v983_v3 = vadd.f32 %v976_v62, %v975_v61  ;;  %v2353_v55 = vld [vmem:[%s2993_s14] sm:$0xff]   ;;  %v2354_v56 = vld [vmem:[%s2993_s14 + $0x48] sm:$0xff]   ;;  %v2357_v58 = vld [vmem:[%s2993_s14 + $0x10] sm:$0xff]  }
 0x2f4   : > { %v2355_v57 = vld [vmem:[%s2993_s14 + $0x8] sm:$0xff]   ;;  %v2358_v59 = vld [vmem:[%s2993_s14 + $0x58] sm:$0xff]   ;;  %v2360_v61 = vld [vmem:[%s2993_s14 + $0x60] sm:$0xff]  }
 0x2f5   : > { %v984_v7 = vadd.f32 %v983_v3, %v977_v2  ;;  %v2359_v60 = vld [vmem:[%s2993_s14 + $0x18] sm:$0xff]   ;;  %v2361_v62 = vld [vmem:[%s2993_s14 + $0x20] sm:$0xff]   ;;  %v2362_v0 = vld [vmem:[%s2993_s14 + $0x68] sm:$0xff]  }
 0x2f6   : > { %v2363_v1 = vld [vmem:[%s2993_s14 + $0x28] sm:$0xff]   ;;  %v2364_v2 = vld [vmem:[%s2993_s14 + $0x70] sm:$0xff]   ;;  %v2366_v4 = vld [vmem:[%s2993_s14 + $0x78] sm:$0xff]  }
 0x2f7   : > { %v985_v11 = vadd.f32 %v984_v7, %v978_v6  ;;  %v2365_v3 = vld [vmem:[%s2993_s14 + $0x30] sm:$0xff]   ;;  %v2367_v5 = vld [vmem:[%s2993_s14 + $0x38] sm:$0xff]  }
 0x2f9   : > { %v986_v15 = vadd.f32 %v985_v11, %v979_v10 }
 0x2fb   : > { %v987_v18 = vadd.f32 %v986_v15, %v980_v14 }
 0x2fd   : > { %v988_v20 = vadd.f32 %v987_v18, %v981_v17 }
 0x2ff   : > { %v989_v21 = vadd.f32 %v988_v20, %v982_v19  ;;  %v1360_v19 = vlaneseq }
 0x301   : > { %v2804_v24 = vpack.c.bf16 %v989_v21, %v989_v21  ;;  %v1361_v21 = vshrl.u32 %v1360_v19, 7 }
 0x303   : > { %1193 = vmatmul.mubr.bf16.vlgmr.msra.gmra.mrb[4].mxu0 %v2804_v24  ;;  %2189 = vmatmul.mubr.bf16.vlgmr.msra.gmra.mrb[4].mxu1 %v2804_v24 }
 0x304   : > { %1556 = vmatpush1.bf16.msra.mxu0 %v2312_v22  ;;  %1278 = vmatpush1.bf16.msra.mxu1 %v2315_v23 }
 0x305   : > { %1557 = vmatprep.subr.bf16.mxu0 %v2320_v25  ;;  %1279 = vmatprep.subr.bf16.mxu1 %v2323_v26  ;;  %v1362_v26 = vsub.s32 0, %v1361_v21 }
 0x306   : > { %1309 = vmatprep.mubr.bf16.mxu1 %v2441_v50  ;;  %1587 = vmatprep.mubr.bf16.mxu0 %v2441_v50  ;;  %v2330_v50 = vld [vmem:[%s2990_s11 + $0x4c] ss:$12 sps:$4 sm:$0xff]  }
 0x308   : > { %1558 = vmatpush1.bf16.msra.mxu0 %v2318_v27  ;;  %1280 = vmatpush1.bf16.msra.mxu1 %v2321_v28  ;;  %v1358_v28 = vld [vmem:[%s2991_s12] sm:$0x7] }
 0x309   : > { %1559 = vmatprep.subr.bf16.mxu0 %v2326_v29  ;;  %2192 = vmatprep.subr.bf16.mxu1 %v2439_v31  ;;  %v1366_v29 = vsub.s32 1, %v1361_v21 }
 0x30b   : > { %1985 = vmatmul.mubr.msk.bf16.vlgmr.msra.gmra.mrb[8].mxu1 %vm1273_vm1, %v990_v30 }
 0x30c   : > { %1560 = vmatpush1.bf16.msra.mxu0 %v2324_v32  ;;  %2193 = vmatpush3.bf16.msra.mxu1 %v2327_v33  ;;  %v1367_v32 = vrot.slane %v1358_v28, %v1366_v29  ;;  %v1410_v33 = vld [vmem:[%s2992_s13] sm:$0x7] }
 0x30d   : > { %1561 = vmatprep.subr.bf16.mxu0 %v2330_v50  ;;  %2194 = vmatprep.subr.bf16.mxu1 %v2439_v31 }
 0x30e   : > { %2196 = vmatprep.mubr.msk.bf16.mxu1 %vm2440_vm0, %v2439_v31 }
 0x310   : > { %1562 = vmatpush1.bf16.msra.mxu0 %v2328_v63  ;;  %2195 = vmatpush3.bf16.msra.mxu1 %v2331_v34  ;;  %v1415_v63 = vrot.slane %v1410_v33, %v1362_v26 }
 0x311   : > { %1563 = vmatprep.subr.bf16.mxu0 %v2334_v35  ;;  %2200 = vmatprep.subr.bf16.mxu1 %v2439_v31  ;;  %v1419_v35 = vrot.slane %v1410_v33, %v1366_v29 }
 0x313   : > { %2197 = vmatmul.mubr.msk.bf16.vlgmr.msra.gmra.mrb[12].mxu1 %vm1273_vm1, %v990_v30  ;;  %v1363_v30 = vrot.slane %v1358_v28, %v1362_v26 }
 0x314   : > { %1564 = vmatpush1.bf16.msra.mxu0 %v2332_v36  ;;  %2201 = vmatpush3.bf16.msra.mxu1 %v2341_v37 }
 0x315   : > { %1565 = vmatprep.subr.bf16.mxu0 %v2337_v38  ;;  %2202 = vmatprep.subr.bf16.mxu1 %v2439_v31 }
 0x316   : > { %2216 = vmatprep.mubr.msk.bf16.mxu1 %vm2440_vm0, %v2439_v31 }
 0x318   : > { %1566 = vmatpush1.bf16.msra.mxu0 %v2335_v41  ;;  %2203 = vmatpush3.bf16.msra.mxu1 %v2345_v42 }
 0x319   : > { %1567 = vmatprep.subr.bf16.mxu0 %v2340_v43  ;;  %2204 = vmatprep.subr.bf16.mxu1 %v2439_v31 }
 0x31c   : > { %1568 = vmatpush1.bf16.msra.mxu0 %v2338_v44  ;;  %2205 = vmatpush3.bf16.msra.mxu1 %v2346_v45 }
 0x31d   : > { %1569 = vmatprep.subr.bf16.mxu0 %v2344_v46  ;;  %2206 = vmatprep.subr.bf16.mxu1 %v2439_v31 }
 0x320   : > { %1570 = vmatpush1.bf16.msra.mxu0 %v2342_v47  ;;  %2207 = vmatpush3.bf16.msra.mxu1 %v2347_v48 }
 0x321   : > { %2208 = vmatprep.subr.bf16.mxu1 %v2439_v31  ;;  %2086 = vmatprep.subr.bf16.mxu0 %v2352_v54  ;;  %v1370_v54 = vsub.s32 2, %v1361_v21 }
 0x323   : > { %1588 = vmatmul.mubr.bf16.vlgmr.msra.gmra.mrb[8].mxu0 %v2643_v40 }
 0x324   : > { %1825 = vmatprep.mubr.bf16.mxu0 %v2804_v24  ;;  %2209 = vmatpush3.bf16.msra.mxu1 %v2348_v49 }
 0x325   : > { %2210 = vmatprep.subr.bf16.mxu1 %v2439_v31  ;;  %2087 = vmatpush3.bf16.msra.mxu0 %v2353_v55 }
 0x326   : > { %2088 = vmatprep.subr.bf16.mxu0 %v2354_v56  ;;  %v1423_v56 = vrot.slane %v1410_v33, %v1370_v54 }
 0x328   : > { %2211 = vmatpush3.bf16.msra.mxu1 %v2349_v51 }
 0x329   : > { %2212 = vmatprep.subr.bf16.mxu1 %v2439_v31  ;;  %2089 = vmatpush3.bf16.msra.mxu0 %v2355_v57 }
 0x32c   : > { %2213 = vmatpush3.bf16.msra.mxu1 %v2350_v52 }
 0x32d   : > { %2214 = vmatprep.subr.bf16.mxu1 %v2439_v31 }
 0x330   : > { %2215 = vmatpush3.bf16.msra.mxu1 %v2351_v53 }
 0x333   : > { %2217 = vmatmul.mubr.bf16.vlgmr.msra.gmra.mrb[16].mxu1 %v2643_v40  ;;  %v2356_v40 = vld [vmem:[%s2993_s14 + $0x50] sm:$0xff]  }
 0x334   : > { %2090 = vmatprep.subr.bf16.mxu0 %v2356_v40  ;;  %v1371_v40 = vrot.slane %v1358_v28, %v1370_v54 }
 0x335   : > { %2091 = vmatpush3.bf16.msra.mxu0 %v2357_v58 }
 0x336   : > { %2092 = vmatprep.subr.bf16.mxu0 %v2358_v59 }
 0x339   : > { %2093 = vmatpush3.bf16.msra.mxu0 %v2359_v60 }
 0x33a   : > { %2094 = vmatprep.subr.bf16.mxu0 %v2360_v61 }
 0x33d   : > { %2095 = vmatpush3.bf16.msra.mxu0 %v2361_v62 }
 0x33e   : > { %2096 = vmatprep.subr.bf16.mxu0 %v2362_v0 }
 0x341   : > { %2097 = vmatpush3.bf16.msra.mxu0 %v2363_v1 }
 0x342   : > { %2098 = vmatprep.subr.bf16.mxu0 %v2364_v2 }
 0x345   : > { %2099 = vmatpush3.bf16.msra.mxu0 %v2365_v3 }
 0x346   : > { %2100 = vmatprep.subr.bf16.mxu0 %v2366_v4 }
 0x349   : > { %2101 = vmatpush3.bf16.msra.mxu0 %v2367_v5 }
 0x3d6   : > { %v1194_v6 = vpop.f32.mrb[4].mxu0  ;;  %v1235_v7 = vpop.f32.mrb[4].mxu1 }
 0x3d7   : > { %v1196_v8 = vpop.f32.mrb[5].mxu0  ;;  %v2190_v9 = vpop.f32.mrb[5].mxu1 }
 0x3d8   : > { %v1198_v10 = vpop.f32.mrb[6].mxu0  ;;  %v1238_v11 = vpop.f32.mrb[6].mxu1 }
 0x3d9   : > { %v1199_v12 = vpop.f32.mrb[7].mxu0  ;;  %v2191_v13 = vpop.f32.mrb[7].mxu1  ;;  %v2013_v10 = vld [vmem:[%s2994_s15] ss:$0 sm:$0xff] }
 0x3de   : > { %v1311_v14 = vpop.f32.mrb[8].mxu1 }
 0x3df   : > { %v1312_v15 = vadd.f32 %v1311_v14, %v1194_v6  ;;  %v1313_v16 = vpop.f32.mrb[9].mxu1 }
 0x3e0   : > { %v1314_v17 = vadd.f32 %v1313_v16, %v1196_v8  ;;  %v1315_v18 = vpop.f32.mrb[10].mxu1 }
 0x3e1   : > { %v1316_v20 = vpop.f32.mrb[11].mxu1  ;;  %v1375_v50 = vadd.f32 %v1363_v30, %v1312_v15 }
 0x3e2   : > { %v1376_v34 = vadd.f32 %v1367_v32, %v1314_v17 }
 0x3e3   : > { %v2238_v36 = vadd.f32 %v1415_v63, %v1375_v50  ;;  %v1875_v63 = vstv %s1874_s29 }
 0x3e4   : > { %v2242_v38 = vadd.f32 %v1419_v35, %v1376_v34  ;;  %vm1876_vm4 = vcmp.eq.s32.totalorder %v1875_v63, 1 }
 0x3e6   : > { %v1352_v22 = vpop.f32.mrb[12].mxu1 }
 0x3e7   : > { %v1353_v23 = vadd.f32 %v1352_v22, %v1235_v7  ;;  %v2198_v24 = vpop.f32.mrb[13].mxu1 }
 0x3e8   : > { %v1355_v25 = vpop.f32.mrb[14].mxu1 }
 0x3e9   : > { %v2199_v27 = vpop.f32.mrb[15].mxu1  ;;  %v1377_v61 = vadd.f32 %v1371_v40, %v1353_v23  ;;  %v1846_v23 = vand.u32 127, %v1360_v19 }
 0x3f6   : > { %v1589_v37 = vpop.f32.mrb[8].mxu0 }
 0x3f7   : > { %v2239_v41 = vadd.f32 %v2238_v36, %v1589_v37  ;;  %v1591_v42 = vpop.f32.mrb[9].mxu0 }
 0x3f8   : > { %v2243_v43 = vadd.f32 %v2242_v38, %v1591_v42  ;;  %v1593_v44 = vpop.f32.mrb[10].mxu0 }
 0x3f9   : > { %v2011_v45 = vmul.f32 -1.442695, %v2239_v41  ;;  %v1594_v46 = vpop.f32.mrb[11].mxu0 }
 0x3fa   : > { %v2012_v47 = vmul.f32 -1.442695, %v2243_v43 }
 0x3fb   : > { %2402 = vpow2.f32 %v2011_v45 }
 0x3fc   : > { %2404 = vpow2.f32 %v2012_v47 }
 0x405   : > { %v2403_v48 = vpop.eup %2402 }
 0x406   : > { %v1640_v49 = vadd.f32 1.0, %v2403_v48  ;;  %v1630_v51 = vpop.f32.mrb[16].mxu1  ;;  %v2405_v57 = vpop.eup %2404 }
 0x407   : > { %v2218_v52 = vpop.f32.mrb[17].mxu1  ;;  %v1647_v58 = vadd.f32 1.0, %v2405_v57  ;;  %v1631_v59 = vadd.f32 %v1630_v51, %v1423_v56 }
 0x408   : > { %2406 = vrcp.f32 %v1640_v49  ;;  %v1633_v53 = vpop.f32.mrb[18].mxu1 }
 0x409   : > { %v2219_v55 = vpop.f32.mrb[19].mxu1  ;;  %2408 = vrcp.f32 %v1647_v58 }
 0x412   : > { %v2407_v60 = vpop.eup %2406 }
 0x413   : > { %v1650_v62 = vmul.f32 %v2407_v60, %v1631_v59  ;;  %v2409_v1 = vpop.eup %2408 }
 0x414   : > { %v1653_v2 = vsub.f32 1.0, %v2409_v1  ;;  %v1655_v5 = vmul.f32 %v2409_v1, %v2638_v39 }
 0x415   : > { %v1651_v0 = vadd.f32 %v1650_v62, %v1377_v61 }
 0x417   : > { %2410 = vtanh.f32 %v1651_v0 }
 0x421   : > { %v2411_v3 = vpop.eup %2410 }
 0x422   : > { %v1654_v4 = vmul.f32 %v2411_v3, %v1653_v2 }
 0x424   : > { %v1656_v6 = vadd.f32 %v1655_v5, %v1654_v4 }
 0x426   : > { %v1657_v7 = vpack.c.bf16 %v1656_v6, %v1656_v6  ;;  %1844 = vst [vmem:[#allocation2] sm:$0xff] %v1656_v6 }
 0x428   : > { %1826 = vmatmul.mubr.bf16.vlgmr.msra.gmra.mrb[12].mxu0 %v1657_v7 }
 0x4fb   : > { %v2102_v8 = vpop.f32.mrb[12].mxu0 }
 0x4fc   : > { %v2103_v9 = vpop.f32.mrb[13].mxu0 }
 0x4fd   : > { %v2104_v11 = vadd.f32 %v2103_v9, %v2102_v8  ;;  %v2105_v12 = vpop.f32.mrb[14].mxu0 }
 0x4fe   : > { %v2106_v13 = vpop.f32.mrb[15].mxu0 }
 0x4ff   : > { %v1828_v14 = vadd.f32 %v2104_v11, %v2013_v10 }
 0x501   : > { %1833 = vmax.xlane.f32.xlu0 %v1828_v14 }
 0x58e   : > { %v1834_v15 = vpop.xlane.xlu0 %1833 }
 0x58f   : > { %v1835_v16 = vsub.f32 %v1828_v14, %v1834_v15 }
 0x591   : > { %v1836_v17 = vmul.f32 1.442695, %v1835_v16 }
 0x593   : > { %2412 = vpow2.f32 %v1836_v17 }
 0x59d   : > { %v2413_v39 = vpop.eup %2412 }
 0x59e   : > { %1838 = vadd.xlane.f32.xlu1 %v2413_v39 }
 0x62b   : > { %v1839_v18 = vpop.xlane.xlu1 %1838 }
 0x62c   : > { %2414 = vlog2.f32 %v1839_v18 }
 0x636   : > { %v2415_v20 = vpop.eup %2414 }
 0x637   : > { %v1841_v21 = vmul.f32 0.6931472, %v2415_v20 }
 0x639   : > { %v1842_v22 = vsub.f32 %v1835_v16, %v1841_v21 }
 0x63b   : > { %1847 = vmax.xlane.f32.xlu0 %v1842_v22  ;;  %1843 = vst [vmem:[%s2545_s0] sm:$0xff] %v1842_v22  ;;  %s2031_s0 = sshll.u32 %s2536_s27, 3 }
 0x63c   : > { %s1903_s18 = scalar_lea.vmem %s2980_s1, %s2031_s0 }
 0x63d   : > { %v2032_v36 = vld [vmem:[%s1903_s18 + $0x8] sm:$0xff] }
 0x6c8   : > { %v1848_v24 = vpop.xlane.xlu0 %1847 }
 0x6c9   : > { %vm1849_vm2 = vcmp.eq.f32.partialorder %v1842_v22, %v1848_v24 }
 0x6ca   : > { %v1850_v25 = vsel %vm1849_vm2, %v1846_v23, 128 }
 0x6cb   : > { %v1852_v26 = vshra.s32 %v1850_v25, 16  ;;  %v1851_v28 = vand.u32 65535, %v1850_v25 }
 0x6cd   : > { %v1854_v27 = vcvt.s32.f32 %v1852_v26  ;;  %v1853_v30 = vcvt.s32.f32 %v1851_v28 }
 0x6cf   : > { %1855 = vmin.xlane.f32.xlu1 %v1854_v27 }
 0x75c   : > { %v1856_v29 = vpop.xlane.xlu1 %1855 }
 0x75d   : > { %vm1857_vm3 = vcmp.eq.f32.partialorder %v1854_v27, %v1856_v29  ;;  %v1862_v33 = vcvt.f32.s32 %v1856_v29 }
 0x75e   : > { %v1858_v32 = vsel %vm1857_vm3, %v1853_v30, inf }
 0x75f   : > { %1859 = vmin.xlane.f32.xlu0 %v1858_v32  ;;  %v1863_v19 = vshll.u32 %v1862_v33, 16 }
 0x7ec   : > { %v1860_v50 = vpop.xlane.xlu0 %1859 }
 0x7ed   : > { %v1861_v34 = vcvt.f32.s32 %v1860_v50 }
 0x7ef   : > { %v1864_v35 = vadd.s32 %v1863_v19, %v1861_v34 }
 0x7f1   : > { %vm1865_vm5 = vcmp.eq.s32.totalorder %v1846_v23, %v1864_v35 }
 0x7f2   : > { %v2030_v37 = vsel %vm1865_vm5, 1.0, %v2439_v31 }
 0x7f3   : > { %v1877_v38 = vsel %vm1876_vm4, %v2032_v36, %v2030_v37 }
 0x7f4   : > { %1878 = vst [vmem:[#allocation3] sm:$0xff] %v1877_v38 }
 0x7f5 PF: > { %s32_s26 = sadd.s32 1, %s2436_s26  }
 0x7f6   : > { %p29_p11 = scmp.ge.s32.totalorder %s32_s26, 7  }
 0x7f8   :  { %31 = sbr.rel (!%p29_p11) target bundleno = 23 (0x17), region = 112 }

</bundles_post_ra>
